<compile_context>
chip_gen: v6e
topology: v6e:2x2x1
jax: 0.10.0
libtpu: 0.0.40
codegen_flags: <defaults>
</compile_context>

<pallas_src>
import functools
import math

import jax
import jax.numpy as jnp
from jax import lax
from jax.experimental import pallas as pl
from jax.experimental.pallas import tpu as pltpu

MAX_SEQ_LENGTH = 77
LN_EPS = 1e-5


# ----------------------------------------------------------------------------
# Fused kernel: pos-add + TransformerEncoderLayer (post-norm, relu) + Gram matrix
# ----------------------------------------------------------------------------
def _fused_text_kernel(te_ref, pe_ref,
                       wqkv_ref, bqkv_ref, wo_ref, bo_ref,
                       w1_ref, b1_ref, w2_ref, b2_ref,
                       g1_ref, be1_ref, g2_ref, be2_ref,
                       pos_ref, dep_ref,
                       qkv_scr, ctx_scr,
                       *, batch, seq, num_heads, eps):
    B, S = batch, seq
    N, H = te_ref.shape                      # N = B*S, rows are b-major: row = b*S + s
    nh = num_heads
    hd = H // nh
    scale = 1.0 / math.sqrt(hd)
    inv_h = 1.0 / H                           # hoisted 1/H constant
    mm = wqkv_ref.dtype                       # dtype for the LARGE matmuls only

    def layer_norm(y, g, b):
        # single-pass LN: one sweep for sum(y) and sum(y*y); var = E[y^2] - mean^2
        mu = jnp.sum(y, axis=-1, keepdims=True) * inv_h
        ms = jnp.sum(y * y, axis=-1, keepdims=True) * inv_h
        var = ms - mu * mu
        return (y - mu) * lax.rsqrt(var + eps) * g + b

    # --- positional-encoding add (output 1); pe is (S,H), broadcast in-kernel ---
    pe_full = jnp.concatenate([pe_ref[...]] * B, axis=0)            # (N, H) f32
    x = te_ref[...].astype(jnp.float32) + pe_full
    pos_ref[...] = x.astype(pos_ref.dtype)

    # --- fused QKV projection: one matmul + one bias add (f32 accumulation) ---
    qkv = jnp.dot(x.astype(mm), wqkv_ref[...],
                  preferred_element_type=jnp.float32) + bqkv_ref[...]   # (N, 3H) f32
    qkv_scr[...] = qkv.reshape(B, S, 3 * H)   # aligned split; enables per-s gather

    # --- self-attention over the *batch* axis per sequence position s
    #     (faithful to nn.TransformerEncoderLayer with batch_first=False).
    #     Gather the B rows {b*S+s} with static scratch indexing (no 0/1 matmuls),
    #     then run ALL (s, head) attention problems as two batched einsums. ---
    q_list, k_list, v_list = [], [], []
    for s in range(S):
        qkv_s = qkv_scr[:, s, :]              # (B, 3H) — static gather, no MXU work
        for h in range(nh):
            c = h * hd
            q_list.append(qkv_s[:, c:c + hd])
            k_list.append(qkv_s[:, H + c:H + c + hd])
            v_list.append(qkv_s[:, 2 * H + c:2 * H + c + hd])
    q_all = jnp.stack(q_list, axis=0)         # (S*nh, B, hd) f32
    k_all = jnp.stack(k_list, axis=0)
    v_all = jnp.stack(v_list, axis=0)

    scores = jnp.einsum('gbd,gcd->gbc', q_all, k_all,
                        preferred_element_type=jnp.float32) * scale     # (S*nh, B, B)
    m = jnp.max(scores, axis=-1, keepdims=True)
    p = jnp.exp(scores - m)
    attn = p * pl.reciprocal(jnp.sum(p, axis=-1, keepdims=True), approx=True)
    ctx_all = jnp.einsum('gbc,gcd->gbd', attn, v_all,
                         preferred_element_type=jnp.float32)             # (S*nh, B, hd)

    # scatter back to b-major: ONE coalesced (B,H) store per s (heads merged in-register)
    for s in range(S):
        ctx_s = jnp.concatenate([ctx_all[s * nh + h] for h in range(nh)], axis=-1)
        ctx_scr[:, s, :] = ctx_s
    ctx = ctx_scr[...].reshape(N, H)          # b-major (N,H); no permutation matmul

    attn_out = jnp.dot(ctx.astype(mm), wo_ref[...],
                       preferred_element_type=jnp.float32) + bo_ref[...]

    # --- post-norm residual blocks (dropout = identity, eval mode) ---
    x1 = layer_norm(x + attn_out, g1_ref[...], be1_ref[...])
    h1 = jnp.maximum(jnp.dot(x1.astype(mm), w1_ref[...],
                             preferred_element_type=jnp.float32) + b1_ref[...], 0.0)
    ff = jnp.dot(h1.astype(mm), w2_ref[...],
                 preferred_element_type=jnp.float32) + b2_ref[...]
    y = layer_norm(x1 + ff, g2_ref[...], be2_ref[...])                  # (N, H) f32

    # --- Gram-matrix epilogue: dep_parse[b] = F_b @ F_b^T ; one batched matmul,
    #     computed in f32 regardless of matmul_dtype, ONE store ---
    y3 = y.reshape(B, S, H)
    dep_ref[...] = jnp.einsum('bsh,bth->bst', y3, y3,
                              preferred_element_type=jnp.float32).astype(dep_ref.dtype)


# ----------------------------------------------------------------------------
# Wrapper
# ----------------------------------------------------------------------------
def text_processor_forward(text_embeddings, pe, params, num_heads,
                           *, matmul_dtype=jnp.float32):
    # NOTE: keep matmul_dtype=float32 on v5e; on v6e/v7x bf16 only affects the
    # large projection/FFN matmuls (attention core / LN / softmax / Gram stay f32).
    B, S, H = text_embeddings.shape
    F = params["w1"].shape[0]
    N = B * S
    hd = H // num_heads

    te2 = text_embeddings.reshape(N, H)                     # metadata-only, b-major rows
    pe_s = pe[0, :S, :].astype(jnp.float32)                 # (S, H) — no B-broadcast in HBM

    ipw = params["in_proj_weight"]                          # (3H, H) rows [Wq; Wk; Wv]
    wqkv = ipw.T.astype(matmul_dtype)                       # (H, 3H)
    bqkv = params["in_proj_bias"][None, :].astype(jnp.float32)
    wo = params["out_proj_weight"].T.astype(matmul_dtype)   # (H, H)
    bo = params["out_proj_bias"][None, :].astype(jnp.float32)
    w1 = params["w1"].T.astype(matmul_dtype)                # (H, F)
    b1 = params["b1"][None, :].astype(jnp.float32)
    w2 = params["w2"].T.astype(matmul_dtype)                # (F, H)
    b2 = params["b2"][None, :].astype(jnp.float32)
    g1 = params["ln1_w"][None, :].astype(jnp.float32)
    be1 = params["ln1_b"][None, :].astype(jnp.float32)
    g2 = params["ln2_w"][None, :].astype(jnp.float32)
    be2 = params["ln2_b"][None, :].astype(jnp.float32)

    inputs = (te2, pe_s, wqkv, bqkv, wo, bo, w1, b1, w2, b2, g1, be1, g2, be2)

    def full(shape):
        n = len(shape)
        return pl.BlockSpec(shape, lambda i: (0,) * n)

    in_specs = [full(a.shape) for a in inputs]
    out_shape = (jax.ShapeDtypeStruct((N, H), text_embeddings.dtype),     # pos (flat)
                 jax.ShapeDtypeStruct((B, S, S), text_embeddings.dtype))  # dep_parse
    out_specs = (full((N, H)), full((B, S, S)))

    # CostEstimate without the removed sel/perm gather FLOPs.
    flops = int(2 * N * H * 3 * H                       # fused QKV
                + 2 * S * num_heads * 2 * B * B * hd    # batched scores + ctx
                + 2 * N * H * H                         # out projection
                + 2 * N * H * F * 2                     # FFN
                + 2 * B * S * S * H)                    # Gram epilogue
    transcendentals = int(S * num_heads * B * B + S * num_heads * B + 4 * N)
    bytes_accessed = int(sum(int(a.size) * a.dtype.itemsize for a in inputs)
                         + (N * H + B * S * S) * jnp.dtype(text_embeddings.dtype).itemsize)

    kernel = functools.partial(_fused_text_kernel, batch=B, seq=S,
                               num_heads=num_heads, eps=LN_EPS)

    pos2, dep_parse = pl.pallas_call(
        kernel,
        out_shape=out_shape,
        grid=(1,),
        in_specs=in_specs,
        out_specs=out_specs,
        scratch_shapes=[pltpu.VMEM((B, S, 3 * H), jnp.float32),   # per-s QKV gather view
                        pltpu.VMEM((B, S, H), jnp.float32)],      # b-major ctx scatter
        compiler_params=pltpu.CompilerParams(
            dimension_semantics=("arbitrary",),
            vmem_limit_bytes=32 * 1024 * 1024),
        cost_estimate=pl.CostEstimate(flops=flops,
                                      transcendentals=transcendentals,
                                      bytes_accessed=bytes_accessed),
    )(*inputs)

    return {
        "text_embeddings": text_embeddings,
        "positional_encodings": pos2.reshape(B, S, H),
        "dependency_parse": dep_parse,
        "pooled_output": text_embeddings[:, 0],
    }


# ----------------------------------------------------------------------------
# Parameter / buffer setup
# ----------------------------------------------------------------------------
def positional_encoding_table(hidden_size, max_seq_length):
    position = jnp.arange(max_seq_length, dtype=jnp.float32)[:, None]
    div_term = jnp.exp(jnp.arange(0, hidden_size, 2, dtype=jnp.float32)
                       * (-math.log(10000.0) / hidden_size))
    ang = position * div_term
    pe = jnp.zeros((1, max_seq_length, hidden_size), jnp.float32)
    pe = pe.at[0, :, 0::2].set(jnp.sin(ang))
    pe = pe.at[0, :, 1::2].set(jnp.cos(ang))
    return pe


def init_params(key, hidden_size, dim_feedforward):
    ks = jax.random.split(key, 4)
    H, F = hidden_size, dim_feedforward
    s = 0.02
    return {
        "in_proj_weight": jax.random.normal(ks[0], (3 * H, H), jnp.float32) * s,
        "in_proj_bias": jnp.zeros((3 * H,), jnp.float32),
        "out_proj_weight": jax.random.normal(ks[1], (H, H), jnp.float32) * s,
        "out_proj_bias": jnp.zeros((H,), jnp.float32),
        "w1": jax.random.normal(ks[2], (F, H), jnp.float32) * s,
        "b1": jnp.zeros((F,), jnp.float32),
        "w2": jax.random.normal(ks[3], (H, F), jnp.float32) * s,
        "b2": jnp.zeros((H,), jnp.float32),
        "ln1_w": jnp.ones((H,), jnp.float32),
        "ln1_b": jnp.zeros((H,), jnp.float32),
        "ln2_w": jnp.ones((H,), jnp.float32),
        "ln2_b": jnp.zeros((H,), jnp.float32),
    }


# pure-JAX reference for validation (faithful to the PyTorch module semantics)
def _reference(text_embeddings, pe, params, num_heads):
    B, S, H = text_embeddings.shape
    hd = H // num_heads
    x = text_embeddings + pe[:, :S]
    pos_encoded = x
    xt = jnp.transpose(x, (1, 0, 2))               # (S,B,H): L=B, N=S (batch_first=False)
    ipw, ipb = params["in_proj_weight"], params["in_proj_bias"]
    q = xt @ ipw[:H].T + ipb[:H]
    k = xt @ ipw[H:2 * H].T + ipb[H:2 * H]
    v = xt @ ipw[2 * H:].T + ipb[2 * H:]
    qh = q.reshape(S, B, num_heads, hd)
    kh = k.reshape(S, B, num_heads, hd)
    vh = v.reshape(S, B, num_heads, hd)
    scores = jnp.einsum("sihd,sjhd->shij", qh, kh) / math.sqrt(hd)
    attn = jax.nn.softmax(scores, axis=-1)
    ctx = jnp.einsum("shij,sjhd->sihd", attn, vh).reshape(S, B, H)
    attn_out = ctx @ params["out_proj_weight"].T + params["out_proj_bias"]

    def ln(y, g, b):
        mu = y.mean(-1, keepdims=True)
        var = ((y - mu) ** 2).mean(-1, keepdims=True)
        return (y - mu) / jnp.sqrt(var + LN_EPS) * g + b

    x1 = ln(xt + attn_out, params["ln1_w"], params["ln1_b"])
    ff = jnp.maximum(x1 @ params["w1"].T + params["b1"], 0.0) @ params["w2"].T + params["b2"]
    x2 = ln(x1 + ff, params["ln2_w"], params["ln2_b"])
    dep_features = jnp.transpose(x2, (1, 0, 2))
    dep_parse = jnp.einsum("bsh,bth->bst", dep_features, dep_features)
    return pos_encoded, dep_parse


if __name__ == "__main__":
    B, S, H = 2, 8, 32
    NUM_HEADS = 4
    FFN = 4 * H

    key = jax.random.PRNGKey(0)
    k_emb, k_par = jax.random.split(key)
    # synthetic stand-in for CLIP last_hidden_state (see TODO(synk) at top)
    text_embeddings = jax.random.normal(k_emb, (B, S, H), jnp.float32)
    pe = positional_encoding_table(H, MAX_SEQ_LENGTH)
    params = init_params(k_par, H, FFN)

    ref_pos, ref_dep = _reference(text_embeddings, pe, params, NUM_HEADS)

    # f32 matmul path (use this on v5e; strict validation)
    out = text_processor_forward(text_embeddings, pe, params, NUM_HEADS)
    jax.block_until_ready(out)
    assert jnp.allclose(out["positional_encodings"], ref_pos, atol=2e-3, rtol=2e-3)
    assert jnp.allclose(out["dependency_parse"], ref_dep, atol=2e-3, rtol=2e-3)
    assert out["pooled_output"].shape == (B, H)

    # bf16 path for v6e/v7x MXUs: bf16 is scoped to the large matmuls only; the Gram
    # epilogue stays f32, so dep_parse tolerance is much tighter than before.
    out_bf16 = text_processor_forward(text_embeddings, pe, params, NUM_HEADS,
                                      matmul_dtype=jnp.bfloat16)
    jax.block_until_ready(out_bf16)
    assert jnp.allclose(out_bf16["positional_encodings"], ref_pos, atol=2e-3, rtol=2e-3)
    assert jnp.allclose(out_bf16["dependency_parse"], ref_dep, atol=0.5, rtol=0.1)

    print("KERNEL_OK")
</pallas_src>

<mosaic_0001>
module attributes {stable_mosaic.version = 11 : i64} {
  func.func @_fused_text_kernel(%arg0: i32, %arg1: memref<16x32xf32, #tpu.memory_space<vmem>>, %arg2: memref<8x32xf32, #tpu.memory_space<vmem>>, %arg3: memref<32x96xf32, #tpu.memory_space<vmem>>, %arg4: memref<1x96xf32, #tpu.memory_space<vmem>>, %arg5: memref<32x32xf32, #tpu.memory_space<vmem>>, %arg6: memref<1x32xf32, #tpu.memory_space<vmem>>, %arg7: memref<32x128xf32, #tpu.memory_space<vmem>>, %arg8: memref<1x128xf32, #tpu.memory_space<vmem>>, %arg9: memref<128x32xf32, #tpu.memory_space<vmem>>, %arg10: memref<1x32xf32, #tpu.memory_space<vmem>>, %arg11: memref<1x32xf32, #tpu.memory_space<vmem>>, %arg12: memref<1x32xf32, #tpu.memory_space<vmem>>, %arg13: memref<1x32xf32, #tpu.memory_space<vmem>>, %arg14: memref<1x32xf32, #tpu.memory_space<vmem>>, %arg15: memref<16x32xf32, #tpu.memory_space<vmem>>, %arg16: memref<2x8x8xf32, #tpu.memory_space<vmem>>, %arg17: memref<2x8x96xf32, #tpu.memory_space<vmem>>, %arg18: memref<2x8x32xf32, #tpu.memory_space<vmem>>) attributes {dimension_semantics = [#tpu.dimension_semantics<arbitrary>], iteration_bounds = array<i64: 1>, scalar_prefetch = 0 : i64, scratch_operands = 2 : i64, tpu.core_type = #tpu.core_type<tc>, window_params = [{pipeline_mode = #tpu.pipeline_mode<synchronous>, transform_indices = @transform_0, window_bounds = array<i64: 16, 32>}, {pipeline_mode = #tpu.pipeline_mode<synchronous>, transform_indices = @transform_1, window_bounds = array<i64: 8, 32>}, {pipeline_mode = #tpu.pipeline_mode<synchronous>, transform_indices = @transform_2, window_bounds = array<i64: 32, 96>}, {pipeline_mode = #tpu.pipeline_mode<synchronous>, transform_indices = @transform_3, window_bounds = array<i64: 1, 96>}, {pipeline_mode = #tpu.pipeline_mode<synchronous>, transform_indices = @transform_4, window_bounds = array<i64: 32, 32>}, {pipeline_mode = #tpu.pipeline_mode<synchronous>, transform_indices = @transform_5, window_bounds = array<i64: 1, 32>}, {pipeline_mode = #tpu.pipeline_mode<synchronous>, transform_indices = @transform_6, window_bounds = array<i64: 32, 128>}, {pipeline_mode = #tpu.pipeline_mode<synchronous>, transform_indices = @transform_7, window_bounds = array<i64: 1, 128>}, {pipeline_mode = #tpu.pipeline_mode<synchronous>, transform_indices = @transform_8, window_bounds = array<i64: 128, 32>}, {pipeline_mode = #tpu.pipeline_mode<synchronous>, transform_indices = @transform_9, window_bounds = array<i64: 1, 32>}, {pipeline_mode = #tpu.pipeline_mode<synchronous>, transform_indices = @transform_10, window_bounds = array<i64: 1, 32>}, {pipeline_mode = #tpu.pipeline_mode<synchronous>, transform_indices = @transform_11, window_bounds = array<i64: 1, 32>}, {pipeline_mode = #tpu.pipeline_mode<synchronous>, transform_indices = @transform_12, window_bounds = array<i64: 1, 32>}, {pipeline_mode = #tpu.pipeline_mode<synchronous>, transform_indices = @transform_13, window_bounds = array<i64: 1, 32>}, {pipeline_mode = #tpu.pipeline_mode<synchronous>, transform_indices = @transform_14, window_bounds = array<i64: 16, 32>}, {pipeline_mode = #tpu.pipeline_mode<synchronous>, transform_indices = @transform_15, window_bounds = array<i64: 2, 8, 8>}]} {
    %c0 = arith.constant 0 : index
    %c0_0 = arith.constant 0 : index
    %0 = vector.load %arg2[%c0, %c0_0] : memref<8x32xf32, #tpu.memory_space<vmem>>, vector<8x32xf32>
    %1 = tpu.concatenate %0, %0 in 0 : vector<8x32xf32>, vector<8x32xf32> -> vector<16x32xf32>
    %c0_1 = arith.constant 0 : index
    %c0_2 = arith.constant 0 : index
    %2 = vector.load %arg1[%c0_1, %c0_2] : memref<16x32xf32, #tpu.memory_space<vmem>>, vector<16x32xf32>
    %3 = arith.addf %2, %1 : vector<16x32xf32>
    %c0_3 = arith.constant 0 : index
    %c0_4 = arith.constant 0 : index
    %4 = vector.load %arg15[%c0_3, %c0_4] : memref<16x32xf32, #tpu.memory_space<vmem>>, vector<16x32xf32>
    tpu.vector_store %arg15[%c0_3, %c0_4], %3 {strides = array<i32>} : memref<16x32xf32, #tpu.memory_space<vmem>>, vector<16x32xf32>,
    %c0_5 = arith.constant 0 : index
    %c0_6 = arith.constant 0 : index
    %5 = vector.load %arg3[%c0_5, %c0_6] : memref<32x96xf32, #tpu.memory_space<vmem>>, vector<32x96xf32>
    %cst = arith.constant dense<0.000000e+00> : vector<16x96xf32>
    %6 = tpu.matmul %3, %5, %cst {dimension_numbers = #tpu.dot_dimension_numbers<[1], [0], [0], [1], [0, 0, 1, 1], [], []>} : vector<16x32xf32>, vector<32x96xf32>, vector<16x96xf32> -> vector<16x96xf32>
    %c0_7 = arith.constant 0 : index
    %c0_8 = arith.constant 0 : index
    %7 = vector.load %arg4[%c0_7, %c0_8] : memref<1x96xf32, #tpu.memory_space<vmem>>, vector<1x96xf32>
    %8 = vector.broadcast %7 : vector<1x96xf32> to vector<16x96xf32>
    %9 = arith.addf %6, %8 : vector<16x96xf32>
    %10 = vector.shape_cast %9 : vector<16x96xf32> to vector<2x8x96xf32>
    %c0_9 = arith.constant 0 : index
    %c0_10 = arith.constant 0 : index
    %c0_11 = arith.constant 0 : index
    %11 = vector.load %arg17[%c0_9, %c0_10, %c0_11] : memref<2x8x96xf32, #tpu.memory_space<vmem>>, vector<2x8x96xf32>
    tpu.vector_store %arg17[%c0_9, %c0_10, %c0_11], %10 {strides = array<i32>} : memref<2x8x96xf32, #tpu.memory_space<vmem>>, vector<2x8x96xf32>,
    %c0_12 = arith.constant 0 : index
    %c0_13 = arith.constant 0 : index
    %c0_14 = arith.constant 0 : index
    %12 = vector.load %arg17[%c0_12, %c0_13, %c0_14] : memref<2x8x96xf32, #tpu.memory_space<vmem>>, vector<2x1x96xf32>
    %13 = vector.shape_cast %12 : vector<2x1x96xf32> to vector<2x96xf32>
    %14 = vector.extract_strided_slice %13 {offsets = [0, 0], sizes = [2, 8], strides = [1, 1]} : vector<2x96xf32> to vector<2x8xf32>
    %15 = vector.extract_strided_slice %13 {offsets = [0, 32], sizes = [2, 8], strides = [1, 1]} : vector<2x96xf32> to vector<2x8xf32>
    %16 = vector.extract_strided_slice %13 {offsets = [0, 64], sizes = [2, 8], strides = [1, 1]} : vector<2x96xf32> to vector<2x8xf32>
    %17 = vector.extract_strided_slice %13 {offsets = [0, 8], sizes = [2, 8], strides = [1, 1]} : vector<2x96xf32> to vector<2x8xf32>
    %18 = vector.extract_strided_slice %13 {offsets = [0, 40], sizes = [2, 8], strides = [1, 1]} : vector<2x96xf32> to vector<2x8xf32>
    %19 = vector.extract_strided_slice %13 {offsets = [0, 72], sizes = [2, 8], strides = [1, 1]} : vector<2x96xf32> to vector<2x8xf32>
    %20 = vector.extract_strided_slice %13 {offsets = [0, 16], sizes = [2, 8], strides = [1, 1]} : vector<2x96xf32> to vector<2x8xf32>
    %21 = vector.extract_strided_slice %13 {offsets = [0, 48], sizes = [2, 8], strides = [1, 1]} : vector<2x96xf32> to vector<2x8xf32>
    %22 = vector.extract_strided_slice %13 {offsets = [0, 80], sizes = [2, 8], strides = [1, 1]} : vector<2x96xf32> to vector<2x8xf32>
    %23 = vector.extract_strided_slice %13 {offsets = [0, 24], sizes = [2, 8], strides = [1, 1]} : vector<2x96xf32> to vector<2x8xf32>
    %24 = vector.extract_strided_slice %13 {offsets = [0, 56], sizes = [2, 8], strides = [1, 1]} : vector<2x96xf32> to vector<2x8xf32>
    %25 = vector.extract_strided_slice %13 {offsets = [0, 88], sizes = [2, 8], strides = [1, 1]} : vector<2x96xf32> to vector<2x8xf32>
    %c0_15 = arith.constant 0 : index
    %c1 = arith.constant 1 : index
    %c0_16 = arith.constant 0 : index
    %26 = vector.load %arg17[%c0_15, %c1, %c0_16] : memref<2x8x96xf32, #tpu.memory_space<vmem>>, vector<2x1x96xf32>
    %27 = vector.shape_cast %26 : vector<2x1x96xf32> to vector<2x96xf32>
    %28 = vector.extract_strided_slice %27 {offsets = [0, 0], sizes = [2, 8], strides = [1, 1]} : vector<2x96xf32> to vector<2x8xf32>
    %29 = vector.extract_strided_slice %27 {offsets = [0, 32], sizes = [2, 8], strides = [1, 1]} : vector<2x96xf32> to vector<2x8xf32>
    %30 = vector.extract_strided_slice %27 {offsets = [0, 64], sizes = [2, 8], strides = [1, 1]} : vector<2x96xf32> to vector<2x8xf32>
    %31 = vector.extract_strided_slice %27 {offsets = [0, 8], sizes = [2, 8], strides = [1, 1]} : vector<2x96xf32> to vector<2x8xf32>
    %32 = vector.extract_strided_slice %27 {offsets = [0, 40], sizes = [2, 8], strides = [1, 1]} : vector<2x96xf32> to vector<2x8xf32>
    %33 = vector.extract_strided_slice %27 {offsets = [0, 72], sizes = [2, 8], strides = [1, 1]} : vector<2x96xf32> to vector<2x8xf32>
    %34 = vector.extract_strided_slice %27 {offsets = [0, 16], sizes = [2, 8], strides = [1, 1]} : vector<2x96xf32> to vector<2x8xf32>
    %35 = vector.extract_strided_slice %27 {offsets = [0, 48], sizes = [2, 8], strides = [1, 1]} : vector<2x96xf32> to vector<2x8xf32>
    %36 = vector.extract_strided_slice %27 {offsets = [0, 80], sizes = [2, 8], strides = [1, 1]} : vector<2x96xf32> to vector<2x8xf32>
    %37 = vector.extract_strided_slice %27 {offsets = [0, 24], sizes = [2, 8], strides = [1, 1]} : vector<2x96xf32> to vector<2x8xf32>
    %38 = vector.extract_strided_slice %27 {offsets = [0, 56], sizes = [2, 8], strides = [1, 1]} : vector<2x96xf32> to vector<2x8xf32>
    %39 = vector.extract_strided_slice %27 {offsets = [0, 88], sizes = [2, 8], strides = [1, 1]} : vector<2x96xf32> to vector<2x8xf32>
    %c0_17 = arith.constant 0 : index
    %c2 = arith.constant 2 : index
    %c0_18 = arith.constant 0 : index
    %40 = vector.load %arg17[%c0_17, %c2, %c0_18] : memref<2x8x96xf32, #tpu.memory_space<vmem>>, vector<2x1x96xf32>
    %41 = vector.shape_cast %40 : vector<2x1x96xf32> to vector<2x96xf32>
    %42 = vector.extract_strided_slice %41 {offsets = [0, 0], sizes = [2, 8], strides = [1, 1]} : vector<2x96xf32> to vector<2x8xf32>
    %43 = vector.extract_strided_slice %41 {offsets = [0, 32], sizes = [2, 8], strides = [1, 1]} : vector<2x96xf32> to vector<2x8xf32>
    %44 = vector.extract_strided_slice %41 {offsets = [0, 64], sizes = [2, 8], strides = [1, 1]} : vector<2x96xf32> to vector<2x8xf32>
    %45 = vector.extract_strided_slice %41 {offsets = [0, 8], sizes = [2, 8], strides = [1, 1]} : vector<2x96xf32> to vector<2x8xf32>
    %46 = vector.extract_strided_slice %41 {offsets = [0, 40], sizes = [2, 8], strides = [1, 1]} : vector<2x96xf32> to vector<2x8xf32>
    %47 = vector.extract_strided_slice %41 {offsets = [0, 72], sizes = [2, 8], strides = [1, 1]} : vector<2x96xf32> to vector<2x8xf32>
    %48 = vector.extract_strided_slice %41 {offsets = [0, 16], sizes = [2, 8], strides = [1, 1]} : vector<2x96xf32> to vector<2x8xf32>
    %49 = vector.extract_strided_slice %41 {offsets = [0, 48], sizes = [2, 8], strides = [1, 1]} : vector<2x96xf32> to vector<2x8xf32>
    %50 = vector.extract_strided_slice %41 {offsets = [0, 80], sizes = [2, 8], strides = [1, 1]} : vector<2x96xf32> to vector<2x8xf32>
    %51 = vector.extract_strided_slice %41 {offsets = [0, 24], sizes = [2, 8], strides = [1, 1]} : vector<2x96xf32> to vector<2x8xf32>
    %52 = vector.extract_strided_slice %41 {offsets = [0, 56], sizes = [2, 8], strides = [1, 1]} : vector<2x96xf32> to vector<2x8xf32>
    %53 = vector.extract_strided_slice %41 {offsets = [0, 88], sizes = [2, 8], strides = [1, 1]} : vector<2x96xf32> to vector<2x8xf32>
    %c0_19 = arith.constant 0 : index
    %c3 = arith.constant 3 : index
    %c0_20 = arith.constant 0 : index
    %54 = vector.load %arg17[%c0_19, %c3, %c0_20] : memref<2x8x96xf32, #tpu.memory_space<vmem>>, vector<2x1x96xf32>
    %55 = vector.shape_cast %54 : vector<2x1x96xf32> to vector<2x96xf32>
    %56 = vector.extract_strided_slice %55 {offsets = [0, 0], sizes = [2, 8], strides = [1, 1]} : vector<2x96xf32> to vector<2x8xf32>
    %57 = vector.extract_strided_slice %55 {offsets = [0, 32], sizes = [2, 8], strides = [1, 1]} : vector<2x96xf32> to vector<2x8xf32>
    %58 = vector.extract_strided_slice %55 {offsets = [0, 64], sizes = [2, 8], strides = [1, 1]} : vector<2x96xf32> to vector<2x8xf32>
    %59 = vector.extract_strided_slice %55 {offsets = [0, 8], sizes = [2, 8], strides = [1, 1]} : vector<2x96xf32> to vector<2x8xf32>
    %60 = vector.extract_strided_slice %55 {offsets = [0, 40], sizes = [2, 8], strides = [1, 1]} : vector<2x96xf32> to vector<2x8xf32>
    %61 = vector.extract_strided_slice %55 {offsets = [0, 72], sizes = [2, 8], strides = [1, 1]} : vector<2x96xf32> to vector<2x8xf32>
    %62 = vector.extract_strided_slice %55 {offsets = [0, 16], sizes = [2, 8], strides = [1, 1]} : vector<2x96xf32> to vector<2x8xf32>
    %63 = vector.extract_strided_slice %55 {offsets = [0, 48], sizes = [2, 8], strides = [1, 1]} : vector<2x96xf32> to vector<2x8xf32>
    %64 = vector.extract_strided_slice %55 {offsets = [0, 80], sizes = [2, 8], strides = [1, 1]} : vector<2x96xf32> to vector<2x8xf32>
    %65 = vector.extract_strided_slice %55 {offsets = [0, 24], sizes = [2, 8], strides = [1, 1]} : vector<2x96xf32> to vector<2x8xf32>
    %66 = vector.extract_strided_slice %55 {offsets = [0, 56], sizes = [2, 8], strides = [1, 1]} : vector<2x96xf32> to vector<2x8xf32>
    %67 = vector.extract_strided_slice %55 {offsets = [0, 88], sizes = [2, 8], strides = [1, 1]} : vector<2x96xf32> to vector<2x8xf32>
    %c0_21 = arith.constant 0 : index
    %c4 = arith.constant 4 : index
    %c0_22 = arith.constant 0 : index
    %68 = vector.load %arg17[%c0_21, %c4, %c0_22] : memref<2x8x96xf32, #tpu.memory_space<vmem>>, vector<2x1x96xf32>
    %69 = vector.shape_cast %68 : vector<2x1x96xf32> to vector<2x96xf32>
    %70 = vector.extract_strided_slice %69 {offsets = [0, 0], sizes = [2, 8], strides = [1, 1]} : vector<2x96xf32> to vector<2x8xf32>
    %71 = vector.extract_strided_slice %69 {offsets = [0, 32], sizes = [2, 8], strides = [1, 1]} : vector<2x96xf32> to vector<2x8xf32>
    %72 = vector.extract_strided_slice %69 {offsets = [0, 64], sizes = [2, 8], strides = [1, 1]} : vector<2x96xf32> to vector<2x8xf32>
    %73 = vector.extract_strided_slice %69 {offsets = [0, 8], sizes = [2, 8], strides = [1, 1]} : vector<2x96xf32> to vector<2x8xf32>
    %74 = vector.extract_strided_slice %69 {offsets = [0, 40], sizes = [2, 8], strides = [1, 1]} : vector<2x96xf32> to vector<2x8xf32>
    %75 = vector.extract_strided_slice %69 {offsets = [0, 72], sizes = [2, 8], strides = [1, 1]} : vector<2x96xf32> to vector<2x8xf32>
    %76 = vector.extract_strided_slice %69 {offsets = [0, 16], sizes = [2, 8], strides = [1, 1]} : vector<2x96xf32> to vector<2x8xf32>
    %77 = vector.extract_strided_slice %69 {offsets = [0, 48], sizes = [2, 8], strides = [1, 1]} : vector<2x96xf32> to vector<2x8xf32>
    %78 = vector.extract_strided_slice %69 {offsets = [0, 80], sizes = [2, 8], strides = [1, 1]} : vector<2x96xf32> to vector<2x8xf32>
    %79 = vector.extract_strided_slice %69 {offsets = [0, 24], sizes = [2, 8], strides = [1, 1]} : vector<2x96xf32> to vector<2x8xf32>
    %80 = vector.extract_strided_slice %69 {offsets = [0, 56], sizes = [2, 8], strides = [1, 1]} : vector<2x96xf32> to vector<2x8xf32>
    %81 = vector.extract_strided_slice %69 {offsets = [0, 88], sizes = [2, 8], strides = [1, 1]} : vector<2x96xf32> to vector<2x8xf32>
    %c0_23 = arith.constant 0 : index
    %c5 = arith.constant 5 : index
    %c0_24 = arith.constant 0 : index
    %82 = vector.load %arg17[%c0_23, %c5, %c0_24] : memref<2x8x96xf32, #tpu.memory_space<vmem>>, vector<2x1x96xf32>
    %83 = vector.shape_cast %82 : vector<2x1x96xf32> to vector<2x96xf32>
    %84 = vector.extract_strided_slice %83 {offsets = [0, 0], sizes = [2, 8], strides = [1, 1]} : vector<2x96xf32> to vector<2x8xf32>
    %85 = vector.extract_strided_slice %83 {offsets = [0, 32], sizes = [2, 8], strides = [1, 1]} : vector<2x96xf32> to vector<2x8xf32>
    %86 = vector.extract_strided_slice %83 {offsets = [0, 64], sizes = [2, 8], strides = [1, 1]} : vector<2x96xf32> to vector<2x8xf32>
    %87 = vector.extract_strided_slice %83 {offsets = [0, 8], sizes = [2, 8], strides = [1, 1]} : vector<2x96xf32> to vector<2x8xf32>
    %88 = vector.extract_strided_slice %83 {offsets = [0, 40], sizes = [2, 8], strides = [1, 1]} : vector<2x96xf32> to vector<2x8xf32>
    %89 = vector.extract_strided_slice %83 {offsets = [0, 72], sizes = [2, 8], strides = [1, 1]} : vector<2x96xf32> to vector<2x8xf32>
    %90 = vector.extract_strided_slice %83 {offsets = [0, 16], sizes = [2, 8], strides = [1, 1]} : vector<2x96xf32> to vector<2x8xf32>
    %91 = vector.extract_strided_slice %83 {offsets = [0, 48], sizes = [2, 8], strides = [1, 1]} : vector<2x96xf32> to vector<2x8xf32>
    %92 = vector.extract_strided_slice %83 {offsets = [0, 80], sizes = [2, 8], strides = [1, 1]} : vector<2x96xf32> to vector<2x8xf32>
    %93 = vector.extract_strided_slice %83 {offsets = [0, 24], sizes = [2, 8], strides = [1, 1]} : vector<2x96xf32> to vector<2x8xf32>
    %94 = vector.extract_strided_slice %83 {offsets = [0, 56], sizes = [2, 8], strides = [1, 1]} : vector<2x96xf32> to vector<2x8xf32>
    %95 = vector.extract_strided_slice %83 {offsets = [0, 88], sizes = [2, 8], strides = [1, 1]} : vector<2x96xf32> to vector<2x8xf32>
    %c0_25 = arith.constant 0 : index
    %c6 = arith.constant 6 : index
    %c0_26 = arith.constant 0 : index
    %96 = vector.load %arg17[%c0_25, %c6, %c0_26] : memref<2x8x96xf32, #tpu.memory_space<vmem>>, vector<2x1x96xf32>
    %97 = vector.shape_cast %96 : vector<2x1x96xf32> to vector<2x96xf32>
    %98 = vector.extract_strided_slice %97 {offsets = [0, 0], sizes = [2, 8], strides = [1, 1]} : vector<2x96xf32> to vector<2x8xf32>
    %99 = vector.extract_strided_slice %97 {offsets = [0, 32], sizes = [2, 8], strides = [1, 1]} : vector<2x96xf32> to vector<2x8xf32>
    %100 = vector.extract_strided_slice %97 {offsets = [0, 64], sizes = [2, 8], strides = [1, 1]} : vector<2x96xf32> to vector<2x8xf32>
    %101 = vector.extract_strided_slice %97 {offsets = [0, 8], sizes = [2, 8], strides = [1, 1]} : vector<2x96xf32> to vector<2x8xf32>
    %102 = vector.extract_strided_slice %97 {offsets = [0, 40], sizes = [2, 8], strides = [1, 1]} : vector<2x96xf32> to vector<2x8xf32>
    %103 = vector.extract_strided_slice %97 {offsets = [0, 72], sizes = [2, 8], strides = [1, 1]} : vector<2x96xf32> to vector<2x8xf32>
    %104 = vector.extract_strided_slice %97 {offsets = [0, 16], sizes = [2, 8], strides = [1, 1]} : vector<2x96xf32> to vector<2x8xf32>
    %105 = vector.extract_strided_slice %97 {offsets = [0, 48], sizes = [2, 8], strides = [1, 1]} : vector<2x96xf32> to vector<2x8xf32>
    %106 = vector.extract_strided_slice %97 {offsets = [0, 80], sizes = [2, 8], strides = [1, 1]} : vector<2x96xf32> to vector<2x8xf32>
    %107 = vector.extract_strided_slice %97 {offsets = [0, 24], sizes = [2, 8], strides = [1, 1]} : vector<2x96xf32> to vector<2x8xf32>
    %108 = vector.extract_strided_slice %97 {offsets = [0, 56], sizes = [2, 8], strides = [1, 1]} : vector<2x96xf32> to vector<2x8xf32>
    %109 = vector.extract_strided_slice %97 {offsets = [0, 88], sizes = [2, 8], strides = [1, 1]} : vector<2x96xf32> to vector<2x8xf32>
    %c0_27 = arith.constant 0 : index
    %c7 = arith.constant 7 : index
    %c0_28 = arith.constant 0 : index
    %110 = vector.load %arg17[%c0_27, %c7, %c0_28] : memref<2x8x96xf32, #tpu.memory_space<vmem>>, vector<2x1x96xf32>
    %111 = vector.shape_cast %110 : vector<2x1x96xf32> to vector<2x96xf32>
    %112 = vector.extract_strided_slice %111 {offsets = [0, 0], sizes = [2, 8], strides = [1, 1]} : vector<2x96xf32> to vector<2x8xf32>
    %113 = vector.extract_strided_slice %111 {offsets = [0, 32], sizes = [2, 8], strides = [1, 1]} : vector<2x96xf32> to vector<2x8xf32>
    %114 = vector.extract_strided_slice %111 {offsets = [0, 64], sizes = [2, 8], strides = [1, 1]} : vector<2x96xf32> to vector<2x8xf32>
    %115 = vector.extract_strided_slice %111 {offsets = [0, 8], sizes = [2, 8], strides = [1, 1]} : vector<2x96xf32> to vector<2x8xf32>
    %116 = vector.extract_strided_slice %111 {offsets = [0, 40], sizes = [2, 8], strides = [1, 1]} : vector<2x96xf32> to vector<2x8xf32>
    %117 = vector.extract_strided_slice %111 {offsets = [0, 72], sizes = [2, 8], strides = [1, 1]} : vector<2x96xf32> to vector<2x8xf32>
    %118 = vector.extract_strided_slice %111 {offsets = [0, 16], sizes = [2, 8], strides = [1, 1]} : vector<2x96xf32> to vector<2x8xf32>
    %119 = vector.extract_strided_slice %111 {offsets = [0, 48], sizes = [2, 8], strides = [1, 1]} : vector<2x96xf32> to vector<2x8xf32>
    %120 = vector.extract_strided_slice %111 {offsets = [0, 80], sizes = [2, 8], strides = [1, 1]} : vector<2x96xf32> to vector<2x8xf32>
    %121 = vector.extract_strided_slice %111 {offsets = [0, 24], sizes = [2, 8], strides = [1, 1]} : vector<2x96xf32> to vector<2x8xf32>
    %122 = vector.extract_strided_slice %111 {offsets = [0, 56], sizes = [2, 8], strides = [1, 1]} : vector<2x96xf32> to vector<2x8xf32>
    %123 = vector.extract_strided_slice %111 {offsets = [0, 88], sizes = [2, 8], strides = [1, 1]} : vector<2x96xf32> to vector<2x8xf32>
    %124 = vector.shape_cast %14 : vector<2x8xf32> to vector<1x2x8xf32>
    %125 = vector.shape_cast %17 : vector<2x8xf32> to vector<1x2x8xf32>
    %126 = vector.shape_cast %20 : vector<2x8xf32> to vector<1x2x8xf32>
    %127 = vector.shape_cast %23 : vector<2x8xf32> to vector<1x2x8xf32>
    %128 = vector.shape_cast %28 : vector<2x8xf32> to vector<1x2x8xf32>
    %129 = vector.shape_cast %31 : vector<2x8xf32> to vector<1x2x8xf32>
    %130 = vector.shape_cast %34 : vector<2x8xf32> to vector<1x2x8xf32>
    %131 = vector.shape_cast %37 : vector<2x8xf32> to vector<1x2x8xf32>
    %132 = vector.shape_cast %42 : vector<2x8xf32> to vector<1x2x8xf32>
    %133 = vector.shape_cast %45 : vector<2x8xf32> to vector<1x2x8xf32>
    %134 = vector.shape_cast %48 : vector<2x8xf32> to vector<1x2x8xf32>
    %135 = vector.shape_cast %51 : vector<2x8xf32> to vector<1x2x8xf32>
    %136 = vector.shape_cast %56 : vector<2x8xf32> to vector<1x2x8xf32>
    %137 = vector.shape_cast %59 : vector<2x8xf32> to vector<1x2x8xf32>
    %138 = vector.shape_cast %62 : vector<2x8xf32> to vector<1x2x8xf32>
    %139 = vector.shape_cast %65 : vector<2x8xf32> to vector<1x2x8xf32>
    %140 = vector.shape_cast %70 : vector<2x8xf32> to vector<1x2x8xf32>
    %141 = vector.shape_cast %73 : vector<2x8xf32> to vector<1x2x8xf32>
    %142 = vector.shape_cast %76 : vector<2x8xf32> to vector<1x2x8xf32>
    %143 = vector.shape_cast %79 : vector<2x8xf32> to vector<1x2x8xf32>
    %144 = vector.shape_cast %84 : vector<2x8xf32> to vector<1x2x8xf32>
    %145 = vector.shape_cast %87 : vector<2x8xf32> to vector<1x2x8xf32>
    %146 = vector.shape_cast %90 : vector<2x8xf32> to vector<1x2x8xf32>
    %147 = vector.shape_cast %93 : vector<2x8xf32> to vector<1x2x8xf32>
    %148 = vector.shape_cast %98 : vector<2x8xf32> to vector<1x2x8xf32>
    %149 = vector.shape_cast %101 : vector<2x8xf32> to vector<1x2x8xf32>
    %150 = vector.shape_cast %104 : vector<2x8xf32> to vector<1x2x8xf32>
    %151 = vector.shape_cast %107 : vector<2x8xf32> to vector<1x2x8xf32>
    %152 = vector.shape_cast %112 : vector<2x8xf32> to vector<1x2x8xf32>
    %153 = vector.shape_cast %115 : vector<2x8xf32> to vector<1x2x8xf32>
    %154 = vector.shape_cast %118 : vector<2x8xf32> to vector<1x2x8xf32>
    %155 = vector.shape_cast %121 : vector<2x8xf32> to vector<1x2x8xf32>
    %156 = tpu.concatenate %124, %125, %126, %127, %128, %129, %130, %131, %132, %133, %134, %135, %136, %137, %138, %139 in 0 : vector<1x2x8xf32>, vector<1x2x8xf32>, vector<1x2x8xf32>, vector<1x2x8xf32>, vector<1x2x8xf32>, vector<1x2x8xf32>, vector<1x2x8xf32>, vector<1x2x8xf32>, vector<1x2x8xf32>, vector<1x2x8xf32>, vector<1x2x8xf32>, vector<1x2x8xf32>, vector<1x2x8xf32>, vector<1x2x8xf32>, vector<1x2x8xf32>, vector<1x2x8xf32> -> vector<16x2x8xf32>
    %157 = tpu.concatenate %140, %141, %142, %143, %144, %145, %146, %147, %148, %149, %150, %151, %152, %153, %154, %155 in 0 : vector<1x2x8xf32>, vector<1x2x8xf32>, vector<1x2x8xf32>, vector<1x2x8xf32>, vector<1x2x8xf32>, vector<1x2x8xf32>, vector<1x2x8xf32>, vector<1x2x8xf32>, vector<1x2x8xf32>, vector<1x2x8xf32>, vector<1x2x8xf32>, vector<1x2x8xf32>, vector<1x2x8xf32>, vector<1x2x8xf32>, vector<1x2x8xf32>, vector<1x2x8xf32> -> vector<16x2x8xf32>
    %158 = tpu.concatenate %156, %157 in 0 : vector<16x2x8xf32>, vector<16x2x8xf32> -> vector<32x2x8xf32>
    %159 = vector.shape_cast %15 : vector<2x8xf32> to vector<1x2x8xf32>
    %160 = vector.shape_cast %18 : vector<2x8xf32> to vector<1x2x8xf32>
    %161 = vector.shape_cast %21 : vector<2x8xf32> to vector<1x2x8xf32>
    %162 = vector.shape_cast %24 : vector<2x8xf32> to vector<1x2x8xf32>
    %163 = vector.shape_cast %29 : vector<2x8xf32> to vector<1x2x8xf32>
    %164 = vector.shape_cast %32 : vector<2x8xf32> to vector<1x2x8xf32>
    %165 = vector.shape_cast %35 : vector<2x8xf32> to vector<1x2x8xf32>
    %166 = vector.shape_cast %38 : vector<2x8xf32> to vector<1x2x8xf32>
    %167 = vector.shape_cast %43 : vector<2x8xf32> to vector<1x2x8xf32>
    %168 = vector.shape_cast %46 : vector<2x8xf32> to vector<1x2x8xf32>
    %169 = vector.shape_cast %49 : vector<2x8xf32> to vector<1x2x8xf32>
    %170 = vector.shape_cast %52 : vector<2x8xf32> to vector<1x2x8xf32>
    %171 = vector.shape_cast %57 : vector<2x8xf32> to vector<1x2x8xf32>
    %172 = vector.shape_cast %60 : vector<2x8xf32> to vector<1x2x8xf32>
    %173 = vector.shape_cast %63 : vector<2x8xf32> to vector<1x2x8xf32>
    %174 = vector.shape_cast %66 : vector<2x8xf32> to vector<1x2x8xf32>
    %175 = vector.shape_cast %71 : vector<2x8xf32> to vector<1x2x8xf32>
    %176 = vector.shape_cast %74 : vector<2x8xf32> to vector<1x2x8xf32>
    %177 = vector.shape_cast %77 : vector<2x8xf32> to vector<1x2x8xf32>
    %178 = vector.shape_cast %80 : vector<2x8xf32> to vector<1x2x8xf32>
    %179 = vector.shape_cast %85 : vector<2x8xf32> to vector<1x2x8xf32>
    %180 = vector.shape_cast %88 : vector<2x8xf32> to vector<1x2x8xf32>
    %181 = vector.shape_cast %91 : vector<2x8xf32> to vector<1x2x8xf32>
    %182 = vector.shape_cast %94 : vector<2x8xf32> to vector<1x2x8xf32>
    %183 = vector.shape_cast %99 : vector<2x8xf32> to vector<1x2x8xf32>
    %184 = vector.shape_cast %102 : vector<2x8xf32> to vector<1x2x8xf32>
    %185 = vector.shape_cast %105 : vector<2x8xf32> to vector<1x2x8xf32>
    %186 = vector.shape_cast %108 : vector<2x8xf32> to vector<1x2x8xf32>
    %187 = vector.shape_cast %113 : vector<2x8xf32> to vector<1x2x8xf32>
    %188 = vector.shape_cast %116 : vector<2x8xf32> to vector<1x2x8xf32>
    %189 = vector.shape_cast %119 : vector<2x8xf32> to vector<1x2x8xf32>
    %190 = vector.shape_cast %122 : vector<2x8xf32> to vector<1x2x8xf32>
    %191 = tpu.concatenate %159, %160, %161, %162, %163, %164, %165, %166, %167, %168, %169, %170, %171, %172, %173, %174 in 0 : vector<1x2x8xf32>, vector<1x2x8xf32>, vector<1x2x8xf32>, vector<1x2x8xf32>, vector<1x2x8xf32>, vector<1x2x8xf32>, vector<1x2x8xf32>, vector<1x2x8xf32>, vector<1x2x8xf32>, vector<1x2x8xf32>, vector<1x2x8xf32>, vector<1x2x8xf32>, vector<1x2x8xf32>, vector<1x2x8xf32>, vector<1x2x8xf32>, vector<1x2x8xf32> -> vector<16x2x8xf32>
    %192 = tpu.concatenate %175, %176, %177, %178, %179, %180, %181, %182, %183, %184, %185, %186, %187, %188, %189, %190 in 0 : vector<1x2x8xf32>, vector<1x2x8xf32>, vector<1x2x8xf32>, vector<1x2x8xf32>, vector<1x2x8xf32>, vector<1x2x8xf32>, vector<1x2x8xf32>, vector<1x2x8xf32>, vector<1x2x8xf32>, vector<1x2x8xf32>, vector<1x2x8xf32>, vector<1x2x8xf32>, vector<1x2x8xf32>, vector<1x2x8xf32>, vector<1x2x8xf32>, vector<1x2x8xf32> -> vector<16x2x8xf32>
    %193 = tpu.concatenate %191, %192 in 0 : vector<16x2x8xf32>, vector<16x2x8xf32> -> vector<32x2x8xf32>
    %194 = vector.shape_cast %16 : vector<2x8xf32> to vector<1x2x8xf32>
    %195 = vector.shape_cast %19 : vector<2x8xf32> to vector<1x2x8xf32>
    %196 = vector.shape_cast %22 : vector<2x8xf32> to vector<1x2x8xf32>
    %197 = vector.shape_cast %25 : vector<2x8xf32> to vector<1x2x8xf32>
    %198 = vector.shape_cast %30 : vector<2x8xf32> to vector<1x2x8xf32>
    %199 = vector.shape_cast %33 : vector<2x8xf32> to vector<1x2x8xf32>
    %200 = vector.shape_cast %36 : vector<2x8xf32> to vector<1x2x8xf32>
    %201 = vector.shape_cast %39 : vector<2x8xf32> to vector<1x2x8xf32>
    %202 = vector.shape_cast %44 : vector<2x8xf32> to vector<1x2x8xf32>
    %203 = vector.shape_cast %47 : vector<2x8xf32> to vector<1x2x8xf32>
    %204 = vector.shape_cast %50 : vector<2x8xf32> to vector<1x2x8xf32>
    %205 = vector.shape_cast %53 : vector<2x8xf32> to vector<1x2x8xf32>
    %206 = vector.shape_cast %58 : vector<2x8xf32> to vector<1x2x8xf32>
    %207 = vector.shape_cast %61 : vector<2x8xf32> to vector<1x2x8xf32>
    %208 = vector.shape_cast %64 : vector<2x8xf32> to vector<1x2x8xf32>
    %209 = vector.shape_cast %67 : vector<2x8xf32> to vector<1x2x8xf32>
    %210 = vector.shape_cast %72 : vector<2x8xf32> to vector<1x2x8xf32>
    %211 = vector.shape_cast %75 : vector<2x8xf32> to vector<1x2x8xf32>
    %212 = vector.shape_cast %78 : vector<2x8xf32> to vector<1x2x8xf32>
    %213 = vector.shape_cast %81 : vector<2x8xf32> to vector<1x2x8xf32>
    %214 = vector.shape_cast %86 : vector<2x8xf32> to vector<1x2x8xf32>
    %215 = vector.shape_cast %89 : vector<2x8xf32> to vector<1x2x8xf32>
    %216 = vector.shape_cast %92 : vector<2x8xf32> to vector<1x2x8xf32>
    %217 = vector.shape_cast %95 : vector<2x8xf32> to vector<1x2x8xf32>
    %218 = vector.shape_cast %100 : vector<2x8xf32> to vector<1x2x8xf32>
    %219 = vector.shape_cast %103 : vector<2x8xf32> to vector<1x2x8xf32>
    %220 = vector.shape_cast %106 : vector<2x8xf32> to vector<1x2x8xf32>
    %221 = vector.shape_cast %109 : vector<2x8xf32> to vector<1x2x8xf32>
    %222 = vector.shape_cast %114 : vector<2x8xf32> to vector<1x2x8xf32>
    %223 = vector.shape_cast %117 : vector<2x8xf32> to vector<1x2x8xf32>
    %224 = vector.shape_cast %120 : vector<2x8xf32> to vector<1x2x8xf32>
    %225 = vector.shape_cast %123 : vector<2x8xf32> to vector<1x2x8xf32>
    %226 = tpu.concatenate %194, %195, %196, %197, %198, %199, %200, %201, %202, %203, %204, %205, %206, %207, %208, %209 in 0 : vector<1x2x8xf32>, vector<1x2x8xf32>, vector<1x2x8xf32>, vector<1x2x8xf32>, vector<1x2x8xf32>, vector<1x2x8xf32>, vector<1x2x8xf32>, vector<1x2x8xf32>, vector<1x2x8xf32>, vector<1x2x8xf32>, vector<1x2x8xf32>, vector<1x2x8xf32>, vector<1x2x8xf32>, vector<1x2x8xf32>, vector<1x2x8xf32>, vector<1x2x8xf32> -> vector<16x2x8xf32>
    %227 = tpu.concatenate %210, %211, %212, %213, %214, %215, %216, %217, %218, %219, %220, %221, %222, %223, %224, %225 in 0 : vector<1x2x8xf32>, vector<1x2x8xf32>, vector<1x2x8xf32>, vector<1x2x8xf32>, vector<1x2x8xf32>, vector<1x2x8xf32>, vector<1x2x8xf32>, vector<1x2x8xf32>, vector<1x2x8xf32>, vector<1x2x8xf32>, vector<1x2x8xf32>, vector<1x2x8xf32>, vector<1x2x8xf32>, vector<1x2x8xf32>, vector<1x2x8xf32>, vector<1x2x8xf32> -> vector<16x2x8xf32>
    %228 = tpu.concatenate %226, %227 in 0 : vector<16x2x8xf32>, vector<16x2x8xf32> -> vector<32x2x8xf32>
    "tpu.trace_start"() <{level = 10 : i32, message = "gbd,gcd->gbc"}> : () -> ()
    %cst_29 = arith.constant dense<0.000000e+00> : vector<32x2x2xf32>
    %229 = tpu.matmul %158, %193, %cst_29 {dimension_numbers = #tpu.dot_dimension_numbers<[2], [2], [1], [1], [0, 0, 0, 1, 1, 1], [0], [0]>} : vector<32x2x8xf32>, vector<32x2x8xf32>, vector<32x2x2xf32> -> vector<32x2x2xf32>
    "tpu.trace_stop"() : () -> ()
    %cst_30 = arith.constant 0.353553385 : f32
    %230 = vector.broadcast %cst_30 : f32 to vector<32x2x2xf32>
    %231 = arith.mulf %229, %230 : vector<32x2x2xf32>
    %cst_31 = arith.constant dense<0xFF800000> : vector<32x2xf32>
    %232 = vector.multi_reduction <maximumf>, %231, %cst_31 [2] : vector<32x2x2xf32> to vector<32x2xf32>
    %233 = vector.shape_cast %232 : vector<32x2xf32> to vector<32x2x1xf32>
    %234 = vector.broadcast %233 : vector<32x2x1xf32> to vector<32x2x2xf32>
    %235 = arith.subf %231, %234 : vector<32x2x2xf32>
    %236 = math.exp %235 : vector<32x2x2xf32>
    %cst_32 = arith.constant dense<0.000000e+00> : vector<32x2xf32>
    %237 = vector.multi_reduction <add>, %236, %cst_32 [2] : vector<32x2x2xf32> to vector<32x2xf32>
    %238 = vector.shape_cast %237 : vector<32x2xf32> to vector<32x2x1xf32>
    %239 = tpu.reciprocal %238 {approx = true} : vector<32x2x1xf32> -> vector<32x2x1xf32>
    %240 = vector.broadcast %239 : vector<32x2x1xf32> to vector<32x2x2xf32>
    %241 = arith.mulf %236, %240 : vector<32x2x2xf32>
    "tpu.trace_start"() <{level = 10 : i32, message = "gbc,gcd->gbd"}> : () -> ()
    %cst_33 = arith.constant dense<0.000000e+00> : vector<32x2x8xf32>
    %242 = tpu.matmul %241, %228, %cst_33 {dimension_numbers = #tpu.dot_dimension_numbers<[2], [1], [1], [2], [0, 0, 0, 1, 1, 2], [0], [0]>} : vector<32x2x2xf32>, vector<32x2x8xf32>, vector<32x2x8xf32> -> vector<32x2x8xf32>
    "tpu.trace_stop"() : () -> ()
    %243 = vector.extract_strided_slice %242 {offsets = [0, 0, 0], sizes = [1, 2, 8], strides = [1, 1, 1]} : vector<32x2x8xf32> to vector<1x2x8xf32>
    %244 = vector.shape_cast %243 : vector<1x2x8xf32> to vector<2x8xf32>
    %245 = vector.extract_strided_slice %242 {offsets = [1, 0, 0], sizes = [1, 2, 8], strides = [1, 1, 1]} : vector<32x2x8xf32> to vector<1x2x8xf32>
    %246 = vector.shape_cast %245 : vector<1x2x8xf32> to vector<2x8xf32>
    %247 = vector.extract_strided_slice %242 {offsets = [2, 0, 0], sizes = [1, 2, 8], strides = [1, 1, 1]} : vector<32x2x8xf32> to vector<1x2x8xf32>
    %248 = vector.shape_cast %247 : vector<1x2x8xf32> to vector<2x8xf32>
    %249 = vector.extract_strided_slice %242 {offsets = [3, 0, 0], sizes = [1, 2, 8], strides = [1, 1, 1]} : vector<32x2x8xf32> to vector<1x2x8xf32>
    %250 = vector.shape_cast %249 : vector<1x2x8xf32> to vector<2x8xf32>
    %251 = tpu.concatenate %244, %246, %248, %250 in 1 : vector<2x8xf32>, vector<2x8xf32>, vector<2x8xf32>, vector<2x8xf32> -> vector<2x32xf32>
    %c0_34 = arith.constant 0 : index
    %c0_35 = arith.constant 0 : index
    %c0_36 = arith.constant 0 : index
    %252 = vector.load %arg18[%c0_34, %c0_35, %c0_36] : memref<2x8x32xf32, #tpu.memory_space<vmem>>, vector<2x1x32xf32>
    %253 = vector.shape_cast %252 : vector<2x1x32xf32> to vector<2x32xf32>
    %254 = vector.shape_cast %251 : vector<2x32xf32> to vector<2x1x32xf32>
    tpu.vector_store %arg18[%c0_34, %c0_35, %c0_36], %254 {strides = array<i32>} : memref<2x8x32xf32, #tpu.memory_space<vmem>>, vector<2x1x32xf32>,
    %255 = vector.extract_strided_slice %242 {offsets = [4, 0, 0], sizes = [1, 2, 8], strides = [1, 1, 1]} : vector<32x2x8xf32> to vector<1x2x8xf32>
    %256 = vector.shape_cast %255 : vector<1x2x8xf32> to vector<2x8xf32>
    %257 = vector.extract_strided_slice %242 {offsets = [5, 0, 0], sizes = [1, 2, 8], strides = [1, 1, 1]} : vector<32x2x8xf32> to vector<1x2x8xf32>
    %258 = vector.shape_cast %257 : vector<1x2x8xf32> to vector<2x8xf32>
    %259 = vector.extract_strided_slice %242 {offsets = [6, 0, 0], sizes = [1, 2, 8], strides = [1, 1, 1]} : vector<32x2x8xf32> to vector<1x2x8xf32>
    %260 = vector.shape_cast %259 : vector<1x2x8xf32> to vector<2x8xf32>
    %261 = vector.extract_strided_slice %242 {offsets = [7, 0, 0], sizes = [1, 2, 8], strides = [1, 1, 1]} : vector<32x2x8xf32> to vector<1x2x8xf32>
    %262 = vector.shape_cast %261 : vector<1x2x8xf32> to vector<2x8xf32>
    %263 = tpu.concatenate %256, %258, %260, %262 in 1 : vector<2x8xf32>, vector<2x8xf32>, vector<2x8xf32>, vector<2x8xf32> -> vector<2x32xf32>
    %c0_37 = arith.constant 0 : index
    %c1_38 = arith.constant 1 : index
    %c0_39 = arith.constant 0 : index
    %264 = vector.load %arg18[%c0_37, %c1_38, %c0_39] : memref<2x8x32xf32, #tpu.memory_space<vmem>>, vector<2x1x32xf32>
    %265 = vector.shape_cast %264 : vector<2x1x32xf32> to vector<2x32xf32>
    %266 = vector.shape_cast %263 : vector<2x32xf32> to vector<2x1x32xf32>
    tpu.vector_store %arg18[%c0_37, %c1_38, %c0_39], %266 {strides = array<i32>} : memref<2x8x32xf32, #tpu.memory_space<vmem>>, vector<2x1x32xf32>,
    %267 = vector.extract_strided_slice %242 {offsets = [8, 0, 0], sizes = [1, 2, 8], strides = [1, 1, 1]} : vector<32x2x8xf32> to vector<1x2x8xf32>
    %268 = vector.shape_cast %267 : vector<1x2x8xf32> to vector<2x8xf32>
    %269 = vector.extract_strided_slice %242 {offsets = [9, 0, 0], sizes = [1, 2, 8], strides = [1, 1, 1]} : vector<32x2x8xf32> to vector<1x2x8xf32>
    %270 = vector.shape_cast %269 : vector<1x2x8xf32> to vector<2x8xf32>
    %271 = vector.extract_strided_slice %242 {offsets = [10, 0, 0], sizes = [1, 2, 8], strides = [1, 1, 1]} : vector<32x2x8xf32> to vector<1x2x8xf32>
    %272 = vector.shape_cast %271 : vector<1x2x8xf32> to vector<2x8xf32>
    %273 = vector.extract_strided_slice %242 {offsets = [11, 0, 0], sizes = [1, 2, 8], strides = [1, 1, 1]} : vector<32x2x8xf32> to vector<1x2x8xf32>
    %274 = vector.shape_cast %273 : vector<1x2x8xf32> to vector<2x8xf32>
    %275 = tpu.concatenate %268, %270, %272, %274 in 1 : vector<2x8xf32>, vector<2x8xf32>, vector<2x8xf32>, vector<2x8xf32> -> vector<2x32xf32>
    %c0_40 = arith.constant 0 : index
    %c2_41 = arith.constant 2 : index
    %c0_42 = arith.constant 0 : index
    %276 = vector.load %arg18[%c0_40, %c2_41, %c0_42] : memref<2x8x32xf32, #tpu.memory_space<vmem>>, vector<2x1x32xf32>
    %277 = vector.shape_cast %276 : vector<2x1x32xf32> to vector<2x32xf32>
    %278 = vector.shape_cast %275 : vector<2x32xf32> to vector<2x1x32xf32>
    tpu.vector_store %arg18[%c0_40, %c2_41, %c0_42], %278 {strides = array<i32>} : memref<2x8x32xf32, #tpu.memory_space<vmem>>, vector<2x1x32xf32>,
    %279 = vector.extract_strided_slice %242 {offsets = [12, 0, 0], sizes = [1, 2, 8], strides = [1, 1, 1]} : vector<32x2x8xf32> to vector<1x2x8xf32>
    %280 = vector.shape_cast %279 : vector<1x2x8xf32> to vector<2x8xf32>
    %281 = vector.extract_strided_slice %242 {offsets = [13, 0, 0], sizes = [1, 2, 8], strides = [1, 1, 1]} : vector<32x2x8xf32> to vector<1x2x8xf32>
    %282 = vector.shape_cast %281 : vector<1x2x8xf32> to vector<2x8xf32>
    %283 = vector.extract_strided_slice %242 {offsets = [14, 0, 0], sizes = [1, 2, 8], strides = [1, 1, 1]} : vector<32x2x8xf32> to vector<1x2x8xf32>
    %284 = vector.shape_cast %283 : vector<1x2x8xf32> to vector<2x8xf32>
    %285 = vector.extract_strided_slice %242 {offsets = [15, 0, 0], sizes = [1, 2, 8], strides = [1, 1, 1]} : vector<32x2x8xf32> to vector<1x2x8xf32>
    %286 = vector.shape_cast %285 : vector<1x2x8xf32> to vector<2x8xf32>
    %287 = tpu.concatenate %280, %282, %284, %286 in 1 : vector<2x8xf32>, vector<2x8xf32>, vector<2x8xf32>, vector<2x8xf32> -> vector<2x32xf32>
    %c0_43 = arith.constant 0 : index
    %c3_44 = arith.constant 3 : index
    %c0_45 = arith.constant 0 : index
    %288 = vector.load %arg18[%c0_43, %c3_44, %c0_45] : memref<2x8x32xf32, #tpu.memory_space<vmem>>, vector<2x1x32xf32>
    %289 = vector.shape_cast %288 : vector<2x1x32xf32> to vector<2x32xf32>
    %290 = vector.shape_cast %287 : vector<2x32xf32> to vector<2x1x32xf32>
    tpu.vector_store %arg18[%c0_43, %c3_44, %c0_45], %290 {strides = array<i32>} : memref<2x8x32xf32, #tpu.memory_space<vmem>>, vector<2x1x32xf32>,
    %291 = vector.extract_strided_slice %242 {offsets = [16, 0, 0], sizes = [1, 2, 8], strides = [1, 1, 1]} : vector<32x2x8xf32> to vector<1x2x8xf32>
    %292 = vector.shape_cast %291 : vector<1x2x8xf32> to vector<2x8xf32>
    %293 = vector.extract_strided_slice %242 {offsets = [17, 0, 0], sizes = [1, 2, 8], strides = [1, 1, 1]} : vector<32x2x8xf32> to vector<1x2x8xf32>
    %294 = vector.shape_cast %293 : vector<1x2x8xf32> to vector<2x8xf32>
    %295 = vector.extract_strided_slice %242 {offsets = [18, 0, 0], sizes = [1, 2, 8], strides = [1, 1, 1]} : vector<32x2x8xf32> to vector<1x2x8xf32>
    %296 = vector.shape_cast %295 : vector<1x2x8xf32> to vector<2x8xf32>
    %297 = vector.extract_strided_slice %242 {offsets = [19, 0, 0], sizes = [1, 2, 8], strides = [1, 1, 1]} : vector<32x2x8xf32> to vector<1x2x8xf32>
    %298 = vector.shape_cast %297 : vector<1x2x8xf32> to vector<2x8xf32>
    %299 = tpu.concatenate %292, %294, %296, %298 in 1 : vector<2x8xf32>, vector<2x8xf32>, vector<2x8xf32>, vector<2x8xf32> -> vector<2x32xf32>
    %c0_46 = arith.constant 0 : index
    %c4_47 = arith.constant 4 : index
    %c0_48 = arith.constant 0 : index
    %300 = vector.load %arg18[%c0_46, %c4_47, %c0_48] : memref<2x8x32xf32, #tpu.memory_space<vmem>>, vector<2x1x32xf32>
    %301 = vector.shape_cast %300 : vector<2x1x32xf32> to vector<2x32xf32>
    %302 = vector.shape_cast %299 : vector<2x32xf32> to vector<2x1x32xf32>
    tpu.vector_store %arg18[%c0_46, %c4_47, %c0_48], %302 {strides = array<i32>} : memref<2x8x32xf32, #tpu.memory_space<vmem>>, vector<2x1x32xf32>,
    %303 = vector.extract_strided_slice %242 {offsets = [20, 0, 0], sizes = [1, 2, 8], strides = [1, 1, 1]} : vector<32x2x8xf32> to vector<1x2x8xf32>
    %304 = vector.shape_cast %303 : vector<1x2x8xf32> to vector<2x8xf32>
    %305 = vector.extract_strided_slice %242 {offsets = [21, 0, 0], sizes = [1, 2, 8], strides = [1, 1, 1]} : vector<32x2x8xf32> to vector<1x2x8xf32>
    %306 = vector.shape_cast %305 : vector<1x2x8xf32> to vector<2x8xf32>
    %307 = vector.extract_strided_slice %242 {offsets = [22, 0, 0], sizes = [1, 2, 8], strides = [1, 1, 1]} : vector<32x2x8xf32> to vector<1x2x8xf32>
    %308 = vector.shape_cast %307 : vector<1x2x8xf32> to vector<2x8xf32>
    %309 = vector.extract_strided_slice %242 {offsets = [23, 0, 0], sizes = [1, 2, 8], strides = [1, 1, 1]} : vector<32x2x8xf32> to vector<1x2x8xf32>
    %310 = vector.shape_cast %309 : vector<1x2x8xf32> to vector<2x8xf32>
    %311 = tpu.concatenate %304, %306, %308, %310 in 1 : vector<2x8xf32>, vector<2x8xf32>, vector<2x8xf32>, vector<2x8xf32> -> vector<2x32xf32>
    %c0_49 = arith.constant 0 : index
    %c5_50 = arith.constant 5 : index
    %c0_51 = arith.constant 0 : index
    %312 = vector.load %arg18[%c0_49, %c5_50, %c0_51] : memref<2x8x32xf32, #tpu.memory_space<vmem>>, vector<2x1x32xf32>
    %313 = vector.shape_cast %312 : vector<2x1x32xf32> to vector<2x32xf32>
    %314 = vector.shape_cast %311 : vector<2x32xf32> to vector<2x1x32xf32>
    tpu.vector_store %arg18[%c0_49, %c5_50, %c0_51], %314 {strides = array<i32>} : memref<2x8x32xf32, #tpu.memory_space<vmem>>, vector<2x1x32xf32>,
    %315 = vector.extract_strided_slice %242 {offsets = [24, 0, 0], sizes = [1, 2, 8], strides = [1, 1, 1]} : vector<32x2x8xf32> to vector<1x2x8xf32>
    %316 = vector.shape_cast %315 : vector<1x2x8xf32> to vector<2x8xf32>
    %317 = vector.extract_strided_slice %242 {offsets = [25, 0, 0], sizes = [1, 2, 8], strides = [1, 1, 1]} : vector<32x2x8xf32> to vector<1x2x8xf32>
    %318 = vector.shape_cast %317 : vector<1x2x8xf32> to vector<2x8xf32>
    %319 = vector.extract_strided_slice %242 {offsets = [26, 0, 0], sizes = [1, 2, 8], strides = [1, 1, 1]} : vector<32x2x8xf32> to vector<1x2x8xf32>
    %320 = vector.shape_cast %319 : vector<1x2x8xf32> to vector<2x8xf32>
    %321 = vector.extract_strided_slice %242 {offsets = [27, 0, 0], sizes = [1, 2, 8], strides = [1, 1, 1]} : vector<32x2x8xf32> to vector<1x2x8xf32>
    %322 = vector.shape_cast %321 : vector<1x2x8xf32> to vector<2x8xf32>
    %323 = tpu.concatenate %316, %318, %320, %322 in 1 : vector<2x8xf32>, vector<2x8xf32>, vector<2x8xf32>, vector<2x8xf32> -> vector<2x32xf32>
    %c0_52 = arith.constant 0 : index
    %c6_53 = arith.constant 6 : index
    %c0_54 = arith.constant 0 : index
    %324 = vector.load %arg18[%c0_52, %c6_53, %c0_54] : memref<2x8x32xf32, #tpu.memory_space<vmem>>, vector<2x1x32xf32>
    %325 = vector.shape_cast %324 : vector<2x1x32xf32> to vector<2x32xf32>
    %326 = vector.shape_cast %323 : vector<2x32xf32> to vector<2x1x32xf32>
    tpu.vector_store %arg18[%c0_52, %c6_53, %c0_54], %326 {strides = array<i32>} : memref<2x8x32xf32, #tpu.memory_space<vmem>>, vector<2x1x32xf32>,
    %327 = vector.extract_strided_slice %242 {offsets = [28, 0, 0], sizes = [1, 2, 8], strides = [1, 1, 1]} : vector<32x2x8xf32> to vector<1x2x8xf32>
    %328 = vector.shape_cast %327 : vector<1x2x8xf32> to vector<2x8xf32>
    %329 = vector.extract_strided_slice %242 {offsets = [29, 0, 0], sizes = [1, 2, 8], strides = [1, 1, 1]} : vector<32x2x8xf32> to vector<1x2x8xf32>
    %330 = vector.shape_cast %329 : vector<1x2x8xf32> to vector<2x8xf32>
    %331 = vector.extract_strided_slice %242 {offsets = [30, 0, 0], sizes = [1, 2, 8], strides = [1, 1, 1]} : vector<32x2x8xf32> to vector<1x2x8xf32>
    %332 = vector.shape_cast %331 : vector<1x2x8xf32> to vector<2x8xf32>
    %333 = vector.extract_strided_slice %242 {offsets = [31, 0, 0], sizes = [1, 2, 8], strides = [1, 1, 1]} : vector<32x2x8xf32> to vector<1x2x8xf32>
    %334 = vector.shape_cast %333 : vector<1x2x8xf32> to vector<2x8xf32>
    %335 = tpu.concatenate %328, %330, %332, %334 in 1 : vector<2x8xf32>, vector<2x8xf32>, vector<2x8xf32>, vector<2x8xf32> -> vector<2x32xf32>
    %c0_55 = arith.constant 0 : index
    %c7_56 = arith.constant 7 : index
    %c0_57 = arith.constant 0 : index
    %336 = vector.load %arg18[%c0_55, %c7_56, %c0_57] : memref<2x8x32xf32, #tpu.memory_space<vmem>>, vector<2x1x32xf32>
    %337 = vector.shape_cast %336 : vector<2x1x32xf32> to vector<2x32xf32>
    %338 = vector.shape_cast %335 : vector<2x32xf32> to vector<2x1x32xf32>
    tpu.vector_store %arg18[%c0_55, %c7_56, %c0_57], %338 {strides = array<i32>} : memref<2x8x32xf32, #tpu.memory_space<vmem>>, vector<2x1x32xf32>,
    %c0_58 = arith.constant 0 : index
    %c0_59 = arith.constant 0 : index
    %c0_60 = arith.constant 0 : index
    %339 = vector.load %arg18[%c0_58, %c0_59, %c0_60] : memref<2x8x32xf32, #tpu.memory_space<vmem>>, vector<2x8x32xf32>
    %340 = vector.shape_cast %339 : vector<2x8x32xf32> to vector<16x32xf32>
    %c0_61 = arith.constant 0 : index
    %c0_62 = arith.constant 0 : index
    %341 = vector.load %arg5[%c0_61, %c0_62] : memref<32x32xf32, #tpu.memory_space<vmem>>, vector<32x32xf32>
    %cst_63 = arith.constant dense<0.000000e+00> : vector<16x32xf32>
    %342 = tpu.matmul %340, %341, %cst_63 {dimension_numbers = #tpu.dot_dimension_numbers<[1], [0], [0], [1], [0, 0, 1, 1], [], []>} : vector<16x32xf32>, vector<32x32xf32>, vector<16x32xf32> -> vector<16x32xf32>
    %c0_64 = arith.constant 0 : index
    %c0_65 = arith.constant 0 : index
    %343 = vector.load %arg6[%c0_64, %c0_65] : memref<1x32xf32, #tpu.memory_space<vmem>>, vector<1x32xf32>
    %344 = vector.broadcast %343 : vector<1x32xf32> to vector<16x32xf32>
    %345 = arith.addf %342, %344 : vector<16x32xf32>
    %346 = arith.addf %3, %345 : vector<16x32xf32>
    %c0_66 = arith.constant 0 : index
    %c0_67 = arith.constant 0 : index
    %347 = vector.load %arg11[%c0_66, %c0_67] : memref<1x32xf32, #tpu.memory_space<vmem>>, vector<1x32xf32>
    %c0_68 = arith.constant 0 : index
    %c0_69 = arith.constant 0 : index
    %348 = vector.load %arg12[%c0_68, %c0_69] : memref<1x32xf32, #tpu.memory_space<vmem>>, vector<1x32xf32>
    %cst_70 = arith.constant dense<0.000000e+00> : vector<16xf32>
    %349 = vector.multi_reduction <add>, %346, %cst_70 [1] : vector<16x32xf32> to vector<16xf32>
    %350 = vector.shape_cast %349 : vector<16xf32> to vector<16x1xf32>
    %cst_71 = arith.constant 3.125000e-02 : f32
    %351 = vector.broadcast %cst_71 : f32 to vector<16x1xf32>
    %352 = arith.mulf %350, %351 : vector<16x1xf32>
    %353 = arith.mulf %346, %346 : vector<16x32xf32>
    %cst_72 = arith.constant dense<0.000000e+00> : vector<16xf32>
    %354 = vector.multi_reduction <add>, %353, %cst_72 [1] : vector<16x32xf32> to vector<16xf32>
    %355 = vector.shape_cast %354 : vector<16xf32> to vector<16x1xf32>
    %cst_73 = arith.constant 3.125000e-02 : f32
    %356 = vector.broadcast %cst_73 : f32 to vector<16x1xf32>
    %357 = arith.mulf %355, %356 : vector<16x1xf32>
    %358 = arith.mulf %352, %352 : vector<16x1xf32>
    %359 = arith.subf %357, %358 : vector<16x1xf32>
    %360 = vector.broadcast %352 : vector<16x1xf32> to vector<16x32xf32>
    %361 = arith.subf %346, %360 : vector<16x32xf32>
    %cst_74 = arith.constant 9.99999974E-6 : f32
    %362 = vector.broadcast %cst_74 : f32 to vector<16x1xf32>
    %363 = arith.addf %359, %362 : vector<16x1xf32>
    %364 = math.rsqrt %363 : vector<16x1xf32>
    %365 = vector.broadcast %364 : vector<16x1xf32> to vector<16x32xf32>
    %366 = arith.mulf %361, %365 : vector<16x32xf32>
    %367 = vector.broadcast %347 : vector<1x32xf32> to vector<16x32xf32>
    %368 = arith.mulf %366, %367 : vector<16x32xf32>
    %369 = vector.broadcast %348 : vector<1x32xf32> to vector<16x32xf32>
    %370 = arith.addf %368, %369 : vector<16x32xf32>
    %c0_75 = arith.constant 0 : index
    %c0_76 = arith.constant 0 : index
    %371 = vector.load %arg7[%c0_75, %c0_76] : memref<32x128xf32, #tpu.memory_space<vmem>>, vector<32x128xf32>
    %cst_77 = arith.constant dense<0.000000e+00> : vector<16x128xf32>
    %372 = tpu.matmul %370, %371, %cst_77 {dimension_numbers = #tpu.dot_dimension_numbers<[1], [0], [0], [1], [0, 0, 1, 1], [], []>} : vector<16x32xf32>, vector<32x128xf32>, vector<16x128xf32> -> vector<16x128xf32>
    %c0_78 = arith.constant 0 : index
    %c0_79 = arith.constant 0 : index
    %373 = vector.load %arg8[%c0_78, %c0_79] : memref<1x128xf32, #tpu.memory_space<vmem>>, vector<1x128xf32>
    %374 = vector.broadcast %373 : vector<1x128xf32> to vector<16x128xf32>
    %375 = arith.addf %372, %374 : vector<16x128xf32>
    %cst_80 = arith.constant 0.000000e+00 : f32
    %376 = vector.broadcast %cst_80 : f32 to vector<16x128xf32>
    %377 = arith.maximumf %375, %376 : vector<16x128xf32>
    %c0_81 = arith.constant 0 : index
    %c0_82 = arith.constant 0 : index
    %378 = vector.load %arg9[%c0_81, %c0_82] : memref<128x32xf32, #tpu.memory_space<vmem>>, vector<128x32xf32>
    %cst_83 = arith.constant dense<0.000000e+00> : vector<16x32xf32>
    %379 = tpu.matmul %377, %378, %cst_83 {dimension_numbers = #tpu.dot_dimension_numbers<[1], [0], [0], [1], [0, 0, 1, 1], [], []>} : vector<16x128xf32>, vector<128x32xf32>, vector<16x32xf32> -> vector<16x32xf32>
    %c0_84 = arith.constant 0 : index
    %c0_85 = arith.constant 0 : index
    %380 = vector.load %arg10[%c0_84, %c0_85] : memref<1x32xf32, #tpu.memory_space<vmem>>, vector<1x32xf32>
    %381 = vector.broadcast %380 : vector<1x32xf32> to vector<16x32xf32>
    %382 = arith.addf %379, %381 : vector<16x32xf32>
    %383 = arith.addf %370, %382 : vector<16x32xf32>
    %c0_86 = arith.constant 0 : index
    %c0_87 = arith.constant 0 : index
    %384 = vector.load %arg13[%c0_86, %c0_87] : memref<1x32xf32, #tpu.memory_space<vmem>>, vector<1x32xf32>
    %c0_88 = arith.constant 0 : index
    %c0_89 = arith.constant 0 : index
    %385 = vector.load %arg14[%c0_88, %c0_89] : memref<1x32xf32, #tpu.memory_space<vmem>>, vector<1x32xf32>
    %cst_90 = arith.constant dense<0.000000e+00> : vector<16xf32>
    %386 = vector.multi_reduction <add>, %383, %cst_90 [1] : vector<16x32xf32> to vector<16xf32>
    %387 = vector.shape_cast %386 : vector<16xf32> to vector<16x1xf32>
    %cst_91 = arith.constant 3.125000e-02 : f32
    %388 = vector.broadcast %cst_91 : f32 to vector<16x1xf32>
    %389 = arith.mulf %387, %388 : vector<16x1xf32>
    %390 = arith.mulf %383, %383 : vector<16x32xf32>
    %cst_92 = arith.constant dense<0.000000e+00> : vector<16xf32>
    %391 = vector.multi_reduction <add>, %390, %cst_92 [1] : vector<16x32xf32> to vector<16xf32>
    %392 = vector.shape_cast %391 : vector<16xf32> to vector<16x1xf32>
    %cst_93 = arith.constant 3.125000e-02 : f32
    %393 = vector.broadcast %cst_93 : f32 to vector<16x1xf32>
    %394 = arith.mulf %392, %393 : vector<16x1xf32>
    %395 = arith.mulf %389, %389 : vector<16x1xf32>
    %396 = arith.subf %394, %395 : vector<16x1xf32>
    %397 = vector.broadcast %389 : vector<16x1xf32> to vector<16x32xf32>
    %398 = arith.subf %383, %397 : vector<16x32xf32>
    %cst_94 = arith.constant 9.99999974E-6 : f32
    %399 = vector.broadcast %cst_94 : f32 to vector<16x1xf32>
    %400 = arith.addf %396, %399 : vector<16x1xf32>
    %401 = math.rsqrt %400 : vector<16x1xf32>
    %402 = vector.broadcast %401 : vector<16x1xf32> to vector<16x32xf32>
    %403 = arith.mulf %398, %402 : vector<16x32xf32>
    %404 = vector.broadcast %384 : vector<1x32xf32> to vector<16x32xf32>
    %405 = arith.mulf %403, %404 : vector<16x32xf32>
    %406 = vector.broadcast %385 : vector<1x32xf32> to vector<16x32xf32>
    %407 = arith.addf %405, %406 : vector<16x32xf32>
    %408 = vector.shape_cast %407 : vector<16x32xf32> to vector<2x8x32xf32>
    "tpu.trace_start"() <{level = 10 : i32, message = "bsh,bth->bst"}> : () -> ()
    %cst_95 = arith.constant dense<0.000000e+00> : vector<2x8x8xf32>
    %409 = tpu.matmul %408, %408, %cst_95 {dimension_numbers = #tpu.dot_dimension_numbers<[2], [2], [1], [1], [0, 0, 0, 1, 1, 1], [0], [0]>} : vector<2x8x32xf32>, vector<2x8x32xf32>, vector<2x8x8xf32> -> vector<2x8x8xf32>
    "tpu.trace_stop"() : () -> ()
    %c0_96 = arith.constant 0 : index
    %c0_97 = arith.constant 0 : index
    %c0_98 = arith.constant 0 : index
    %410 = vector.load %arg16[%c0_96, %c0_97, %c0_98] : memref<2x8x8xf32, #tpu.memory_space<vmem>>, vector<2x8x8xf32>
    tpu.vector_store %arg16[%c0_96, %c0_97, %c0_98], %409 {strides = array<i32>} : memref<2x8x8xf32, #tpu.memory_space<vmem>>, vector<2x8x8xf32>,
    return
  }
  func.func @transform_0(%arg0: i32) -> (i32, i32) {
    %c0_i32 = arith.constant 0 : i32
    %c0_i32_0 = arith.constant 0 : i32
    %c0_i32_1 = arith.constant 0 : i32
    return %c0_i32, %c0_i32_0 : i32, i32
  }
  func.func @transform_1(%arg0: i32) -> (i32, i32) {
    %c0_i32 = arith.constant 0 : i32
    %c0_i32_0 = arith.constant 0 : i32
    %c0_i32_1 = arith.constant 0 : i32
    return %c0_i32, %c0_i32_0 : i32, i32
  }
  func.func @transform_2(%arg0: i32) -> (i32, i32) {
    %c0_i32 = arith.constant 0 : i32
    %c0_i32_0 = arith.constant 0 : i32
    %c0_i32_1 = arith.constant 0 : i32
    return %c0_i32, %c0_i32_0 : i32, i32
  }
  func.func @transform_3(%arg0: i32) -> (i32, i32) {
    %c0_i32 = arith.constant 0 : i32
    %c0_i32_0 = arith.constant 0 : i32
    %c0_i32_1 = arith.constant 0 : i32
    return %c0_i32, %c0_i32_0 : i32, i32
  }
  func.func @transform_4(%arg0: i32) -> (i32, i32) {
    %c0_i32 = arith.constant 0 : i32
    %c0_i32_0 = arith.constant 0 : i32
    %c0_i32_1 = arith.constant 0 : i32
    return %c0_i32, %c0_i32_0 : i32, i32
  }
  func.func @transform_5(%arg0: i32) -> (i32, i32) {
    %c0_i32 = arith.constant 0 : i32
    %c0_i32_0 = arith.constant 0 : i32
    %c0_i32_1 = arith.constant 0 : i32
    return %c0_i32, %c0_i32_0 : i32, i32
  }
  func.func @transform_6(%arg0: i32) -> (i32, i32) {
    %c0_i32 = arith.constant 0 : i32
    %c0_i32_0 = arith.constant 0 : i32
    %c0_i32_1 = arith.constant 0 : i32
    return %c0_i32, %c0_i32_0 : i32, i32
  }
  func.func @transform_7(%arg0: i32) -> (i32, i32) {
    %c0_i32 = arith.constant 0 : i32
    %c0_i32_0 = arith.constant 0 : i32
    %c0_i32_1 = arith.constant 0 : i32
    return %c0_i32, %c0_i32_0 : i32, i32
  }
  func.func @transform_8(%arg0: i32) -> (i32, i32) {
    %c0_i32 = arith.constant 0 : i32
    %c0_i32_0 = arith.constant 0 : i32
    %c0_i32_1 = arith.constant 0 : i32
    return %c0_i32, %c0_i32_0 : i32, i32
  }
  func.func @transform_9(%arg0: i32) -> (i32, i32) {
    %c0_i32 = arith.constant 0 : i32
    %c0_i32_0 = arith.constant 0 : i32
    %c0_i32_1 = arith.constant 0 : i32
    return %c0_i32, %c0_i32_0 : i32, i32
  }
  func.func @transform_10(%arg0: i32) -> (i32, i32) {
    %c0_i32 = arith.constant 0 : i32
    %c0_i32_0 = arith.constant 0 : i32
    %c0_i32_1 = arith.constant 0 : i32
    return %c0_i32, %c0_i32_0 : i32, i32
  }
  func.func @transform_11(%arg0: i32) -> (i32, i32) {
    %c0_i32 = arith.constant 0 : i32
    %c0_i32_0 = arith.constant 0 : i32
    %c0_i32_1 = arith.constant 0 : i32
    return %c0_i32, %c0_i32_0 : i32, i32
  }
  func.func @transform_12(%arg0: i32) -> (i32, i32) {
    %c0_i32 = arith.constant 0 : i32
    %c0_i32_0 = arith.constant 0 : i32
    %c0_i32_1 = arith.constant 0 : i32
    return %c0_i32, %c0_i32_0 : i32, i32
  }
  func.func @transform_13(%arg0: i32) -> (i32, i32) {
    %c0_i32 = arith.constant 0 : i32
    %c0_i32_0 = arith.constant 0 : i32
    %c0_i32_1 = arith.constant 0 : i32
    return %c0_i32, %c0_i32_0 : i32, i32
  }
  func.func @transform_14(%arg0: i32) -> (i32, i32) {
    %c0_i32 = arith.constant 0 : i32
    %c0_i32_0 = arith.constant 0 : i32
    %c0_i32_1 = arith.constant 0 : i32
    return %c0_i32, %c0_i32_0 : i32, i32
  }
  func.func @transform_15(%arg0: i32) -> (i32, i32, i32) {
    %c0_i32 = arith.constant 0 : i32
    %c0_i32_0 = arith.constant 0 : i32
    %c0_i32_1 = arith.constant 0 : i32
    %c0_i32_2 = arith.constant 0 : i32
    return %c0_i32, %c0_i32_0, %c0_i32_1 : i32, i32, i32
  }
}

</mosaic_0001>

<bundles_post_ra>
// kernel: tpu_custom_call.1
= control target key start
LH: loop header
LB: loop body
LE: loop exit
PB: predicated region body
PF: predicated region fallthrough
CT: control target
= control target key end

     0   :  { %21 = vsyncpa [#allocation5], 0  ;;  %vm56_vm0 = vcmask 261120   ;;  %s8913_s0 = inlined_call_operand.vmem [shape: f32[16,32], index: 0, kind: input, shape index: {}]   ;;  %s8914_s1 = inlined_call_operand.vmem [shape: f32[8,32], index: 1, kind: input, shape index: {}]   ;;  %s8915_s2 = inlined_call_operand.vmem [shape: f32[32,96], index: 2, kind: input, shape index: {}]   ;;  %s8916_s3 = inlined_call_operand.vmem [shape: f32[1,96], index: 3, kind: input, shape index: {}]   ;;  %s8917_s4 = inlined_call_operand.vmem [shape: f32[32,32], index: 4, kind: input, shape index: {}]   ;;  %s8918_s5 = inlined_call_operand.vmem [shape: f32[1,32], index: 5, kind: input, shape index: {}]   ;;  %s8919_s6 = inlined_call_operand.vmem [shape: f32[32,128], index: 6, kind: input, shape index: {}]   ;;  %s8920_s7 = inlined_call_operand.vmem [shape: f32[1,128], index: 7, kind: input, shape index: {}]   ;;  %s8921_s8 = inlined_call_operand.vmem [shape: f32[128,32], index: 8, kind: input, shape index: {}]   ;;  %s8922_s9 = inlined_call_operand.vmem [shape: f32[1,32], index: 9, kind: input, shape index: {}]   ;;  %s8923_s10 = inlined_call_operand.vmem [shape: f32[1,32], index: 10, kind: input, shape index: {}]   ;;  %s8924_s11 = inlined_call_operand.vmem [shape: f32[1,32], index: 11, kind: input, shape index: {}]   ;;  %s8925_s12 = inlined_call_operand.vmem [shape: f32[1,32], index: 12, kind: input, shape index: {}]   ;;  %s8926_s13 = inlined_call_operand.vmem [shape: f32[1,32], index: 13, kind: input, shape index: {}]   ;;  %s8927_s14 = inlined_call_operand.hbm [shape: f32[16,32], index: 14, kind: output, shape index: {0}]   ;;  %s8928_s15 = inlined_call_operand.hbm [shape: f32[2,8,8], index: 15, kind: output, shape index: {1}]  }
   0x1   :  { %v62_v0 = vld [vmem:[%s8915_s2 + $0x18] sm:$0xff]  ;;  %v61_v1 = vld [vmem:[%s8915_s2 + $0x10] sm:$0xff]  ;;  %v51_v2 = vld [vmem:[%s8914_s1] sm:$0xff] }
   0x2   :  { %6850 = vmatprep.subr.mxu1 %v62_v0  ;;  %v52_v3 = vld [vmem:[%s8913_s0] sm:$0xff]  ;;  %v60_v4 = vld [vmem:[%s8915_s2 + $0x8] sm:$0xff] }
   0x3   :  { %6851 = vmatpush3.msra.mxu1 %v62_v0  ;;  %v53_v5 = vld [vmem:[%s8913_s0 + $0x8] sm:$0xff]  ;;  %v7554_v6 = vadd.f32 %v52_v3, %v51_v2 }
   0x5   :  { %8933 = vst [vmem:[#allocation10_spill] sm:$0xff] %v7554_v6 }
   0x6   :  { %22 = vsyncpa [#allocation7], 0  ;;  %6852 = vmatprep.subr.mxu1 %v61_v1  ;;  %v7556_v7 = vadd.f32 %v53_v5, %v51_v2  ;;  %v59_v8 = vld [vmem:[%s8915_s2] sm:$0xff]  ;;  %6858 = vmatprep.mubr.msk.f32.mxu1 %vm56_vm0, %v7554_v6  ;;  %57 = vst.msk [vmem:[#allocation4] sm:$0xff] %vm56_vm0, %v7554_v6  ;;  %vm151_vm1 = vcmask 785408   ;;  %s7442_s2 = smov 112  }
   0x7   :  { %6853 = vmatpush3.msra.mxu1 %v61_v1  ;;  %v6536_v9 = vld [vmem:[%s8916_s3] ss:$0 sm:$0xff]  ;;  %s7443_s17 = smov 120   ;;  %vm283_vm2 = vcmask 1041409   ;;  %s7444_s3 = smov 104   ;;  %v8929_v36 = vmov 0.0  }
   0x8   :  { %8934 = vst [vmem:[#allocation11_spill] sm:$0xff] %v7556_v7  ;;  %6854 = vmatprep.subr.mxu1 %v60_v4  ;;  %58 = vst.msk [vmem:[#allocation4 + $0x8] sm:$0xff] %vm56_vm0, %v7556_v7  ;;  %6881 = vmatprep.subr.mxu0 %v8929_v36  ;;  %vm7446_vm3 = vmmov 0   ;;  %s7447_s18 = smov 96   ;;  %vm287_vm4 = vcmask 64512   ;;  %s7448_s19 = smov 64  }
   0x9   :  { %6855 = vmatpush3.msra.mxu1 %v60_v4  ;;  %6883 = vmatprep.mubr.msk.f32.mxu0 %vm7446_vm3, %v8929_v36  ;;  %vm3171_vm5 = vcmask 1041408   ;;  %vm2812_vm6 = vcmask 9216   ;;  %vm3167_vm7 = vcmask 15360   ;;  %s7449_s20 = smov 8   ;;  %s7450_s21 = smov 16   ;;  %vm5644_vm8 = vcmask 130048  }
   0xa   :  { %6856 = vmatprep.subr.mxu1 %v59_v8  ;;  %s7451_s22 = smov 24   ;;  %vm5646_vm9 = vcmask 195584   ;;  %vm5673_vm10 = vcmask 253952  }
   0xb   :  { %6857 = vmatpush3.msra.mxu1 %v59_v8 }
   0xc   :  { %6859 = vmatmul.mubr.msk.f32.vlgmr.msra.gmra.mxu1 %vm56_vm0, %v7556_v7  ;;  %6861 = vmatprep.subr.mxu1 %v8929_v36 }
   0xd   :  { %6863 = vmatprep.mubr.msk.f32.mxu1 %vm7446_vm3, %v8929_v36 }
  0xcc   :  { %v6860_v10 = vpop.f32.mrf.mxu1 }
  0xcd   :  { %v148_v11 = vadd.f32 %v6860_v10, %v6536_v9 }
  0xce   :  { %v142_v12 = vpop.f32.mrf.mxu1 }
  0xcf   :  { %153 = vst.msk [vmem:[#allocation2 + $0x8] sm:$0xff] %vm151_vm1, %v148_v11  ;;  %v143_v13 = vadd.f32 %v6536_v9, %v142_v12 }
  0xd1   :  { %152 = vst.msk [vmem:[#allocation2] sm:$0xff] %vm151_vm1, %v143_v13 }
  0xd6   :  { %v155_v14 = vld [vmem:[#allocation2 + $0x8] sm:$0x1]  ;;  %v157_v15 = vld [vmem:[#allocation2 + $0x9] sm:$0x1]  ;;  %v159_v16 = vld [vmem:[#allocation2 + $0xa] sm:$0x1] }
  0xd7   :  { %178 = vrot.lane.b32.xlu1 %v155_v14, %s7442_s2  ;;  %174 = vrot.lane.b32.xlu0 %v155_v14, %s7443_s17  ;;  %v161_v17 = vld [vmem:[#allocation2 + $0xb] sm:$0x1]  ;;  %v282_v22 = vrot.slane %v155_v14, 7  ;;  %v596_v23 = vrot.slane %v157_v15, 7  ;;  %v908_v24 = vrot.slane %v159_v16, 7 }
  0xd8   :  { %v154_v18 = vld [vmem:[#allocation2] sm:$0x1]  ;;  %v156_v19 = vld [vmem:[#allocation2 + $0x1] sm:$0x1]  ;;  %v158_v20 = vld [vmem:[#allocation2 + $0x2] sm:$0x1] }
  0xd9   :  { %v160_v21 = vld [vmem:[#allocation2 + $0x3] sm:$0x1]  ;;  %v1220_v25 = vrot.slane %v161_v17, 7  ;;  %v7577_v26 = vsel %vm283_vm2, %v282_v22, %v154_v18  ;;  %v7580_v27 = vsel %vm283_vm2, %v596_v23, %v156_v19  ;;  %v7583_v28 = vsel %vm283_vm2, %v908_v24, %v158_v20  ;;  %v7592_v30 = vld [vmem:[#allocation2 + $0xc] sm:$0x1] }
  0xda   :  { %v7603_v31 = vld [vmem:[#allocation2 + $0xd] sm:$0x1]  ;;  %v7619_v32 = vld [vmem:[#allocation2 + $0xe] sm:$0x1]  ;;  %v7625_v33 = vld [vmem:[#allocation2 + $0xf] sm:$0x1] }
  0xdb   :  { %196 = vrot.lane.b32.xlu1 %v157_v15, %s7444_s3  ;;  %182 = vrot.lane.b32.xlu0 %v155_v14, %s7444_s3  ;;  %v7586_v29 = vsel %vm283_vm2, %v1220_v25, %v160_v21  ;;  %v7633_v34 = vld [vmem:[#allocation2 + $0x4] sm:$0x1]  ;;  %v7642_v35 = vld [vmem:[#allocation2 + $0x5] sm:$0x1]  ;;  %v7658_v37 = vld [vmem:[#allocation2 + $0x6] sm:$0x1] }
  0xdc   :  { %v7664_v38 = vld [vmem:[#allocation2 + $0x7] sm:$0x1] }
  0xdf   :  { %210 = vrot.lane.b32.xlu1 %v159_v16, %s7444_s3  ;;  %188 = vrot.lane.b32.xlu0 %v157_v15, %s7443_s17 }
  0xe3   :  { %224 = vrot.lane.b32.xlu1 %v161_v17, %s7444_s3  ;;  %192 = vrot.lane.b32.xlu0 %v157_v15, %s7442_s2 }
  0xe7   :  { %238 = vrot.lane.b32.xlu1 %v7592_v30, %s7444_s3  ;;  %202 = vrot.lane.b32.xlu0 %v159_v16, %s7443_s17 }
  0xeb   :  { %206 = vrot.lane.b32.xlu0 %v159_v16, %s7442_s2  ;;  %176 = vrot.lane.b32.xlu1 %v154_v18, %s7442_s2 }
  0xef   :  { %216 = vrot.lane.b32.xlu0 %v161_v17, %s7443_s17  ;;  %180 = vrot.lane.b32.xlu1 %v154_v18, %s7444_s3 }
  0xf3   :  { %220 = vrot.lane.b32.xlu0 %v161_v17, %s7442_s2  ;;  %186 = vrot.lane.b32.xlu1 %v156_v19, %s7443_s17 }
  0xf7   :  { %230 = vrot.lane.b32.xlu0 %v7592_v30, %s7443_s17  ;;  %252 = vrot.lane.b32.xlu1 %v7603_v31, %s7444_s3 }
  0xfb   :  { %194 = vrot.lane.b32.xlu1 %v156_v19, %s7444_s3  ;;  %172 = vrot.lane.b32.xlu0 %v154_v18, %s7443_s17 }
  0xff   :  { %200 = vrot.lane.b32.xlu1 %v158_v20, %s7443_s17  ;;  %234 = vrot.lane.b32.xlu0 %v7592_v30, %s7442_s2 }
 0x103   :  { %208 = vrot.lane.b32.xlu1 %v158_v20, %s7444_s3  ;;  %244 = vrot.lane.b32.xlu0 %v7603_v31, %s7443_s17 }
 0x107   :  { %214 = vrot.lane.b32.xlu1 %v160_v21, %s7443_s17  ;;  %190 = vrot.lane.b32.xlu0 %v156_v19, %s7442_s2 }
 0x10b   :  { %266 = vrot.lane.b32.xlu1 %v7619_v32, %s7444_s3  ;;  %248 = vrot.lane.b32.xlu0 %v7603_v31, %s7442_s2 }
 0x10f   :  { %272 = vrot.lane.b32.xlu1 %v7625_v33, %s7443_s17  ;;  %204 = vrot.lane.b32.xlu0 %v158_v20, %s7442_s2 }
 0x113   :  { %222 = vrot.lane.b32.xlu1 %v160_v21, %s7444_s3  ;;  %258 = vrot.lane.b32.xlu0 %v7619_v32, %s7443_s17 }
 0x117   :  { %228 = vrot.lane.b32.xlu1 %v7633_v34, %s7443_s17  ;;  %218 = vrot.lane.b32.xlu0 %v160_v21, %s7442_s2 }
 0x11b   :  { %236 = vrot.lane.b32.xlu1 %v7633_v34, %s7444_s3  ;;  %262 = vrot.lane.b32.xlu0 %v7619_v32, %s7442_s2 }
 0x11f   :  { %242 = vrot.lane.b32.xlu1 %v7642_v35, %s7443_s17  ;;  %232 = vrot.lane.b32.xlu0 %v7633_v34, %s7442_s2 }
 0x123   :  { %250 = vrot.lane.b32.xlu1 %v7642_v35, %s7444_s3  ;;  %276 = vrot.lane.b32.xlu0 %v7625_v33, %s7442_s2 }
 0x127   :  { %256 = vrot.lane.b32.xlu1 %v7658_v37, %s7443_s17  ;;  %246 = vrot.lane.b32.xlu0 %v7642_v35, %s7442_s2 }
 0x12b   :  { %270 = vrot.lane.b32.xlu1 %v7664_v38, %s7443_s17  ;;  %260 = vrot.lane.b32.xlu0 %v7658_v37, %s7442_s2 }
 0x12f   :  { %264 = vrot.lane.b32.xlu0 %v7658_v37, %s7444_s3  ;;  %285 = vrot.lane.b32.xlu1 %v7577_v26, %s7447_s18 }
 0x133   :  { %280 = vrot.lane.b32.xlu1 %v7625_v33, %s7444_s3 }
 0x149   :  { %v179_v39 = vpop.permute.xlu1 %178  ;;  %v175_v40 = vpop.permute.xlu0 %174 }
 0x14a   :  { %v440_v49 = vrot.slane %v179_v39, 7  ;;  %v362_v63 = vrot.slane %v175_v40, 7 }
 0x14d   :  { %v197_v41 = vpop.permute.xlu1 %196  ;;  %v183_v42 = vpop.permute.xlu0 %182 }
 0x14e   :  { %v518_v53 = vrot.slane %v183_v42, 7  ;;  %v830_v0 = vrot.slane %v197_v41, 7 }
 0x151   :  { %v211_v43 = vpop.permute.xlu1 %210  ;;  %v189_v44 = vpop.permute.xlu0 %188 }
 0x152   :  { %v674_v57 = vrot.slane %v189_v44, 7  ;;  %v1142_v11 = vrot.slane %v211_v43, 7 }
 0x155   :  { %v225_v45 = vpop.permute.xlu1 %224  ;;  %v193_v46 = vpop.permute.xlu0 %192 }
 0x156   :  { %v752_v19 = vrot.slane %v193_v46, 7  ;;  %v1454_v25 = vrot.slane %v225_v45, 7 }
 0x159   :  { %v7676_v47 = vpop.permute.xlu1 %238  ;;  %v203_v48 = vpop.permute.xlu0 %202 }
 0x15a   :  { %v986_v5 = vrot.slane %v203_v48, 7 }
 0x15d   :  { %v207_v50 = vpop.permute.xlu0 %206  ;;  %v177_v51 = vpop.permute.xlu1 %176 }
 0x15e   :  { %v7679_v52 = vsel %vm283_vm2, %v440_v49, %v177_v51  ;;  %v1064_v39 = vrot.slane %v207_v50, 7  ;;  %v1766_v49 = vrot.slane %v7676_v47, 7 }
 0x15f   :  { %442 = vrot.lane.b32.xlu1 %v7679_v52, %s7447_s18 }
 0x161   :  { %v217_v54 = vpop.permute.xlu0 %216  ;;  %v181_v55 = vpop.permute.xlu1 %180 }
 0x162   :  { %v7684_v56 = vsel %vm283_vm2, %v518_v53, %v181_v55  ;;  %v1298_v15 = vrot.slane %v217_v54, 7 }
 0x163   :  { %520 = vrot.lane.b32.xlu1 %v7684_v56, %s7447_s18 }
 0x165   :  { %v221_v58 = vpop.permute.xlu0 %220  ;;  %v187_v59 = vpop.permute.xlu1 %186 }
 0x166   :  { %v7689_v60 = vsel %vm283_vm2, %v674_v57, %v187_v59  ;;  %v1376_v50 = vrot.slane %v221_v58, 7  ;;  %v1532_v57 = vrot.slane %v7592_v30, 7 }
 0x167   :  { %676 = vrot.lane.b32.xlu1 %v7689_v60, %s7447_s18 }
 0x168   :  { %v7768_v58 = vsel %vm283_vm2, %v1532_v57, %v7633_v34 }
 0x169   :  { %v231_v61 = vpop.permute.xlu0 %230  ;;  %v7693_v62 = vpop.permute.xlu1 %252 }
 0x16a   :  { %v1610_v44 = vrot.slane %v231_v61, 7  ;;  %v2078_v30 = vrot.slane %v7693_v62, 7 }
 0x16d   :  { %v195_v1 = vpop.permute.xlu1 %194  ;;  %v173_v2 = vpop.permute.xlu0 %172 }
 0x16e   :  { %v7696_v3 = vsel %vm283_vm2, %v362_v63, %v173_v2  ;;  %v7699_v4 = vsel %vm283_vm2, %v830_v0, %v195_v1 }
 0x16f   :  { %364 = vrot.lane.b32.xlu0 %v7696_v3, %s7447_s18  ;;  %832 = vrot.lane.b32.xlu1 %v7699_v4, %s7447_s18 }
 0x171   :  { %v201_v8 = vpop.permute.xlu1 %200  ;;  %v235_v9 = vpop.permute.xlu0 %234 }
 0x172   :  { %v7706_v10 = vsel %vm283_vm2, %v986_v5, %v201_v8  ;;  %v1688_v0 = vrot.slane %v235_v9, 7  ;;  %v1844_v8 = vrot.slane %v7603_v31, 7 }
 0x173   :  { %274 = vrot.lane.b32.xlu0 %v7664_v38, %s7442_s2  ;;  %988 = vrot.lane.b32.xlu1 %v7706_v10, %s7447_s18 }
 0x174   :  { %v7791_v9 = vsel %vm283_vm2, %v1844_v8, %v7642_v35 }
 0x175   :  { %v209_v12 = vpop.permute.xlu1 %208  ;;  %v245_v13 = vpop.permute.xlu0 %244 }
 0x176   :  { %v7713_v14 = vsel %vm283_vm2, %v1142_v11, %v209_v12  ;;  %v1922_v59 = vrot.slane %v245_v13, 7 }
 0x177   :  { %278 = vrot.lane.b32.xlu0 %v7664_v38, %s7444_s3  ;;  %1144 = vrot.lane.b32.xlu1 %v7713_v14, %s7447_s18 }
 0x179   :  { %v215_v16 = vpop.permute.xlu1 %214  ;;  %v191_v17 = vpop.permute.xlu0 %190 }
 0x17a   :  { %v7720_v18 = vsel %vm283_vm2, %v1298_v15, %v215_v16  ;;  %v7729_v22 = vsel %vm283_vm2, %v752_v19, %v191_v17  ;;  %v2156_v19 = vrot.slane %v7619_v32, 7 }
 0x17b   :  { %598 = vrot.lane.b32.xlu0 %v7580_v27, %s7447_s18  ;;  %1300 = vrot.lane.b32.xlu1 %v7720_v18, %s7447_s18 }
 0x17d   :  { %v7726_v20 = vpop.permute.xlu1 %266  ;;  %v249_v21 = vpop.permute.xlu0 %248 }
 0x17e   :  { %v2000_v31 = vrot.slane %v249_v21, 7  ;;  %v2390_v35 = vrot.slane %v7726_v20, 7  ;;  %v7810_v21 = vsel %vm283_vm2, %v2156_v19, %v7658_v37 }
 0x17f   :  { %754 = vrot.lane.b32.xlu0 %v7729_v22, %s7447_s18 }
 0x181   :  { %v7733_v23 = vpop.permute.xlu1 %272  ;;  %v205_v24 = vpop.permute.xlu0 %204 }
 0x182   :  { %v7738_v42 = vsel %vm283_vm2, %v1064_v39, %v205_v24  ;;  %v2546_v32 = vrot.slane %v7733_v23, 7 }
 0x183   :  { %910 = vrot.lane.b32.xlu0 %v7583_v28, %s7447_s18 }
 0x185   :  { %v223_v40 = vpop.permute.xlu1 %222  ;;  %v259_v41 = vpop.permute.xlu0 %258 }
 0x186   :  { %v7741_v43 = vsel %vm283_vm2, %v1454_v25, %v223_v40  ;;  %v2234_v11 = vrot.slane %v259_v41, 7  ;;  %v2468_v41 = vrot.slane %v7625_v33, 7 }
 0x187   :  { %1066 = vrot.lane.b32.xlu0 %v7738_v42, %s7447_s18  ;;  %1456 = vrot.lane.b32.xlu1 %v7741_v43, %s7447_s18 }
 0x188   :  { %v7838_v23 = vsel %vm283_vm2, %v2468_v41, %v7664_v38 }
 0x189   :  { %v229_v46 = vpop.permute.xlu1 %228  ;;  %v219_v48 = vpop.permute.xlu0 %218 }
 0x18a   :  { %v7748_v45 = vsel %vm283_vm2, %v1610_v44, %v229_v46  ;;  %v7756_v54 = vsel %vm283_vm2, %v1376_v50, %v219_v48 }
 0x18b   :  { %1222 = vrot.lane.b32.xlu0 %v7586_v29, %s7447_s18  ;;  %1612 = vrot.lane.b32.xlu1 %v7748_v45, %s7447_s18 }
 0x18d   :  { %v237_v51 = vpop.permute.xlu1 %236  ;;  %v263_v53 = vpop.permute.xlu0 %262 }
 0x18e   :  { %v7759_v55 = vsel %vm283_vm2, %v1766_v49, %v237_v51  ;;  %v2312_v20 = vrot.slane %v263_v53, 7 }
 0x18f   :  { %1378 = vrot.lane.b32.xlu0 %v7756_v54, %s7447_s18  ;;  %1768 = vrot.lane.b32.xlu1 %v7759_v55, %s7447_s18 }
 0x191   :  { %v243_v61 = vpop.permute.xlu1 %242  ;;  %v233_v47 = vpop.permute.xlu0 %232 }
 0x192   :  { %v7771_v63 = vsel %vm283_vm2, %v1922_v59, %v243_v61  ;;  %v7779_v5 = vsel %vm283_vm2, %v1688_v0, %v233_v47 }
 0x193   :  { %1534 = vrot.lane.b32.xlu0 %v7768_v58, %s7447_s18  ;;  %1924 = vrot.lane.b32.xlu1 %v7771_v63, %s7447_s18 }
 0x195   :  { %v251_v1 = vpop.permute.xlu1 %250  ;;  %v277_v2 = vpop.permute.xlu0 %276 }
 0x196   :  { %v7782_v34 = vsel %vm283_vm2, %v2078_v30, %v251_v1  ;;  %v2624_v49 = vrot.slane %v277_v2, 7 }
 0x197   :  { %1690 = vrot.lane.b32.xlu0 %v7779_v5, %s7447_s18  ;;  %2080 = vrot.lane.b32.xlu1 %v7782_v34, %s7447_s18 }
 0x199   :  { %v257_v12 = vpop.permute.xlu1 %256  ;;  %v247_v62 = vpop.permute.xlu0 %246 }
 0x19a   :  { %v7794_v13 = vsel %vm283_vm2, %v2234_v11, %v257_v12  ;;  %v7801_v17 = vsel %vm283_vm2, %v2000_v31, %v247_v62 }
 0x19b   :  { %1846 = vrot.lane.b32.xlu0 %v7791_v9, %s7447_s18  ;;  %2236 = vrot.lane.b32.xlu1 %v7794_v13, %s7447_s18 }
 0x19d   :  { %v271_v15 = vpop.permute.xlu1 %270  ;;  %v261_v16 = vpop.permute.xlu0 %260 }
 0x19e   :  { %v7824_v37 = vsel %vm283_vm2, %v2312_v20, %v261_v16  ;;  %v7827_v40 = vsel %vm283_vm2, %v2546_v32, %v271_v15 }
 0x19f   :  { %2002 = vrot.lane.b32.xlu0 %v7801_v17, %s7447_s18 }
 0x1a1   :  { %v265_v24 = vpop.permute.xlu0 %264  ;;  %v286_v25 = vpop.permute.xlu1 %285 }
 0x1a2   :  { %6862 = vmatpush3.xpose.msk.msra.mxu1 %vm287_vm4, %v286_v25  ;;  %v7813_v39 = vsel %vm283_vm2, %v2390_v35, %v265_v24 }
 0x1a3   :  { %2158 = vrot.lane.b32.xlu0 %v7810_v21, %s7447_s18  ;;  %2392 = vrot.lane.b32.xlu1 %v7813_v39, %s7447_s18 }
 0x1a4   :  { %6866 = vmatprep.subr.mxu1 %v8929_v36 }
 0x1a5   :  { %6864 = vmatmul.mubr.msk.f32.vlgmr.msra.gmra.mxu1 %vm287_vm4, %v7577_v26  ;;  %v281_v44 = vpop.permute.xlu1 %280 }
 0x1a6   :  { %6868 = vmatprep.mubr.msk.f32.mxu1 %vm7446_vm3, %v8929_v36  ;;  %v2702_v53 = vrot.slane %v281_v44, 7 }
 0x1a7   :  { %2314 = vrot.lane.b32.xlu0 %v7824_v37, %s7447_s18  ;;  %2548 = vrot.lane.b32.xlu1 %v7827_v40, %s7447_s18 }
 0x1ab   :  { %2470 = vrot.lane.b32.xlu0 %v7838_v23, %s7447_s18 }
 0x1d1   :  { %v443_v46 = vpop.permute.xlu1 %442 }
 0x1d5   :  { %v521_v48 = vpop.permute.xlu1 %520 }
 0x1d9   :  { %v677_v51 = vpop.permute.xlu1 %676 }
 0x1e1   :  { %v365_v33 = vpop.permute.xlu0 %364  ;;  %v833_v59 = vpop.permute.xlu1 %832 }
 0x1e2   :  { %6867 = vmatpush3.xpose.msk.msra.mxu1 %vm287_vm4, %v365_v33 }
 0x1e3   :  { %6871 = vmatprep.subr.mxu1 %v8929_v36 }
 0x1e5   :  { %v275_v50 = vpop.permute.xlu0 %274  ;;  %6869 = vmatmul.mubr.msk.f32.vlgmr.msra.gmra.mxu1 %vm287_vm4, %v7696_v3  ;;  %v989_v30 = vpop.permute.xlu1 %988 }
 0x1e6   :  { %6872 = vmatpush3.xpose.msk.msra.mxu1 %vm287_vm4, %v443_v46  ;;  %v7848_v38 = vsel %vm283_vm2, %v2624_v49, %v275_v50  ;;  %6873 = vmatprep.mubr.msk.f32.mxu1 %vm7446_vm3, %v8929_v36 }
 0x1e7   :  { %2626 = vrot.lane.b32.xlu0 %v7848_v38, %s7447_s18  ;;  %6876 = vmatprep.subr.mxu1 %v8929_v36 }
 0x1e9   :  { %v279_v57 = vpop.permute.xlu0 %278  ;;  %6874 = vmatmul.mubr.msk.f32.vlgmr.msra.gmra.mxu1 %vm287_vm4, %v7679_v52 }
 0x1ea   :  { %6877 = vmatpush3.xpose.msk.msra.mxu1 %vm287_vm4, %v521_v48  ;;  %v7859_v61 = vsel %vm283_vm2, %v2702_v53, %v279_v57  ;;  %6878 = vmatprep.mubr.msk.f32.mxu1 %vm7446_vm3, %v8929_v36 }
 0x1eb   :  { %3475 = vrot.lane.b32.xlu0 %v7580_v27, %s7448_s19  ;;  %2704 = vrot.lane.b32.xlu1 %v7859_v61, %s7447_s18 }
 0x1ec   :  { %6886 = vmatprep.subr.mxu1 %v8929_v36 }
 0x1ed   :  { %v599_v47 = vpop.permute.xlu0 %598  ;;  %6879 = vmatmul.mubr.msk.f32.vlgmr.msra.gmra.mxu1 %vm287_vm4, %v7684_v56 }
 0x1ee   :  { %6882 = vmatpush3.xpose.msk.msra.mxu0 %vm287_vm4, %v599_v47  ;;  %6887 = vmatpush3.xpose.msk.msra.mxu1 %vm287_vm4, %v677_v51 }
 0x1ef   :  { %3244 = vrot.lane.b32.xlu0 %v7696_v3, %s7448_s19  ;;  %3165 = vrot.lane.b32.xlu1 %v7577_v26, %s7448_s19 }
 0x1f0   :  { %6888 = vmatprep.mubr.msk.f32.mxu1 %vm7446_vm3, %v8929_v36  ;;  %6891 = vmatprep.subr.mxu0 %v8929_v36 }
 0x1f1   :  { %6884 = vmatmul.mubr.msk.f32.vlgmr.msra.gmra.mxu0 %vm287_vm4, %v7580_v27  ;;  %v755_v0 = vpop.permute.xlu0 %754  ;;  %6889 = vmatmul.mubr.msk.f32.vlgmr.msra.gmra.mxu1 %vm287_vm4, %v7689_v60  ;;  %v1145_v27 = vpop.permute.xlu1 %1144 }
 0x1f2   :  { %6896 = vmatprep.subr.mxu1 %v8929_v36  ;;  %6892 = vmatpush3.xpose.msk.msra.mxu0 %vm287_vm4, %v755_v0 }
 0x1f3   :  { %6897 = vmatpush3.xpose.msk.msra.mxu1 %vm287_vm4, %v833_v59  ;;  %3321 = vrot.lane.b32.xlu0 %v7679_v52, %s7448_s19 }
 0x1f4   :  { %3783 = vrot.lane.b32.xlu1 %v7583_v28, %s7448_s19  ;;  %6893 = vmatprep.mubr.msk.f32.mxu0 %vm7446_vm3, %v8929_v36 }
 0x1f5   :  { %6898 = vmatprep.mubr.msk.f32.mxu1 %vm7446_vm3, %v8929_v36  ;;  %6894 = vmatmul.mubr.msk.f32.vlgmr.msra.gmra.mxu0 %vm287_vm4, %v7729_v22  ;;  %v911_v26 = vpop.permute.xlu0 %910  ;;  %v1301_v3 = vpop.permute.xlu1 %1300 }
 0x1f6   :  { %6901 = vmatprep.subr.mxu0 %v8929_v36  ;;  %6899 = vmatmul.mubr.msk.f32.vlgmr.msra.gmra.mxu1 %vm287_vm4, %v7699_v4 }
 0x1f7   :  { %6906 = vmatprep.subr.mxu1 %v8929_v36  ;;  %6902 = vmatpush3.xpose.msk.msra.mxu0 %vm287_vm4, %v911_v26 }
 0x1f8   :  { %6907 = vmatpush3.xpose.msk.msra.mxu1 %vm287_vm4, %v989_v30  ;;  %3552 = vrot.lane.b32.xlu0 %v7689_v60, %s7448_s19 }
 0x1f9   :  { %4091 = vrot.lane.b32.xlu1 %v7586_v29, %s7448_s19  ;;  %6903 = vmatprep.mubr.msk.f32.mxu0 %vm7446_vm3, %v8929_v36  ;;  %v1067_v52 = vpop.permute.xlu0 %1066 }
 0x1fa   :  { %6908 = vmatprep.mubr.msk.f32.mxu1 %vm7446_vm3, %v8929_v36  ;;  %6904 = vmatmul.mubr.msk.f32.vlgmr.msra.gmra.mxu0 %vm287_vm4, %v7583_v28  ;;  %v1457_v28 = vpop.permute.xlu1 %1456 }
 0x1fb   :  { %6911 = vmatprep.subr.mxu0 %v8929_v36  ;;  %6909 = vmatmul.mubr.msk.f32.vlgmr.msra.gmra.mxu1 %vm287_vm4, %v7706_v10 }
 0x1fc   :  { %6916 = vmatprep.subr.mxu1 %v8929_v36  ;;  %6912 = vmatpush3.xpose.msk.msra.mxu0 %vm287_vm4, %v1067_v52 }
 0x1fd   :  { %6917 = vmatpush3.xpose.msk.msra.mxu1 %vm287_vm4, %v1145_v27  ;;  %3706 = vrot.lane.b32.xlu0 %v7699_v4, %s7448_s19  ;;  %v1223_v60 = vpop.permute.xlu0 %1222 }
 0x1fe   :  { %4399 = vrot.lane.b32.xlu1 %v7768_v58, %s7448_s19  ;;  %6913 = vmatprep.mubr.msk.f32.mxu0 %vm7446_vm3, %v8929_v36  ;;  %v1613_v2 = vpop.permute.xlu1 %1612 }
 0x1ff   :  { %6918 = vmatprep.mubr.msk.f32.mxu1 %vm7446_vm3, %v8929_v36  ;;  %6914 = vmatmul.mubr.msk.f32.vlgmr.msra.gmra.mxu0 %vm287_vm4, %v7738_v42 }
 0x200   :  { %6921 = vmatprep.subr.mxu0 %v8929_v36  ;;  %6919 = vmatmul.mubr.msk.f32.vlgmr.msra.gmra.mxu1 %vm287_vm4, %v7713_v14 }
 0x201   :  { %6926 = vmatprep.subr.mxu1 %v8929_v36  ;;  %6922 = vmatpush3.xpose.msk.msra.mxu0 %vm287_vm4, %v1223_v60  ;;  %v1379_v4 = vpop.permute.xlu0 %1378 }
 0x202   :  { %6927 = vmatpush3.xpose.msk.msra.mxu1 %vm287_vm4, %v1301_v3  ;;  %3860 = vrot.lane.b32.xlu0 %v7706_v10, %s7448_s19 }
 0x203   :  { %3398 = vrot.lane.b32.xlu1 %v7684_v56, %s7448_s19  ;;  %6923 = vmatprep.mubr.msk.f32.mxu0 %vm7446_vm3, %v8929_v36  ;;  %v1769_v56 = vpop.permute.xlu1 %1768 }
 0x204   :  { %6928 = vmatprep.mubr.msk.f32.mxu1 %vm7446_vm3, %v8929_v36  ;;  %6924 = vmatmul.mubr.msk.f32.vlgmr.msra.gmra.mxu0 %vm287_vm4, %v7586_v29 }
 0x205   :  { %6931 = vmatprep.subr.mxu0 %v8929_v36  ;;  %6929 = vmatmul.mubr.msk.f32.vlgmr.msra.gmra.mxu1 %vm287_vm4, %v7720_v18  ;;  %v1535_v1 = vpop.permute.xlu0 %1534 }
 0x206   :  { %6936 = vmatprep.subr.mxu1 %v8929_v36  ;;  %6932 = vmatpush3.xpose.msk.msra.mxu0 %vm287_vm4, %v1379_v4 }
 0x207   :  { %6937 = vmatpush3.xpose.msk.msra.mxu1 %vm287_vm4, %v1457_v28  ;;  %4014 = vrot.lane.b32.xlu0 %v7713_v14, %s7448_s19  ;;  %v1925_v14 = vpop.permute.xlu1 %1924 }
 0x208   :  { %3629 = vrot.lane.b32.xlu1 %v7729_v22, %s7448_s19  ;;  %6933 = vmatprep.mubr.msk.f32.mxu0 %vm7446_vm3, %v8929_v36 }
 0x209   :  { %6938 = vmatprep.mubr.msk.f32.mxu1 %vm7446_vm3, %v8929_v36  ;;  %6934 = vmatmul.mubr.msk.f32.vlgmr.msra.gmra.mxu0 %vm287_vm4, %v7756_v54  ;;  %v1691_v29 = vpop.permute.xlu0 %1690 }
 0x20a   :  { %6941 = vmatprep.subr.mxu0 %v8929_v36  ;;  %6939 = vmatmul.mubr.msk.f32.vlgmr.msra.gmra.mxu1 %vm287_vm4, %v7741_v43 }
 0x20b   :  { %6946 = vmatprep.subr.mxu1 %v8929_v36  ;;  %6942 = vmatpush3.xpose.msk.msra.mxu0 %vm287_vm4, %v1535_v1  ;;  %v2081_v22 = vpop.permute.xlu1 %2080 }
 0x20c   :  { %6947 = vmatpush3.xpose.msk.msra.mxu1 %vm287_vm4, %v1613_v2  ;;  %4168 = vrot.lane.b32.xlu0 %v7720_v18, %s7448_s19 }
 0x20d   :  { %3937 = vrot.lane.b32.xlu1 %v7738_v42, %s7448_s19  ;;  %6943 = vmatprep.mubr.msk.f32.mxu0 %vm7446_vm3, %v8929_v36  ;;  %v1847_v10 = vpop.permute.xlu0 %1846 }
 0x20e   :  { %6948 = vmatprep.mubr.msk.f32.mxu1 %vm7446_vm3, %v8929_v36  ;;  %6944 = vmatmul.mubr.msk.f32.vlgmr.msra.gmra.mxu0 %vm287_vm4, %v7768_v58 }
 0x20f   :  { %6951 = vmatprep.subr.mxu0 %v8929_v36  ;;  %6949 = vmatmul.mubr.msk.f32.vlgmr.msra.gmra.mxu1 %vm287_vm4, %v7748_v45 }
 0x210   :  { %6956 = vmatprep.subr.mxu1 %v8929_v36  ;;  %6952 = vmatpush3.xpose.msk.msra.mxu0 %vm287_vm4, %v1691_v29 }
 0x211   :  { %6957 = vmatpush3.xpose.msk.msra.mxu1 %vm287_vm4, %v1769_v56  ;;  %4322 = vrot.lane.b32.xlu0 %v7741_v43, %s7448_s19  ;;  %v2003_v18 = vpop.permute.xlu0 %2002  ;;  %v2237_v43 = vpop.permute.xlu1 %2236 }
 0x212   :  { %4245 = vrot.lane.b32.xlu1 %v7756_v54, %s7448_s19  ;;  %6953 = vmatprep.mubr.msk.f32.mxu0 %vm7446_vm3, %v8929_v36 }
 0x213   :  { %6958 = vmatprep.mubr.msk.f32.mxu1 %vm7446_vm3, %v8929_v36  ;;  %6954 = vmatmul.mubr.msk.f32.vlgmr.msra.gmra.mxu0 %vm287_vm4, %v7779_v5 }
 0x214   :  { %6961 = vmatprep.subr.mxu0 %v8929_v36  ;;  %6959 = vmatmul.mubr.msk.f32.vlgmr.msra.gmra.mxu1 %vm287_vm4, %v7759_v55 }
 0x215   :  { %6966 = vmatprep.subr.mxu1 %v8929_v36  ;;  %6962 = vmatpush3.xpose.msk.msra.mxu0 %vm287_vm4, %v1847_v10  ;;  %v2159_v42 = vpop.permute.xlu0 %2158  ;;  %v2393_v54 = vpop.permute.xlu1 %2392 }
 0x216   :  { %6967 = vmatpush3.xpose.msk.msra.mxu1 %vm287_vm4, %v1925_v14  ;;  %4476 = vrot.lane.b32.xlu0 %v7748_v45, %s7448_s19 }
 0x217   :  { %5015 = vrot.lane.b32.xlu1 %v7810_v21, %s7448_s19  ;;  %6963 = vmatprep.mubr.msk.f32.mxu0 %vm7446_vm3, %v8929_v36 }
 0x218   :  { %6968 = vmatprep.mubr.msk.f32.mxu1 %vm7446_vm3, %v8929_v36  ;;  %6964 = vmatmul.mubr.msk.f32.vlgmr.msra.gmra.mxu0 %vm287_vm4, %v7791_v9 }
 0x219   :  { %6971 = vmatprep.subr.mxu0 %v8929_v36  ;;  %6969 = vmatmul.mubr.msk.f32.vlgmr.msra.gmra.mxu1 %vm287_vm4, %v7771_v63  ;;  %v2315_v45 = vpop.permute.xlu0 %2314  ;;  %v2549_v58 = vpop.permute.xlu1 %2548 }
 0x21a   :  { %6976 = vmatprep.subr.mxu1 %v8929_v36  ;;  %6972 = vmatpush3.xpose.msk.msra.mxu0 %vm287_vm4, %v2003_v18 }
 0x21b   :  { %6977 = vmatpush3.xpose.msk.msra.mxu1 %vm287_vm4, %v2081_v22  ;;  %4707 = vrot.lane.b32.xlu0 %v7791_v9, %s7448_s19 }
 0x21c   :  { %4553 = vrot.lane.b32.xlu1 %v7779_v5, %s7448_s19  ;;  %6973 = vmatprep.mubr.msk.f32.mxu0 %vm7446_vm3, %v8929_v36 }
 0x21d   :  { %6978 = vmatprep.mubr.msk.f32.mxu1 %vm7446_vm3, %v8929_v36  ;;  %6974 = vmatmul.mubr.msk.f32.vlgmr.msra.gmra.mxu0 %vm287_vm4, %v7801_v17 }
 0x21e   :  { %6981 = vmatprep.subr.mxu0 %v8929_v36  ;;  %6979 = vmatmul.mubr.msk.f32.vlgmr.msra.gmra.mxu1 %vm287_vm4, %v7782_v34 }
 0x21f   :  { %6986 = vmatprep.subr.mxu1 %v8929_v36  ;;  %6982 = vmatpush3.xpose.msk.msra.mxu0 %vm287_vm4, %v2159_v42 }
 0x220   :  { %6987 = vmatpush3.xpose.msk.msra.mxu1 %vm287_vm4, %v2237_v43  ;;  %5169 = vrot.lane.b32.xlu0 %v7824_v37, %s7448_s19 }
 0x221   :  { %4630 = vrot.lane.b32.xlu1 %v7759_v55, %s7448_s19  ;;  %6983 = vmatprep.mubr.msk.f32.mxu0 %vm7446_vm3, %v8929_v36  ;;  %v2471_v55 = vpop.permute.xlu0 %2470 }
 0x222   :  { %6988 = vmatprep.mubr.msk.f32.mxu1 %vm7446_vm3, %v8929_v36  ;;  %6984 = vmatmul.mubr.msk.f32.vlgmr.msra.gmra.mxu0 %vm287_vm4, %v7810_v21 }
 0x223   :  { %6991 = vmatprep.subr.mxu0 %v8929_v36  ;;  %6989 = vmatmul.mubr.msk.f32.vlgmr.msra.gmra.mxu1 %vm287_vm4, %v7794_v13 }
 0x224   :  { %6996 = vmatprep.subr.mxu1 %v8929_v36  ;;  %6992 = vmatpush3.xpose.msk.msra.mxu0 %vm287_vm4, %v2315_v45 }
 0x225   :  { %6997 = vmatpush3.xpose.msk.msra.mxu1 %vm287_vm4, %v2393_v54  ;;  %4784 = vrot.lane.b32.xlu1 %v7771_v63, %s7448_s19 }
 0x226   :  { %6993 = vmatprep.mubr.msk.f32.mxu0 %vm7446_vm3, %v8929_v36  ;;  %6998 = vmatprep.mubr.msk.f32.mxu1 %vm7446_vm3, %v8929_v36 }
 0x227   :  { %6994 = vmatmul.mubr.msk.f32.vlgmr.msra.gmra.mxu0 %vm287_vm4, %v7824_v37  ;;  %7001 = vmatprep.subr.mxu0 %v8929_v36 }
 0x228   :  { %6999 = vmatmul.mubr.msk.f32.vlgmr.msra.gmra.mxu1 %vm287_vm4, %v7813_v39  ;;  %7006 = vmatprep.subr.mxu1 %v8929_v36 }
 0x229   :  { %7002 = vmatpush3.xpose.msk.msra.mxu0 %vm287_vm4, %v2471_v55  ;;  %7007 = vmatpush3.xpose.msk.msra.mxu1 %vm287_vm4, %v2549_v58 }
 0x22a   :  { %4861 = vrot.lane.b32.xlu1 %v7801_v17, %s7448_s19  ;;  %7003 = vmatprep.mubr.msk.f32.mxu0 %vm7446_vm3, %v8929_v36 }
 0x22b   :  { %7008 = vmatprep.mubr.msk.f32.mxu1 %vm7446_vm3, %v8929_v36  ;;  %7011 = vmatprep.subr.mxu0 %v8929_v36 }
 0x22c   :  { %7004 = vmatmul.mubr.msk.f32.vlgmr.msra.gmra.mxu0 %vm287_vm4, %v7838_v23  ;;  %7009 = vmatmul.mubr.msk.f32.vlgmr.msra.gmra.mxu1 %vm287_vm4, %v7827_v40 }
 0x22d   :  { %7013 = vmatprep.mubr.msk.f32.mxu0 %vm7446_vm3, %v8929_v36  ;;  %7016 = vmatprep.subr.mxu1 %v8929_v36 }
 0x22e   :  { %4938 = vrot.lane.b32.xlu1 %v7782_v34, %s7448_s19  ;;  %7018 = vmatprep.mubr.msk.f32.mxu1 %vm7446_vm3, %v8929_v36 }
 0x232   :  { %5092 = vrot.lane.b32.xlu1 %v7794_v13, %s7448_s19 }
 0x236   :  { %5246 = vrot.lane.b32.xlu1 %v7813_v39, %s7448_s19 }
 0x259   :  { %v2627_v63 = vpop.permute.xlu0 %2626 }
 0x25a   :  { %7012 = vmatpush3.xpose.msk.msra.mxu0 %vm287_vm4, %v2627_v63 }
 0x25b   :  { %7021 = vmatprep.subr.mxu0 %v8929_v36 }
 0x25d   :  { %7014 = vmatmul.mubr.msk.f32.vlgmr.msra.gmra.mxu0 %vm287_vm4, %v7848_v38  ;;  %v8086_v5 = vpop.permute.xlu0 %3475  ;;  %v2705_v34 = vpop.permute.xlu1 %2704 }
 0x25e   :  { %7017 = vmatpush3.xpose.msk.msra.mxu1 %vm287_vm4, %v2705_v34  ;;  %7023 = vmatprep.mubr.msk.f32.mxu0 %vm7446_vm3, %v8929_v36 }
 0x25f   :  { %7026 = vmatprep.subr.mxu1 %v8929_v36 }
 0x261   :  { %v3245_v8 = vpop.permute.xlu0 %3244  ;;  %7019 = vmatmul.mubr.msk.f32.vlgmr.msra.gmra.mxu1 %vm287_vm4, %v7859_v61  ;;  %v3166_v11 = vpop.permute.xlu1 %3165 }
 0x262   :  { %7022 = vmatpush3.msk.msra.mxu0 %vm3171_vm5, %v3166_v11  ;;  %7027 = vmatpush3.msk.msra.mxu1 %vm3171_vm5, %v3245_v8 }
 0x263   :  { %7031 = vmatprep.subr.mxu0 %v8929_v36  ;;  %7028 = vmatprep.mubr.msk.f32.mxu1 %vm7446_vm3, %v8929_v36 }
 0x264   :  { %7036 = vmatprep.subr.mxu1 %v8929_v36 }
 0x265   :  { %v358_v12 = vpop.f32.mrf.mxu1  ;;  %v8122_v53 = vpop.permute.xlu0 %3321 }
 0x266   :  { %v8100_v62 = vmul.f32 0.35355338, %v358_v12 }
 0x267   :  { %v6865_v9 = vpop.f32.mrf.mxu1 }
 0x268   :  { %v2813_v13 = vsel %vm2812_vm6, %v8100_v62, -inf }
 0x269   :  { %2814 = vmax.xlane.f32.xlu0 %v2813_v13 }
 0x26a   :  { %v8138_v1 = vpop.permute.xlu0 %3552 }
 0x26f   :  { %v8148_v45 = vpop.permute.xlu0 %3706 }
 0x2a5   :  { %v436_v31 = vpop.f32.mrf.mxu1 }
 0x2a6   :  { %v8116_v48 = vmul.f32 0.35355338, %v436_v31  ;;  %v8162_v31 = vpop.permute.xlu0 %3860 }
 0x2a7   :  { %v6870_v15 = vpop.f32.mrf.mxu1 }
 0x2a8   :  { %v2816_v0 = vsel %vm2812_vm6, %v8116_v48, -inf }
 0x2a9   :  { %v514_v16 = vpop.f32.mrf.mxu1 }
 0x2aa   :  { %v8104_v17 = vmul.f32 0.35355338, %v514_v16 }
 0x2ab   :  { %v6875_v19 = vpop.f32.mrf.mxu1 }
 0x2ac   :  { %v2819_v35 = vsel %vm2812_vm6, %v8104_v17, -inf }
 0x2ad   :  { %2820 = vmax.xlane.f32.xlu0 %v2819_v35  ;;  %v592_v24 = vpop.f32.mrf.mxu1 }
 0x2ae   :  { %v8108_v25 = vmul.f32 0.35355338, %v592_v24 }
 0x2af   :  { %v6880_v21 = vpop.f32.mrf.mxu1 }
 0x2b0   :  { %v2822_v39 = vsel %vm2812_vm6, %v8108_v25, -inf }
 0x2b1   :  { %v670_v32 = vpop.f32.mrf.mxu0  ;;  %2823 = vmax.xlane.f32.xlu0 %v2822_v39  ;;  %v748_v20 = vpop.f32.mrf.mxu1 }
 0x2b2   :  { %v8112_v37 = vmul.f32 0.35355338, %v670_v32  ;;  %v8114_v41 = vmul.f32 0.35355338, %v748_v20 }
 0x2b3   :  { %v6885_v44 = vpop.f32.mrf.mxu0  ;;  %v6890_v46 = vpop.f32.mrf.mxu1 }
 0x2b4   :  { %v2825_v33 = vsel %vm2812_vm6, %v8112_v37, -inf  ;;  %v2828_v49 = vsel %vm2812_vm6, %v8114_v41, -inf  ;;  %v8172_v44 = vpop.permute.xlu0 %4014 }
 0x2b5   :  { %v826_v50 = vpop.f32.mrf.mxu0  ;;  %2826 = vmax.xlane.f32.xlu1 %v2825_v33  ;;  %2829 = vmax.xlane.f32.xlu0 %v2828_v49 }
 0x2b6   :  { %v904_v51 = vpop.f32.mrf.mxu1  ;;  %v8126_v47 = vmul.f32 0.35355338, %v826_v50 }
 0x2b7   :  { %v8124_v57 = vmul.f32 0.35355338, %v904_v51  ;;  %v6895_v59 = vpop.f32.mrf.mxu0 }
 0x2b8   :  { %v6900_v30 = vpop.f32.mrf.mxu1  ;;  %v2831_v4 = vsel %vm2812_vm6, %v8126_v47, -inf }
 0x2b9   :  { %2817 = vmax.xlane.f32.xlu1 %v2816_v0  ;;  %v2834_v26 = vsel %vm2812_vm6, %v8124_v57, -inf }
 0x2ba   :  { %v982_v27 = vpop.f32.mrf.mxu0  ;;  %2835 = vmax.xlane.f32.xlu0 %v2834_v26 }
 0x2bb   :  { %v1060_v52 = vpop.f32.mrf.mxu1  ;;  %v8132_v3 = vmul.f32 0.35355338, %v982_v27 }
 0x2bc   :  { %v8134_v60 = vmul.f32 0.35355338, %v1060_v52  ;;  %v6905_v28 = vpop.f32.mrf.mxu0  ;;  %v8184_v52 = vpop.permute.xlu0 %4168 }
 0x2bd   :  { %v6910_v2 = vpop.f32.mrf.mxu1  ;;  %2832 = vmax.xlane.f32.xlu1 %v2831_v4  ;;  %v2837_v18 = vsel %vm2812_vm6, %v8132_v3, -inf }
 0x2be   :  { %v2840_v29 = vsel %vm2812_vm6, %v8134_v60, -inf }
 0x2bf   :  { %v1138_v56 = vpop.f32.mrf.mxu0  ;;  %2841 = vmax.xlane.f32.xlu0 %v2840_v29 }
 0x2c0   :  { %v8142_v10 = vmul.f32 0.35355338, %v1138_v56  ;;  %v1216_v14 = vpop.f32.mrf.mxu1 }
 0x2c1   :  { %v8146_v22 = vmul.f32 0.35355338, %v1216_v14  ;;  %v6915_v42 = vpop.f32.mrf.mxu0  ;;  %2838 = vmax.xlane.f32.xlu1 %v2837_v18 }
 0x2c2   :  { %v6920_v43 = vpop.f32.mrf.mxu1  ;;  %v2843_v58 = vsel %vm2812_vm6, %v8142_v10, -inf }
 0x2c3   :  { %v2846_v54 = vsel %vm2812_vm6, %v8146_v22, -inf }
 0x2c4   :  { %v1294_v55 = vpop.f32.mrf.mxu0  ;;  %2847 = vmax.xlane.f32.xlu0 %v2846_v54 }
 0x2c5   :  { %v8154_v63 = vmul.f32 0.35355338, %v1294_v55  ;;  %v1372_v34 = vpop.f32.mrf.mxu1  ;;  %2844 = vmax.xlane.f32.xlu1 %v2843_v58  ;;  %v8196_v55 = vpop.permute.xlu0 %4322 }
 0x2c6   :  { %v8156_v8 = vmul.f32 0.35355338, %v1372_v34  ;;  %v6925_v11 = vpop.f32.mrf.mxu0  ;;  %8935 = vst [vmem:[#allocation12_spill] sm:$0xff] %v8196_v55 }
 0x2c7   :  { %v6930_v12 = vpop.f32.mrf.mxu1  ;;  %v2849_v13 = vsel %vm2812_vm6, %v8154_v63, -inf }
 0x2c8   :  { %v2852_v9 = vsel %vm2812_vm6, %v8156_v8, -inf }
 0x2c9   :  { %v1450_v15 = vpop.f32.mrf.mxu0  ;;  %2853 = vmax.xlane.f32.xlu0 %v2852_v9  ;;  %2850 = vmax.xlane.f32.xlu1 %v2849_v13 }
 0x2ca   :  { %v8164_v16 = vmul.f32 0.35355338, %v1450_v15  ;;  %v1528_v19 = vpop.f32.mrf.mxu1 }
 0x2cb   :  { %v8166_v35 = vmul.f32 0.35355338, %v1528_v19  ;;  %v6935_v24 = vpop.f32.mrf.mxu0 }
 0x2cc   :  { %v6940_v21 = vpop.f32.mrf.mxu1  ;;  %v2855_v39 = vsel %vm2812_vm6, %v8164_v16, -inf }
 0x2cd   :  { %v2858_v32 = vsel %vm2812_vm6, %v8166_v35, -inf  ;;  %2856 = vmax.xlane.f32.xlu1 %v2855_v39  ;;  %v8208_v39 = vpop.permute.xlu0 %4476 }
 0x2ce   :  { %v1606_v20 = vpop.f32.mrf.mxu0  ;;  %2859 = vmax.xlane.f32.xlu0 %v2858_v32  ;;  %8936 = vst [vmem:[#allocation13_spill] sm:$0xff] %v8208_v39 }
 0x2cf   :  { %v8174_v46 = vmul.f32 0.35355338, %v1606_v20  ;;  %v1684_v33 = vpop.f32.mrf.mxu1 }
 0x2d0   :  { %v8176_v49 = vmul.f32 0.35355338, %v1684_v33  ;;  %v6945_v50 = vpop.f32.mrf.mxu0 }
 0x2d1   :  { %v6950_v51 = vpop.f32.mrf.mxu1  ;;  %v2861_v59 = vsel %vm2812_vm6, %v8174_v46, -inf }
 0x2d2   :  { %v2864_v30 = vsel %vm2812_vm6, %v8176_v49, -inf  ;;  %2862 = vmax.xlane.f32.xlu1 %v2861_v59 }
 0x2d3   :  { %v1762_v0 = vpop.f32.mrf.mxu0  ;;  %2865 = vmax.xlane.f32.xlu0 %v2864_v30  ;;  %v8216_v30 = vpop.permute.xlu1 %3783 }
 0x2d4   :  { %v8182_v26 = vmul.f32 0.35355338, %v1762_v0  ;;  %v1840_v27 = vpop.f32.mrf.mxu1 }
 0x2d5   :  { %v8186_v28 = vmul.f32 0.35355338, %v1840_v27  ;;  %v6955_v4 = vpop.f32.mrf.mxu0 }
 0x2d6   :  { %v6960_v2 = vpop.f32.mrf.mxu1  ;;  %v2867_v29 = vsel %vm2812_vm6, %v8182_v26, -inf }
 0x2d7   :  { %v2870_v56 = vsel %vm2812_vm6, %v8186_v28, -inf  ;;  %2868 = vmax.xlane.f32.xlu1 %v2867_v29  ;;  %v8222_v2 = vpop.permute.xlu0 %4707 }
 0x2d8   :  { %v1918_v14 = vpop.f32.mrf.mxu0  ;;  %2871 = vmax.xlane.f32.xlu0 %v2870_v56  ;;  %8937 = vst [vmem:[#allocation14_spill] sm:$0xff] %v8222_v2 }
 0x2d9   :  { %v8192_v18 = vmul.f32 0.35355338, %v1918_v14  ;;  %v1996_v42 = vpop.f32.mrf.mxu1 }
 0x2da   :  { %v8194_v43 = vmul.f32 0.35355338, %v1996_v42  ;;  %v6965_v54 = vpop.f32.mrf.mxu0 }
 0x2db   :  { %v6970_v58 = vpop.f32.mrf.mxu1  ;;  %v2873_v34 = vsel %vm2812_vm6, %v8192_v18, -inf }
 0x2dc   :  { %v2876_v11 = vsel %vm2812_vm6, %v8194_v43, -inf  ;;  %2874 = vmax.xlane.f32.xlu1 %v2873_v34 }
 0x2dd   :  { %v2074_v12 = vpop.f32.mrf.mxu0  ;;  %2877 = vmax.xlane.f32.xlu0 %v2876_v11  ;;  %v8230_v11 = vpop.permute.xlu1 %4091 }
 0x2de   :  { %v8202_v9 = vmul.f32 0.35355338, %v2074_v12  ;;  %v2152_v13 = vpop.f32.mrf.mxu1 }
 0x2df   :  { %v8204_v15 = vmul.f32 0.35355338, %v2152_v13  ;;  %v6975_v19 = vpop.f32.mrf.mxu0 }
 0x2e0   :  { %v6980_v24 = vpop.f32.mrf.mxu1  ;;  %v2879_v21 = vsel %vm2812_vm6, %v8202_v9, -inf }
 0x2e1   :  { %v2882_v32 = vsel %vm2812_vm6, %v8204_v15, -inf  ;;  %2880 = vmax.xlane.f32.xlu1 %v2879_v21  ;;  %v8236_v24 = vpop.permute.xlu0 %5169 }
 0x2e2   :  { %v2230_v20 = vpop.f32.mrf.mxu0  ;;  %2883 = vmax.xlane.f32.xlu0 %v2882_v32  ;;  %8938 = vst [vmem:[#allocation15_spill] sm:$0xff] %v8236_v24 }
 0x2e3   :  { %v8212_v33 = vmul.f32 0.35355338, %v2230_v20  ;;  %v2308_v50 = vpop.f32.mrf.mxu1 }
 0x2e4   :  { %v8214_v51 = vmul.f32 0.35355338, %v2308_v50  ;;  %v6985_v59 = vpop.f32.mrf.mxu0 }
 0x2e5   :  { %v6990_v0 = vpop.f32.mrf.mxu1  ;;  %v2885_v27 = vsel %vm2812_vm6, %v8212_v33, -inf  ;;  %v8242_v59 = vpop.permute.xlu1 %4399 }
 0x2e6   :  { %v2888_v4 = vsel %vm2812_vm6, %v8214_v51, -inf  ;;  %2886 = vmax.xlane.f32.xlu1 %v2885_v27  ;;  %8939 = vst [vmem:[#allocation16_spill] sm:$0xff] %v8242_v59 }
 0x2e7   :  { %v2386_v29 = vpop.f32.mrf.mxu0  ;;  %2889 = vmax.xlane.f32.xlu0 %v2888_v4 }
 0x2e8   :  { %v8224_v56 = vmul.f32 0.35355338, %v2386_v29  ;;  %v2464_v14 = vpop.f32.mrf.mxu1 }
 0x2e9   :  { %v8226_v42 = vmul.f32 0.35355338, %v2464_v14  ;;  %v6995_v54 = vpop.f32.mrf.mxu0  ;;  %v8245_v29 = vpop.permute.xlu1 %3398 }
 0x2ea   :  { %v7000_v58 = vpop.f32.mrf.mxu1  ;;  %v2891_v34 = vsel %vm2812_vm6, %v8224_v56, -inf }
 0x2eb   :  { %v2894_v12 = vsel %vm2812_vm6, %v8226_v42, -inf  ;;  %2892 = vmax.xlane.f32.xlu1 %v2891_v34 }
 0x2ec   :  { %v8234_v13 = vpop.f32.mrf.mxu0  ;;  %2895 = vmax.xlane.f32.xlu0 %v2894_v12  ;;  %v2620_v19 = vpop.f32.mrf.mxu1 }
 0x2ed   :  { %v8238_v21 = vmul.f32 0.35355338, %v2620_v19  ;;  %v8247_v14 = vpop.permute.xlu1 %3629 }
 0x2ee   :  { %v7005_v32 = vpop.f32.mrf.mxu0  ;;  %v7010_v20 = vpop.f32.mrf.mxu1 }
 0x2ef   :  { %v2900_v50 = vsel %vm2812_vm6, %v8238_v21, -inf }
 0x2f0   :  { %2901 = vmax.xlane.f32.xlu0 %v2900_v50 }
 0x2f1   :  { %v8251_v58 = vpop.permute.xlu1 %3937 }
 0x2f2   :  { %v2815_v0 = vpop.xlane.xlu0 %2814 }
 0x2f3   :  { %v2909_v27 = vsub.f32 %v8100_v62, %v2815_v0 }
 0x2f5   :  { %v2941_v4 = vmul.f32 1.442695, %v2909_v27  ;;  %v8255_v12 = vpop.permute.xlu1 %4245 }
 0x2f6   :  { %8940 = vst [vmem:[#allocation17_spill] sm:$0xff] %v8255_v12 }
 0x2f7   :  { %7262 = vpow2.f32 %v2941_v4 }
 0x2f9   :  { %v8257_v19 = vpop.permute.xlu1 %5015 }
 0x2fa   :  { %8941 = vst [vmem:[#allocation18_spill] sm:$0xff] %v8257_v19 }
 0x2fd   :  { %v8259_v32 = vpop.permute.xlu1 %4553 }
 0x2fe   :  { %8942 = vst [vmem:[#allocation19_spill] sm:$0xff] %v8259_v32 }
 0x301   :  { %v8261_v62 = vpop.permute.xlu1 %4630 }
 0x302   :  { %8943 = vst [vmem:[#allocation20_spill] sm:$0xff] %v8261_v62 }
 0x304   :  { %v8249_v54 = vpop.eup %7262 }
 0x305   :  { %v3005_v34 = vsel %vm2812_vm6, %v8249_v54, 0.0  ;;  %v8263_v27 = vpop.permute.xlu1 %4784 }
 0x306   :  { %3006 = vadd.xlane.f32.xlu1 %v3005_v34  ;;  %8944 = vst [vmem:[#allocation21_spill] sm:$0xff] %v8263_v27 }
 0x309   :  { %v8269_v34 = vpop.permute.xlu1 %4861 }
 0x30a   :  { %8945 = vst [vmem:[#allocation22_spill] sm:$0xff] %v8269_v34 }
 0x30d   :  { %v8271_v7 = vpop.permute.xlu1 %4938 }
 0x30e   :  { %8946 = vst [vmem:[#allocation23_spill] sm:$0xff] %v8271_v7 }
 0x311   :  { %v8273_v24 = vpop.permute.xlu1 %5092 }
 0x312   :  { %8947 = vst [vmem:[#allocation24_spill] sm:$0xff] %v8273_v24 }
 0x315   :  { %v8275_v2 = vpop.permute.xlu1 %5246 }
 0x316   :  { %8948 = vst [vmem:[#allocation25_spill] sm:$0xff] %v8275_v2 }
 0x31d   :  { %v2698_v20 = vpop.f32.mrf.mxu0 }
 0x31f   :  { %v7015_v50 = vpop.f32.mrf.mxu0 }
 0x321   :  { %v2776_v0 = vpop.f32.mrf.mxu1 }
 0x322   :  { %v8265_v4 = vmul.f32 0.35355338, %v2776_v0 }
 0x323   :  { %v7020_v36 = vpop.f32.mrf.mxu1 }
 0x324   :  { %v2906_v6 = vsel %vm2812_vm6, %v8265_v4, -inf }
 0x325   :  { %2907 = vmax.xlane.f32.xlu0 %v2906_v6 }
 0x336   :  { %v2821_v19 = vpop.xlane.xlu0 %2820 }
 0x337   :  { %v2911_v12 = vsub.f32 %v8104_v17, %v2821_v19 }
 0x33a   :  { %v2824_v50 = vpop.xlane.xlu0 %2823 }
 0x33b   :  { %5323 = vrot.lane.b32.xlu0 %v7838_v23, %s7448_s19  ;;  %v2912_v7 = vsub.f32 %v8108_v25, %v2824_v50 }
 0x33d   :  { %v2947_v55 = vmul.f32 1.442695, %v2912_v7  ;;  %v8290_v7 = vmul.f32 0.35355338, %v8234_v13 }
 0x33e   :  { %v2830_v0 = vpop.xlane.xlu0 %2829  ;;  %v2827_v27 = vpop.xlane.xlu1 %2826 }
 0x33f   :  { %v2913_v36 = vsub.f32 %v8112_v37, %v2827_v27  ;;  %v2914_v23 = vsub.f32 %v8114_v41, %v2830_v0 }
 0x341   :  { %v2949_v62 = vmul.f32 1.442695, %v2913_v36  ;;  %v2951_v36 = vmul.f32 1.442695, %v2914_v23 }
 0x342   :  { %v2818_v32 = vpop.xlane.xlu1 %2817 }
 0x343   :  { %v2836_v6 = vpop.xlane.xlu0 %2835  ;;  %v2910_v34 = vsub.f32 %v8116_v48, %v2818_v32  ;;  %7264 = vpow2.f32 %v2949_v62  ;;  %v2945_v62 = vmul.f32 1.442695, %v2911_v12  ;;  %v8300_v12 = vmul.f32 0.35355338, %v2698_v20 }
 0x344   :  { %v2916_v48 = vsub.f32 %v8124_v57, %v2836_v6 }
 0x345   :  { %v2943_v24 = vmul.f32 1.442695, %v2910_v34  ;;  %v2903_v20 = vsel %vm2812_vm6, %v8300_v12, -inf }
 0x346   :  { %v2833_v39 = vpop.xlane.xlu1 %2832  ;;  %v2955_v41 = vmul.f32 1.442695, %v2916_v48 }
 0x347   :  { %v2915_v2 = vsub.f32 %v8126_v47, %v2833_v39  ;;  %7266 = vpow2.f32 %v2943_v24  ;;  %v2897_v24 = vsel %vm2812_vm6, %v8290_v7, -inf }
 0x348   :  { %v2842_v59 = vpop.xlane.xlu0 %2841  ;;  %7268 = vpow2.f32 %v2947_v55 }
 0x349   :  { %v2953_v37 = vmul.f32 1.442695, %v2915_v2 }
 0x34a   :  { %v2839_v27 = vpop.xlane.xlu1 %2838 }
 0x34b   :  { %7270 = vpow2.f32 %v2953_v37  ;;  %v2917_v25 = vsub.f32 %v8132_v3, %v2839_v27  ;;  %v2918_v3 = vsub.f32 %v8134_v60, %v2842_v59 }
 0x34c   :  { %7272 = vpow2.f32 %v2951_v36 }
 0x34d   :  { %v2848_v32 = vpop.xlane.xlu0 %2847  ;;  %7274 = vpow2.f32 %v2945_v62  ;;  %v2957_v17 = vmul.f32 1.442695, %v2917_v25  ;;  %v2959_v23 = vmul.f32 1.442695, %v2918_v3 }
 0x34e   :  { %v2845_v34 = vpop.xlane.xlu1 %2844  ;;  %7276 = vpow2.f32 %v2955_v41 }
 0x34f   :  { %v2919_v55 = vsub.f32 %v8142_v10, %v2845_v34  ;;  %7278 = vpow2.f32 %v2957_v17 }
 0x350   :  { %v8287_v47 = vpop.eup %7264 }
 0x351   :  { %v3017_v57 = vsel %vm2812_vm6, %v8287_v47, 0.0  ;;  %v2961_v19 = vmul.f32 1.442695, %v2919_v55 }
 0x352   :  { %v2854_v39 = vpop.xlane.xlu0 %2853  ;;  %v2851_v2 = vpop.xlane.xlu1 %2850  ;;  %3018 = vadd.xlane.f32.xlu1 %v3017_v57 }
 0x353   :  { %v2921_v50 = vsub.f32 %v8154_v63, %v2851_v2  ;;  %7280 = vpow2.f32 %v2961_v19 }
 0x354   :  { %v8298_v13 = vpop.eup %7266 }
 0x355   :  { %v3008_v60 = vsel %vm2812_vm6, %v8298_v13, 0.0  ;;  %v8306_v59 = vpop.eup %7268  ;;  %v2965_v27 = vmul.f32 1.442695, %v2921_v50 }
 0x356   :  { %v2857_v10 = vpop.xlane.xlu1 %2856  ;;  %2898 = vmax.xlane.f32.xlu1 %v2897_v24  ;;  %v3014_v25 = vsel %vm2812_vm6, %v8306_v59, 0.0 }
 0x357   :  { %v2860_v0 = vpop.xlane.xlu0 %2859  ;;  %v2923_v6 = vsub.f32 %v8164_v16, %v2857_v10  ;;  %v2920_v16 = vsub.f32 %v8146_v22, %v2848_v32  ;;  %v2922_v32 = vsub.f32 %v8156_v8, %v2854_v39 }
 0x358   :  { %v8310_v36 = vpop.eup %7270  ;;  %v2924_v8 = vsub.f32 %v8166_v35, %v2860_v0 }
 0x359   :  { %v2969_v37 = vmul.f32 1.442695, %v2923_v6  ;;  %v8316_v34 = vpop.eup %7272  ;;  %v3023_v17 = vsel %vm2812_vm6, %v8310_v36, 0.0  ;;  %v2963_v57 = vmul.f32 1.442695, %v2920_v16 }
 0x35a   :  { %3009 = vadd.xlane.f32.xlu0 %v3008_v60  ;;  %2904 = vmax.xlane.f32.xlu1 %v2903_v20  ;;  %v8320_v55 = vpop.eup %7274  ;;  %v3020_v3 = vsel %vm2812_vm6, %v8316_v34, 0.0  ;;  %v2967_v39 = vmul.f32 1.442695, %v2922_v32  ;;  %v2971_v35 = vmul.f32 1.442695, %v2924_v8 }
 0x35b   :  { %7282 = vpow2.f32 %v2969_v37  ;;  %v2863_v63 = vpop.xlane.xlu1 %2862  ;;  %v8326_v24 = vpop.eup %7276  ;;  %v3011_v19 = vsel %vm2812_vm6, %v8320_v55, 0.0 }
 0x35c   :  { %v2866_v48 = vpop.xlane.xlu0 %2865  ;;  %v2925_v62 = vsub.f32 %v8174_v46, %v2863_v63  ;;  %7284 = vpow2.f32 %v2959_v23  ;;  %v8330_v50 = vpop.eup %7278  ;;  %v3026_v23 = vsel %vm2812_vm6, %v8326_v24, 0.0 }
 0x35d   :  { %7286 = vpow2.f32 %v2965_v27  ;;  %v2926_v6 = vsub.f32 %v8176_v49, %v2866_v48  ;;  %v3029_v27 = vsel %vm2812_vm6, %v8330_v50, 0.0 }
 0x35e   :  { %v2973_v41 = vmul.f32 1.442695, %v2925_v62  ;;  %3015 = vadd.xlane.f32.xlu0 %v3014_v25  ;;  %3024 = vadd.xlane.f32.xlu1 %v3023_v17 }
 0x35f   :  { %v2975_v49 = vmul.f32 1.442695, %v2926_v6 }
 0x360   :  { %v2869_v22 = vpop.xlane.xlu1 %2868  ;;  %7288 = vpow2.f32 %v2973_v41  ;;  %v8339_v20 = vpop.eup %7280 }
 0x361   :  { %v2872_v46 = vpop.xlane.xlu0 %2871  ;;  %v2927_v2 = vsub.f32 %v8182_v26, %v2869_v22  ;;  %7290 = vpow2.f32 %v2963_v57 }
 0x362   :  { %3021 = vadd.xlane.f32.xlu0 %v3020_v3  ;;  %3012 = vadd.xlane.f32.xlu1 %v3011_v19  ;;  %v2928_v16 = vsub.f32 %v8186_v28, %v2872_v46 }
 0x363   :  { %v2977_v10 = vmul.f32 1.442695, %v2927_v2 }
 0x364   :  { %v2979_v17 = vmul.f32 1.442695, %v2928_v16 }
 0x365   :  { %7292 = vpow2.f32 %v2977_v10  ;;  %v2875_v26 = vpop.xlane.xlu1 %2874 }
 0x366   :  { %v2878_v37 = vpop.xlane.xlu0 %2877  ;;  %v2929_v60 = vsub.f32 %v8192_v18, %v2875_v26  ;;  %3027 = vadd.xlane.f32.xlu0 %v3026_v23  ;;  %3030 = vadd.xlane.f32.xlu1 %v3029_v27  ;;  %7294 = vpow2.f32 %v2967_v39  ;;  %v3035_v18 = vsel %vm2812_vm6, %v8339_v20, 0.0 }
 0x367   :  { %v2930_v57 = vsub.f32 %v8194_v43, %v2878_v37 }
 0x368   :  { %v8341_v63 = vpop.eup %7282  ;;  %v2981_v0 = vmul.f32 1.442695, %v2929_v60 }
 0x369   :  { %v3047_v48 = vsel %vm2812_vm6, %v8341_v63, 0.0  ;;  %v8346_v62 = vpop.eup %7284  ;;  %v2983_v3 = vmul.f32 1.442695, %v2930_v57 }
 0x36a   :  { %7296 = vpow2.f32 %v2981_v0  ;;  %3048 = vadd.xlane.f32.xlu0 %v3047_v48  ;;  %v8350_v25 = vpop.eup %7286  ;;  %3036 = vadd.xlane.f32.xlu1 %v3035_v18  ;;  %v3032_v28 = vsel %vm2812_vm6, %v8346_v62, 0.0  ;;  %v2881_v57 = vpop.xlane.xlu1 %2880 }
 0x36b   :  { %v2884_v41 = vpop.xlane.xlu0 %2883  ;;  %7298 = vpow2.f32 %v2971_v35  ;;  %v3041_v32 = vsel %vm2812_vm6, %v8350_v25, 0.0 }
 0x36c   :  { %7300 = vpow2.f32 %v2975_v49  ;;  %v2932_v19 = vsub.f32 %v8204_v15, %v2884_v41 }
 0x36d   :  { %v8355_v22 = vpop.eup %7288  ;;  %7302 = vpow2.f32 %v2979_v17 }
 0x36e   :  { %3033 = vadd.xlane.f32.xlu0 %v3032_v28  ;;  %3042 = vadd.xlane.f32.xlu1 %v3041_v32  ;;  %v8359_v2 = vpop.eup %7290  ;;  %v3053_v43 = vsel %vm2812_vm6, %v8355_v22, 0.0  ;;  %7304 = vpow2.f32 %v2983_v3  ;;  %v2987_v39 = vmul.f32 1.442695, %v2932_v19 }
 0x36f   :  { %v3038_v23 = vsel %vm2812_vm6, %v8359_v2, 0.0  ;;  %v2887_v3 = vpop.xlane.xlu1 %2886 }
 0x370   :  { %v2890_v46 = vpop.xlane.xlu0 %2889  ;;  %7306 = vpow2.f32 %v2987_v39 }
 0x371   :  { %v2934_v6 = vsub.f32 %v8214_v51, %v2890_v46 }
 0x372   :  { %v8364_v10 = vpop.eup %7292  ;;  %3054 = vadd.xlane.f32.xlu0 %v3053_v43 }
 0x373   :  { %v3059_v8 = vsel %vm2812_vm6, %v8364_v10, 0.0  ;;  %v8371_v37 = vpop.eup %7294  ;;  %v2991_v35 = vmul.f32 1.442695, %v2934_v6 }
 0x374   :  { %3060 = vadd.xlane.f32.xlu1 %v3059_v8  ;;  %v3044_v51 = vsel %vm2812_vm6, %v8371_v37, 0.0  ;;  %v2893_v39 = vpop.xlane.xlu1 %2892 }
 0x375   :  { %v2896_v26 = vpop.xlane.xlu0 %2895  ;;  %7308 = vpow2.f32 %v2991_v35 }
 0x376   :  { %3039 = vadd.xlane.f32.xlu0 %v3038_v23  ;;  %v2936_v0 = vsub.f32 %v8226_v42, %v2896_v26 }
 0x377   :  { %v8373_v15 = vpop.eup %7296 }
 0x378   :  { %v3065_v60 = vsel %vm2812_vm6, %v8373_v15, 0.0  ;;  %v8377_v27 = vpop.eup %7298  ;;  %v2995_v18 = vmul.f32 1.442695, %v2936_v0 }
 0x379   :  { %3066 = vadd.xlane.f32.xlu1 %v3065_v60  ;;  %v8382_v49 = vpop.eup %7300  ;;  %v2902_v16 = vpop.xlane.xlu0 %2901  ;;  %v3050_v48 = vsel %vm2812_vm6, %v8377_v27, 0.0 }
 0x37a   :  { %3045 = vadd.xlane.f32.xlu0 %v3044_v51  ;;  %v2938_v41 = vsub.f32 %v8238_v21, %v2902_v16  ;;  %v3056_v17 = vsel %vm2812_vm6, %v8382_v49, 0.0  ;;  %v8389_v42 = vpop.eup %7302  ;;  %7310 = vpow2.f32 %v2995_v18  ;;  %v2931_v51 = vsub.f32 %v8202_v9, %v2881_v57 }
 0x37b   :  { %v3062_v32 = vsel %vm2812_vm6, %v8389_v42, 0.0  ;;  %v8393_v46 = vpop.eup %7304  ;;  %v2933_v18 = vsub.f32 %v8212_v33, %v2887_v3 }
 0x37c   :  { %v2999_v28 = vmul.f32 1.442695, %v2938_v41  ;;  %v3068_v21 = vsel %vm2812_vm6, %v8393_v46, 0.0 }
 0x37d   :  { %3051 = vadd.xlane.f32.xlu1 %v3050_v48  ;;  %v8397_v19 = vpop.eup %7306  ;;  %v2985_v48 = vmul.f32 1.442695, %v2931_v51  ;;  %v2989_v41 = vmul.f32 1.442695, %v2933_v18 }
 0x37e   :  { %3057 = vadd.xlane.f32.xlu0 %v3056_v17  ;;  %7312 = vpow2.f32 %v2999_v28  ;;  %v3074_v43 = vsel %vm2812_vm6, %v8397_v19, 0.0  ;;  %v2935_v17 = vsub.f32 %v8224_v56, %v2893_v39  ;;  %v8949_v28 = vmov 0.0  }
 0x380   :  { %v2993_v9 = vmul.f32 1.442695, %v2935_v17 }
 0x382   :  { %3063 = vadd.xlane.f32.xlu0 %v3062_v32  ;;  %v8401_v8 = vpop.eup %7308 }
 0x383   :  { %v3080_v6 = vsel %vm2812_vm6, %v8401_v8, 0.0 }
 0x386   :  { %3069 = vadd.xlane.f32.xlu0 %v3068_v21 }
 0x387   :  { %v8405_v26 = vpop.eup %7310 }
 0x388   :  { %v3086_v60 = vsel %vm2812_vm6, %v8405_v26, 0.0 }
 0x38a   :  { %3075 = vadd.xlane.f32.xlu0 %v3074_v43 }
 0x38b   :  { %v8411_v35 = vpop.eup %7312 }
 0x38c   :  { %v3092_v0 = vsel %vm2812_vm6, %v8411_v35, 0.0 }
 0x38e   :  { %5400 = vrot.lane.b32.xlu1 %v7827_v40, %s7448_s19  ;;  %3081 = vadd.xlane.f32.xlu0 %v3080_v6 }
 0x38f   :  { %v3007_v23 = vpop.xlane.xlu1 %3006 }
 0x390   :  { %7314 = vrcp.f32 %v3007_v23 }
 0x391   :  { %7316 = vpow2.f32 %v2985_v48 }
 0x392   :  { %3087 = vadd.xlane.f32.xlu0 %v3086_v60  ;;  %7318 = vpow2.f32 %v2989_v41 }
 0x393   :  { %7320 = vpow2.f32 %v2993_v9 }
 0x396   :  { %3093 = vadd.xlane.f32.xlu0 %v3092_v0 }
 0x39d   :  { %v7315_v16 = vpop.eup %7314 }
 0x39e   :  { %v3133_v40 = vmul.f32 %v7315_v16, %v8249_v54  ;;  %v8425_v33 = vpop.eup %7316 }
 0x39f   :  { %v3071_v56 = vsel %vm2812_vm6, %v8425_v33, 0.0  ;;  %v8430_v3 = vpop.eup %7318 }
 0x3a0   :  { %7024 = vmatmul.mubr.msk.f32.vlgmr.msra.gmra.mxu0 %vm3167_vm7, %v3133_v40  ;;  %v8434_v21 = vpop.eup %7320 }
 0x3a1   :  { %7032 = vmatpush3.msk.msra.mxu0 %vm3171_vm5, %v8122_v53  ;;  %7033 = vmatprep.mubr.msk.f32.mxu0 %vm7446_vm3, %v8949_v28  ;;  %v3077_v53 = vsel %vm2812_vm6, %v8430_v3, 0.0  ;;  %v3083_v43 = vsel %vm2812_vm6, %v8434_v21, 0.0 }
 0x3a2   :  { %7041 = vmatprep.subr.mxu0 %v8949_v28 }
 0x3ae   :  { %v2908_v54 = vpop.xlane.xlu0 %2907 }
 0x3af   :  { %v2940_v57 = vsub.f32 %v8265_v4, %v2908_v54 }
 0x3b1   :  { %v3003_v32 = vmul.f32 1.442695, %v2940_v57 }
 0x3b2   :  { %3072 = vadd.xlane.f32.xlu1 %v3071_v56  ;;  %v8444_v23 = vpop.permute.xlu0 %5323 }
 0x3b3   :  { %7322 = vpow2.f32 %v3003_v32 }
 0x3b6   :  { %3078 = vadd.xlane.f32.xlu1 %v3077_v53 }
 0x3ba   :  { %3084 = vadd.xlane.f32.xlu1 %v3083_v43 }
 0x3c0   :  { %v8438_v39 = vpop.eup %7322 }
 0x3c1   :  { %v3098_v4 = vsel %vm2812_vm6, %v8438_v39, 0.0 }
 0x3c2   :  { %3099 = vadd.xlane.f32.xlu0 %v3098_v4 }
 0x3d8   :  { %5477 = vrot.lane.b32.xlu0 %v7848_v38, %s7448_s19 }
 0x3db   :  { %v3019_v6 = vpop.xlane.xlu1 %3018 }
 0x3df   :  { %v2899_v60 = vpop.xlane.xlu1 %2898 }
 0x3e0   :  { %v2937_v0 = vsub.f32 %v8290_v7, %v2899_v60 }
 0x3e2   :  { %v2997_v51 = vmul.f32 1.442695, %v2937_v0 }
 0x3e3   :  { %v3010_v16 = vpop.xlane.xlu0 %3009  ;;  %v2905_v48 = vpop.xlane.xlu1 %2904 }
 0x3e4   :  { %7324 = vrcp.f32 %v3010_v16  ;;  %v2939_v18 = vsub.f32 %v8300_v12, %v2905_v48 }
 0x3e5   :  { %7326 = vpow2.f32 %v2997_v51 }
 0x3e6   :  { %v3001_v40 = vmul.f32 1.442695, %v2939_v18 }
 0x3e7   :  { %v3016_v41 = vpop.xlane.xlu0 %3015  ;;  %v3025_v17 = vpop.xlane.xlu1 %3024 }
 0x3e8   :  { %7328 = vrcp.f32 %v3016_v41 }
 0x3e9   :  { %7330 = vpow2.f32 %v3001_v40 }
 0x3eb   :  { %v3022_v9 = vpop.xlane.xlu0 %3021  ;;  %v3013_v38 = vpop.xlane.xlu1 %3012 }
 0x3ec   :  { %7332 = vrcp.f32 %v3022_v9 }
 0x3ed   :  { %7334 = vrcp.f32 %v3013_v38 }
 0x3ee   :  { %7336 = vrcp.f32 %v3019_v6 }
 0x3ef   :  { %v3028_v54 = vpop.xlane.xlu0 %3027  ;;  %v3031_v7 = vpop.xlane.xlu1 %3030 }
 0x3f0   :  { %7338 = vrcp.f32 %v3028_v54 }
 0x3f1   :  { %v7325_v57 = vpop.eup %7324  ;;  %7340 = vrcp.f32 %v3025_v17 }
 0x3f2   :  { %v8448_v32 = vpop.eup %7326  ;;  %v3134_v56 = vmul.f32 %v7325_v57, %v8298_v13  ;;  %7342 = vrcp.f32 %v3031_v7 }
 0x3f3   :  { %v3049_v12 = vpop.xlane.xlu0 %3048  ;;  %v3089_v53 = vsel %vm2812_vm6, %v8448_v32, 0.0  ;;  %v3037_v43 = vpop.xlane.xlu1 %3036 }
 0x3f4   :  { %3090 = vadd.xlane.f32.xlu1 %v3089_v53  ;;  %7029 = vmatmul.mubr.msk.f32.vlgmr.msra.gmra.mxu1 %vm3167_vm7, %v3134_v56 }
 0x3f5   :  { %v7329_v4 = vpop.eup %7328  ;;  %7037 = vmatpush3.msk.msra.mxu1 %vm3171_vm5, %v8245_v29  ;;  %7038 = vmatprep.mubr.msk.f32.mxu1 %vm7446_vm3, %v8949_v28 }
 0x3f6   :  { %v8458_v6 = vpop.eup %7330  ;;  %7046 = vmatprep.subr.mxu1 %v8949_v28  ;;  %v3136_v13 = vmul.f32 %v7329_v4, %v8306_v59 }
 0x3f7   :  { %v3034_v60 = vpop.xlane.xlu0 %3033  ;;  %v3095_v0 = vsel %vm2812_vm6, %v8458_v6, 0.0  ;;  %v3043_v51 = vpop.xlane.xlu1 %3042 }
 0x3f8   :  { %7344 = vrcp.f32 %v3034_v60  ;;  %3096 = vadd.xlane.f32.xlu1 %v3095_v0  ;;  %7039 = vmatmul.mubr.msk.f32.vlgmr.msra.gmra.mxu1 %vm3167_vm7, %v3136_v13  ;;  %v8952_v13 = vld [vmem:[#allocation16_spill] sm:$0xff] }
 0x3f9   :  { %v7333_v29 = vpop.eup %7332  ;;  %7047 = vmatpush3.msk.msra.mxu1 %vm3171_vm5, %v8138_v1  ;;  %7048 = vmatprep.mubr.msk.f32.mxu1 %vm7446_vm3, %v8949_v28  ;;  %7346 = vrcp.f32 %v3037_v43  ;;  %v8951_v43 = vld [vmem:[#allocation12_spill] sm:$0xff] }
 0x3fa   :  { %v7335_v16 = vpop.eup %7334  ;;  %7056 = vmatprep.subr.mxu1 %v8949_v28  ;;  %v3138_v59 = vmul.f32 %v7333_v29, %v8316_v34  ;;  %7348 = vrcp.f32 %v3043_v51  ;;  %v8953_v51 = vld [vmem:[#allocation13_spill] sm:$0xff] }
 0x3fb   :  { %v3055_v48 = vpop.xlane.xlu0 %3054  ;;  %v3135_v18 = vmul.f32 %v7335_v16, %v8320_v55  ;;  %v7337_v40 = vpop.eup %7336  ;;  %v8954_v16 = vld [vmem:[#allocation19_spill] sm:$0xff] }
 0x3fc   :  { %7049 = vmatmul.mubr.msk.f32.vlgmr.msra.gmra.mxu1 %vm3167_vm7, %v3138_v59  ;;  %v3137_v55 = vmul.f32 %v7337_v40, %v8287_v47 }
 0x3fd   :  { %v7339_v41 = vpop.eup %7338  ;;  %v3061_v17 = vpop.xlane.xlu1 %3060  ;;  %7034 = vmatmul.mubr.msk.f32.vlgmr.msra.gmra.mxu0 %vm3167_vm7, %v3135_v18  ;;  %7057 = vmatpush3.msk.msra.mxu1 %vm3171_vm5, %v8148_v45  ;;  %v8955_v18 = vld [vmem:[#allocation20_spill] sm:$0xff] }
 0x3fe   :  { %7042 = vmatpush3.msk.msra.mxu0 %vm3171_vm5, %v8086_v5  ;;  %7058 = vmatprep.mubr.msk.f32.mxu1 %vm7446_vm3, %v8949_v28  ;;  %v3140_v1 = vmul.f32 %v7339_v41, %v8326_v24  ;;  %v7341_v9 = vpop.eup %7340  ;;  %v8956_v41 = vld [vmem:[#allocation14_spill] sm:$0xff] }
 0x3ff   :  { %7066 = vmatprep.subr.mxu1 %v8949_v28  ;;  %v3040_v34 = vpop.xlane.xlu0 %3039  ;;  %7043 = vmatprep.mubr.msk.f32.mxu0 %vm7446_vm3, %v8949_v28  ;;  %v3139_v47 = vmul.f32 %v7341_v9, %v8310_v36  ;;  %v7343_v24 = vpop.eup %7342 }
 0x400   :  { %7350 = vrcp.f32 %v3040_v34  ;;  %7051 = vmatprep.subr.mxu0 %v8949_v28  ;;  %7059 = vmatmul.mubr.msk.f32.vlgmr.msra.gmra.mxu1 %vm3167_vm7, %v3140_v1  ;;  %v3141_v54 = vmul.f32 %v7343_v24, %v8330_v50  ;;  %v8957_v1 = vld [vmem:[#allocation21_spill] sm:$0xff] }
 0x401   :  { %7044 = vmatmul.mubr.msk.f32.vlgmr.msra.gmra.mxu0 %vm3167_vm7, %v3137_v55  ;;  %7067 = vmatpush3.msk.msra.mxu1 %vm3171_vm5, %v8162_v31  ;;  %7352 = vrcp.f32 %v3049_v12  ;;  %v8958_v55 = vld [vmem:[#allocation22_spill] sm:$0xff]  ;;  %v8961_v24 = vld [vmem:[#allocation25_spill] sm:$0xff] }
 0x402   :  { %v3067_v5 = vpop.xlane.xlu1 %3066  ;;  %7052 = vmatpush3.msk.msra.mxu0 %vm3171_vm5, %v8247_v14  ;;  %7053 = vmatprep.mubr.msk.f32.mxu0 %vm7446_vm3, %v8949_v28 }
 0x403   :  { %v3046_v45 = vpop.xlane.xlu0 %3045  ;;  %7061 = vmatprep.subr.mxu0 %v8949_v28  ;;  %7068 = vmatprep.mubr.msk.f32.mxu1 %vm7446_vm3, %v8949_v28 }
 0x404   :  { %7354 = vrcp.f32 %v3046_v45  ;;  %7076 = vmatprep.subr.mxu1 %v8949_v28 }
 0x405   :  { %v7345_v31 = vpop.eup %7344  ;;  %7054 = vmatmul.mubr.msk.f32.vlgmr.msra.gmra.mxu0 %vm3167_vm7, %v3139_v47 }
 0x406   :  { %v3052_v14 = vpop.xlane.xlu1 %3051  ;;  %7062 = vmatpush3.msk.msra.mxu0 %vm3171_vm5, %v8216_v30  ;;  %7063 = vmatprep.mubr.msk.f32.mxu0 %vm7446_vm3, %v8949_v28  ;;  %v3142_v38 = vmul.f32 %v7345_v31, %v8346_v62  ;;  %v7347_v7 = vpop.eup %7346 }
 0x407   :  { %7356 = vrcp.f32 %v3052_v14  ;;  %v3058_v36 = vpop.xlane.xlu0 %3057  ;;  %7071 = vmatprep.subr.mxu0 %v8949_v28  ;;  %v7349_v50 = vpop.eup %7348 }
 0x408   :  { %7358 = vrcp.f32 %v3055_v48  ;;  %7069 = vmatmul.mubr.msk.f32.vlgmr.msra.gmra.mxu1 %vm3167_vm7, %v3142_v38 }
 0x409   :  { %7077 = vmatpush3.msk.msra.mxu1 %vm3171_vm5, %v8172_v44  ;;  %5554 = vrot.lane.b32.xlu1 %v7859_v61, %s7448_s19  ;;  %7360 = vrcp.f32 %v3058_v36  ;;  %v3143_v44 = vmul.f32 %v7347_v7, %v8339_v20  ;;  %v3145_v20 = vmul.f32 %v7349_v50, %v8350_v25 }
 0x40a   :  { %7064 = vmatmul.mubr.msk.f32.vlgmr.msra.gmra.mxu0 %vm3167_vm7, %v3141_v54  ;;  %7078 = vmatprep.mubr.msk.f32.mxu1 %vm7446_vm3, %v8949_v28  ;;  %7362 = vrcp.f32 %v3061_v17  ;;  %v5401_v14 = vpop.permute.xlu1 %5400 }
 0x40b   :  { %7072 = vmatpush3.msk.msra.mxu0 %vm3171_vm5, %v8251_v58  ;;  %v3064_v30 = vpop.xlane.xlu0 %3063  ;;  %7073 = vmatprep.mubr.msk.f32.mxu0 %vm7446_vm3, %v8949_v28 }
 0x40c   :  { %7081 = vmatprep.subr.mxu0 %v8949_v28  ;;  %7086 = vmatprep.subr.mxu1 %v8949_v28  ;;  %7364 = vrcp.f32 %v3064_v30 }
 0x40d   :  { %v7351_v61 = vpop.eup %7350  ;;  %7366 = vrcp.f32 %v3067_v5  ;;  %v8960_v5 = vld [vmem:[#allocation24_spill] sm:$0xff] }
 0x40e   :  { %7074 = vmatmul.mubr.msk.f32.vlgmr.msra.gmra.mxu0 %vm3167_vm7, %v3143_v44  ;;  %v3144_v62 = vmul.f32 %v7351_v61, %v8359_v2  ;;  %v7353_v57 = vpop.eup %7352  ;;  %v8950_v2 = vld [vmem:[#allocation17_spill] sm:$0xff]  ;;  %v8963_v61 = vld [vmem:[#allocation15_spill] sm:$0xff] }
 0x40f   :  { %7082 = vmatpush3.msk.msra.mxu0 %vm3171_vm5, %v8230_v11  ;;  %v3070_v58 = vpop.xlane.xlu0 %3069  ;;  %7083 = vmatprep.mubr.msk.f32.mxu0 %vm7446_vm3, %v8949_v28 }
 0x410   :  { %7091 = vmatprep.subr.mxu0 %v8949_v28  ;;  %7079 = vmatmul.mubr.msk.f32.vlgmr.msra.gmra.mxu1 %vm3167_vm7, %v3144_v62  ;;  %7368 = vrcp.f32 %v3070_v58 }
 0x411   :  { %v7355_v56 = vpop.eup %7354  ;;  %7087 = vmatpush3.msk.msra.mxu1 %vm3171_vm5, %v8184_v52  ;;  %7088 = vmatprep.mubr.msk.f32.mxu1 %vm7446_vm3, %v8949_v28  ;;  %v3147_v52 = vmul.f32 %v7353_v57, %v8341_v63 }
 0x412   :  { %7084 = vmatmul.mubr.msk.f32.vlgmr.msra.gmra.mxu0 %vm3167_vm7, %v3145_v20  ;;  %7096 = vmatprep.subr.mxu1 %v8949_v28  ;;  %v3146_v11 = vmul.f32 %v7355_v56, %v8371_v37 }
 0x413   :  { %7092 = vmatpush3.msk.msra.mxu0 %vm3171_vm5, %v8950_v2  ;;  %v3076_v12 = vpop.xlane.xlu0 %3075  ;;  %7093 = vmatprep.mubr.msk.f32.mxu0 %vm7446_vm3, %v8949_v28 }
 0x414   :  { %v7357_v25 = vpop.eup %7356  ;;  %7101 = vmatprep.subr.mxu0 %v8949_v28  ;;  %7089 = vmatmul.mubr.msk.f32.vlgmr.msra.gmra.mxu1 %vm3167_vm7, %v3146_v11  ;;  %7370 = vrcp.f32 %v3076_v12 }
 0x415   :  { %v7359_v53 = vpop.eup %7358  ;;  %7097 = vmatpush3.msk.msra.mxu1 %vm3171_vm5, %v8951_v43  ;;  %7098 = vmatprep.mubr.msk.f32.mxu1 %vm7446_vm3, %v8949_v28  ;;  %v3148_v37 = vmul.f32 %v7357_v25, %v8377_v27 }
 0x416   :  { %7094 = vmatmul.mubr.msk.f32.vlgmr.msra.gmra.mxu0 %vm3167_vm7, %v3147_v52  ;;  %7106 = vmatprep.subr.mxu1 %v8949_v28  ;;  %v7361_v4 = vpop.eup %7360  ;;  %v3149_v63 = vmul.f32 %v7359_v53, %v8355_v22 }
 0x417   :  { %7102 = vmatpush3.msk.msra.mxu0 %vm3171_vm5, %v8952_v13  ;;  %v3082_v60 = vpop.xlane.xlu0 %3081  ;;  %7103 = vmatprep.mubr.msk.f32.mxu0 %vm7446_vm3, %v8949_v28  ;;  %v7363_v0 = vpop.eup %7362  ;;  %v3150_v27 = vmul.f32 %v7361_v4, %v8382_v49 }
 0x418   :  { %7111 = vmatprep.subr.mxu0 %v8949_v28  ;;  %7099 = vmatmul.mubr.msk.f32.vlgmr.msra.gmra.mxu1 %vm3167_vm7, %v3148_v37  ;;  %7372 = vrcp.f32 %v3082_v60  ;;  %v3151_v22 = vmul.f32 %v7363_v0, %v8364_v10 }
 0x419   :  { %7107 = vmatpush3.msk.msra.mxu1 %vm3171_vm5, %v8953_v51  ;;  %7108 = vmatprep.mubr.msk.f32.mxu1 %vm7446_vm3, %v8949_v28  ;;  %v7365_v29 = vpop.eup %7364 }
 0x41a   :  { %7104 = vmatmul.mubr.msk.f32.vlgmr.msra.gmra.mxu0 %vm3167_vm7, %v3149_v63  ;;  %7116 = vmatprep.subr.mxu1 %v8949_v28  ;;  %v7367_v48 = vpop.eup %7366  ;;  %v3152_v49 = vmul.f32 %v7365_v29, %v8389_v42 }
 0x41b   :  { %7112 = vmatpush3.msk.msra.mxu0 %vm3171_vm5, %v8954_v16  ;;  %v3088_v59 = vpop.xlane.xlu0 %3087  ;;  %7113 = vmatprep.mubr.msk.f32.mxu0 %vm7446_vm3, %v8949_v28  ;;  %v3153_v10 = vmul.f32 %v7367_v48, %v8373_v15  ;;  %v8959_v15 = vld [vmem:[#allocation23_spill] sm:$0xff] }
 0x41c   :  { %7121 = vmatprep.subr.mxu0 %v8949_v28  ;;  %7109 = vmatmul.mubr.msk.f32.vlgmr.msra.gmra.mxu1 %vm3167_vm7, %v3150_v27  ;;  %7374 = vrcp.f32 %v3088_v59 }
 0x41d   :  { %7117 = vmatpush3.msk.msra.mxu1 %vm3171_vm5, %v8955_v18  ;;  %7118 = vmatprep.mubr.msk.f32.mxu1 %vm7446_vm3, %v8949_v28  ;;  %v7369_v40 = vpop.eup %7368 }
 0x41e   :  { %7114 = vmatmul.mubr.msk.f32.vlgmr.msra.gmra.mxu0 %vm3167_vm7, %v3151_v22  ;;  %7126 = vmatprep.subr.mxu1 %v8949_v28  ;;  %v3154_v42 = vmul.f32 %v7369_v40, %v8393_v46 }
 0x41f   :  { %7122 = vmatpush3.msk.msra.mxu0 %vm3171_vm5, %v8956_v41  ;;  %v3094_v17 = vpop.xlane.xlu0 %3093  ;;  %7123 = vmatprep.mubr.msk.f32.mxu0 %vm7446_vm3, %v8949_v28 }
 0x420   :  { %7131 = vmatprep.subr.mxu0 %v8949_v28  ;;  %7119 = vmatmul.mubr.msk.f32.vlgmr.msra.gmra.mxu1 %vm3167_vm7, %v3152_v49  ;;  %7376 = vrcp.f32 %v3094_v17 }
 0x421   :  { %7127 = vmatpush3.msk.msra.mxu1 %vm3171_vm5, %v8957_v1  ;;  %7128 = vmatprep.mubr.msk.f32.mxu1 %vm7446_vm3, %v8949_v28  ;;  %v7371_v34 = vpop.eup %7370 }
 0x422   :  { %7124 = vmatmul.mubr.msk.f32.vlgmr.msra.gmra.mxu0 %vm3167_vm7, %v3153_v10  ;;  %7136 = vmatprep.subr.mxu1 %v8949_v28  ;;  %v3156_v46 = vmul.f32 %v7371_v34, %v8397_v19 }
 0x423   :  { %7132 = vmatpush3.msk.msra.mxu0 %vm3171_vm5, %v8958_v55  ;;  %7133 = vmatprep.mubr.msk.f32.mxu0 %vm7446_vm3, %v8949_v28 }
 0x424   :  { %7129 = vmatmul.mubr.msk.f32.vlgmr.msra.gmra.mxu1 %vm3167_vm7, %v3154_v42  ;;  %7141 = vmatprep.subr.mxu0 %v8949_v28 }
 0x425   :  { %7137 = vmatpush3.msk.msra.mxu1 %vm3171_vm5, %v8959_v15  ;;  %7138 = vmatprep.mubr.msk.f32.mxu1 %vm7446_vm3, %v8949_v28  ;;  %v7373_v9 = vpop.eup %7372 }
 0x426   :  { %7146 = vmatprep.subr.mxu1 %v8949_v28  ;;  %v3158_v45 = vmul.f32 %v7373_v9, %v8401_v8 }
 0x428   :  { %7139 = vmatmul.mubr.msk.f32.vlgmr.msra.gmra.mxu1 %vm3167_vm7, %v3156_v46 }
 0x429   :  { %7147 = vmatpush3.msk.msra.mxu1 %vm3171_vm5, %v8960_v5  ;;  %7148 = vmatprep.mubr.msk.f32.mxu1 %vm7446_vm3, %v8949_v28  ;;  %v7375_v47 = vpop.eup %7374 }
 0x42a   :  { %7156 = vmatprep.subr.mxu1 %v8949_v28  ;;  %v3160_v19 = vmul.f32 %v7375_v47, %v8405_v26 }
 0x42c   :  { %7149 = vmatmul.mubr.msk.f32.vlgmr.msra.gmra.mxu1 %vm3167_vm7, %v3158_v45 }
 0x42d   :  { %7157 = vmatpush3.msk.msra.mxu1 %vm3171_vm5, %v8961_v24  ;;  %7158 = vmatprep.mubr.msk.f32.mxu1 %vm7446_vm3, %v8949_v28  ;;  %v7377_v31 = vpop.eup %7376 }
 0x42e   :  { %7166 = vmatprep.subr.mxu1 %v8949_v28  ;;  %v3162_v8 = vmul.f32 %v7377_v31, %v8411_v35  ;;  %v8962_v35 = vld [vmem:[#allocation18_spill] sm:$0xff] }
 0x430   :  { %7159 = vmatmul.mubr.msk.f32.vlgmr.msra.gmra.mxu1 %vm3167_vm7, %v3160_v19 }
 0x431   :  { %7167 = vmatpush3.msk.msra.mxu1 %vm3171_vm5, %v5401_v14  ;;  %7168 = vmatprep.mubr.msk.f32.mxu1 %vm7446_vm3, %v8949_v28 }
 0x432   :  { %7176 = vmatprep.subr.mxu1 %v8949_v28 }
 0x434   :  { %7169 = vmatmul.mubr.msk.f32.vlgmr.msra.gmra.mxu1 %vm3167_vm7, %v3162_v8 }
 0x435   :  { %7178 = vmatprep.mubr.msk.f32.mxu1 %vm7446_vm3, %v8949_v28 }
 0x43b   :  { %v3073_v38 = vpop.xlane.xlu1 %3072 }
 0x43c   :  { %7378 = vrcp.f32 %v3073_v38 }
 0x43f   :  { %v3079_v26 = vpop.xlane.xlu1 %3078 }
 0x440   :  { %7380 = vrcp.f32 %v3079_v26 }
 0x443   :  { %v3085_v36 = vpop.xlane.xlu1 %3084 }
 0x444   :  { %7382 = vrcp.f32 %v3085_v36 }
 0x449   :  { %v7379_v54 = vpop.eup %7378 }
 0x44a   :  { %v3155_v7 = vmul.f32 %v7379_v54, %v8425_v33 }
 0x44b   :  { %v3100_v58 = vpop.xlane.xlu0 %3099 }
 0x44c   :  { %7134 = vmatmul.mubr.msk.f32.vlgmr.msra.gmra.mxu0 %vm3167_vm7, %v3155_v7  ;;  %7384 = vrcp.f32 %v3100_v58 }
 0x44d   :  { %v7381_v30 = vpop.eup %7380  ;;  %7142 = vmatpush3.msk.msra.mxu0 %vm3171_vm5, %v8962_v35  ;;  %7143 = vmatprep.mubr.msk.f32.mxu0 %vm7446_vm3, %v8949_v28 }
 0x44e   :  { %7151 = vmatprep.subr.mxu0 %v8949_v28  ;;  %v3157_v50 = vmul.f32 %v7381_v30, %v8430_v3 }
 0x44f   :  { %v5478_v12 = vpop.permute.xlu0 %5477 }
 0x450   :  { %7144 = vmatmul.mubr.msk.f32.vlgmr.msra.gmra.mxu0 %vm3167_vm7, %v3157_v50 }
 0x451   :  { %v7383_v44 = vpop.eup %7382  ;;  %7152 = vmatpush3.msk.msra.mxu0 %vm3171_vm5, %v8963_v61  ;;  %7153 = vmatprep.mubr.msk.f32.mxu0 %vm7446_vm3, %v8949_v28 }
 0x452   :  { %7161 = vmatprep.subr.mxu0 %v8949_v28  ;;  %v3159_v33 = vmul.f32 %v7383_v44, %v8434_v21 }
 0x454   :  { %7154 = vmatmul.mubr.msk.f32.vlgmr.msra.gmra.mxu0 %vm3167_vm7, %v3159_v33 }
 0x455   :  { %7162 = vmatpush3.msk.msra.mxu0 %vm3171_vm5, %v8444_v23  ;;  %7163 = vmatprep.mubr.msk.f32.mxu0 %vm7446_vm3, %v8949_v28 }
 0x456   :  { %7171 = vmatprep.subr.mxu0 %v8949_v28 }
 0x459   :  { %v7385_v56 = vpop.eup %7384 }
 0x45a   :  { %v3164_v11 = vmul.f32 %v7385_v56, %v8438_v39 }
 0x460   :  { %v8650_v3 = vpop.f32.mrf.mxu0 }
 0x462   :  { %v7025_v62 = vpop.f32.mrf.mxu0 }
 0x47d   :  { %v3091_v57 = vpop.xlane.xlu1 %3090 }
 0x47e   :  { %7386 = vrcp.f32 %v3091_v57 }
 0x481   :  { %v3097_v20 = vpop.xlane.xlu1 %3096 }
 0x482   :  { %7388 = vrcp.f32 %v3097_v20 }
 0x485   :  { %v5555_v21 = vpop.permute.xlu1 %5554 }
 0x486   :  { %7177 = vmatpush3.msk.msra.mxu1 %vm3171_vm5, %v5555_v21 }
 0x487   :  { %7179 = vmatmul.mubr.msk.f32.vlgmr.msra.gmra.mxu1 %vm3167_vm7, %v3164_v11  ;;  %v7452_v11 = vmov 1966171168  }
 0x48b   :  { %v7387_v23 = vpop.eup %7386 }
 0x48c   :  { %v3161_v2 = vmul.f32 %v7387_v23, %v8448_v32  ;;  %v5650_v23 = vunpack.c.l.s4 %v7452_v11 }
 0x48e   :  { %7164 = vmatmul.mubr.msk.f32.vlgmr.msra.gmra.mxu0 %vm3167_vm7, %v3161_v2  ;;  %v5652_v2 = vlaneseq }
 0x48f   :  { %v7389_v25 = vpop.eup %7388  ;;  %7172 = vmatpush3.msk.msra.mxu0 %vm3171_vm5, %v5478_v12  ;;  %7173 = vmatprep.mubr.msk.f32.mxu0 %vm7446_vm3, %v8949_v28 }
 0x490   :  { %v3163_v52 = vmul.f32 %v7389_v25, %v8458_v6  ;;  %v5651_v25 = vunpack.c.0.s8 %v5650_v23 }
 0x492   :  { %7174 = vmatmul.mubr.msk.f32.vlgmr.msra.gmra.mxu0 %vm3167_vm7, %v3163_v52  ;;  %v5653_v52 = vshrl.u32 %v5652_v2, 7 }
 0x4b4   :  { %v3317_v39 = vpop.f32.mrf.mxu1 }
 0x4b5   :  { %5632 = vrot.lane.b32.xlu0 %v3317_v39, %s7449_s20 }
 0x4b6   :  { %v7030_v53 = vpop.f32.mrf.mxu1 }
 0x4b7   :  { %v8696_v53 = vsub.s32 %v5651_v25, %v5653_v52 }
 0x4b8   :  { %v3471_v43 = vpop.f32.mrf.mxu1 }
 0x4ba   :  { %v7040_v32 = vpop.f32.mrf.mxu1 }
 0x4bc   :  { %v3625_v37 = vpop.f32.mrf.mxu1 }
 0x4bd   :  { %v3394_v4 = vpop.f32.mrf.mxu0  ;;  %5677 = vrot.lane.b32.xlu1 %v3625_v37, %s7449_s20 }
 0x4be   :  { %5636 = vrot.lane.b32.xlu0 %v3394_v4, %s7450_s21  ;;  %v7050_v13 = vpop.f32.mrf.mxu1 }
 0x4bf   :  { %v7035_v60 = vpop.f32.mrf.mxu0 }
 0x4c0   :  { %v3779_v63 = vpop.f32.mrf.mxu1 }
 0x4c1   :  { %v8665_v6 = vpop.f32.mrf.mxu0 }
 0x4c2   :  { %5640 = vrot.lane.b32.xlu0 %v3471_v43, %s7451_s22  ;;  %v7060_v0 = vpop.f32.mrf.mxu1 }
 0x4c3   :  { %v7045_v51 = vpop.f32.mrf.mxu0 }
 0x4c5   :  { %v3702_v27 = vpop.f32.mrf.mxu0 }
 0x4c6   :  { %5681 = vrot.lane.b32.xlu1 %v3702_v27, %s7450_s21 }
 0x4c7   :  { %v7055_v29 = vpop.f32.mrf.mxu0 }
 0x4c8   :  { %v3933_v16 = vpop.f32.mrf.mxu1 }
 0x4c9   :  { %5719 = vrot.lane.b32.xlu0 %v3933_v16, %s7449_s20 }
 0x4ca   :  { %v8670_v59 = vpop.f32.mrf.mxu0  ;;  %5685 = vrot.lane.b32.xlu1 %v3779_v63, %s7451_s22  ;;  %v7070_v22 = vpop.f32.mrf.mxu1 }
 0x4cc   :  { %v7065_v48 = vpop.f32.mrf.mxu0 }
 0x4ce   :  { %v4010_v18 = vpop.f32.mrf.mxu0 }
 0x4cf   :  { %5723 = vrot.lane.b32.xlu0 %v4010_v18, %s7450_s21 }
 0x4d0   :  { %v7075_v49 = vpop.f32.mrf.mxu0  ;;  %v4087_v40 = vpop.f32.mrf.mxu1 }
 0x4d2   :  { %v8674_v41 = vpop.f32.mrf.mxu0  ;;  %v7080_v17 = vpop.f32.mrf.mxu1 }
 0x4d3   :  { %5727 = vrot.lane.b32.xlu0 %v4087_v40, %s7451_s22 }
 0x4d4   :  { %v7085_v10 = vpop.f32.mrf.mxu0  ;;  %v4241_v1 = vpop.f32.mrf.mxu1 }
 0x4d5   :  { %5761 = vrot.lane.b32.xlu1 %v4241_v1, %s7449_s20 }
 0x4d6   :  { %v4318_v42 = vpop.f32.mrf.mxu0  ;;  %v7090_v34 = vpop.f32.mrf.mxu1 }
 0x4d8   :  { %v7095_v55 = vpop.f32.mrf.mxu0  ;;  %v4395_v15 = vpop.f32.mrf.mxu1 }
 0x4d9   :  { %5765 = vrot.lane.b32.xlu1 %v4318_v42, %s7450_s21 }
 0x4da   :  { %v8679_v46 = vpop.f32.mrf.mxu0  ;;  %v7100_v9 = vpop.f32.mrf.mxu1 }
 0x4dc   :  { %v7105_v5 = vpop.f32.mrf.mxu0  ;;  %v4549_v45 = vpop.f32.mrf.mxu1 }
 0x4dd   :  { %5769 = vrot.lane.b32.xlu1 %v4395_v15, %s7451_s22  ;;  %5803 = vrot.lane.b32.xlu0 %v4549_v45, %s7449_s20 }
 0x4de   :  { %v4626_v47 = vpop.f32.mrf.mxu0  ;;  %v7110_v24 = vpop.f32.mrf.mxu1 }
 0x4e0   :  { %v7115_v19 = vpop.f32.mrf.mxu0  ;;  %v4703_v31 = vpop.f32.mrf.mxu1 }
 0x4e1   :  { %5807 = vrot.lane.b32.xlu0 %v4626_v47, %s7450_s21 }
 0x4e2   :  { %v8684_v14 = vpop.f32.mrf.mxu0  ;;  %v7120_v8 = vpop.f32.mrf.mxu1 }
 0x4e4   :  { %v7125_v38 = vpop.f32.mrf.mxu0  ;;  %v4857_v26 = vpop.f32.mrf.mxu1 }
 0x4e5   :  { %5811 = vrot.lane.b32.xlu0 %v4703_v31, %s7451_s22  ;;  %5845 = vrot.lane.b32.xlu1 %v4857_v26, %s7449_s20 }
 0x4e6   :  { %v7130_v36 = vpop.f32.mrf.mxu1 }
 0x4e8   :  { %v5011_v54 = vpop.f32.mrf.mxu1 }
 0x4ea   :  { %v7140_v7 = vpop.f32.mrf.mxu1 }
 0x4ec   :  { %v5165_v30 = vpop.f32.mrf.mxu1 }
 0x4ed   :  { %5887 = vrot.lane.b32.xlu0 %v5165_v30, %s7449_s20  ;;  %v5975_v30 = vld [vmem:[%s8917_s4 + $0x18] sm:$0xff] }
 0x4ee   :  { %v7150_v35 = vpop.f32.mrf.mxu1  ;;  %7181 = vmatprep.subr.mxu0 %v5975_v30 }
 0x4ef   :  { %v5974_v35 = vld [vmem:[%s8917_s4 + $0x10] sm:$0xff]  ;;  %7182 = vmatpush3.msra.mxu0 %v5975_v30 }
 0x4f0   :  { %v5319_v50 = vpop.f32.mrf.mxu1  ;;  %7183 = vmatprep.subr.mxu0 %v5974_v35 }
 0x4f1   :  { %7184 = vmatpush3.msra.mxu0 %v5974_v35 }
 0x4f2   :  { %v7160_v44 = vpop.f32.mrf.mxu1 }
 0x4f4   :  { %v5473_v61 = vpop.f32.mrf.mxu1 }
 0x4f6   :  { %v7170_v33 = vpop.f32.mrf.mxu1 }
 0x4f7   :  { %v5973_v33 = vld [vmem:[%s8917_s4 + $0x8] sm:$0xff] }
 0x4f8   :  { %7185 = vmatprep.subr.mxu0 %v5973_v33 }
 0x4f9   :  { %7186 = vmatpush3.msra.mxu0 %v5973_v33  ;;  %v6223_v33 = vld [vmem:[%s8921_s8 + $0x78] sm:$0xff] }
 0x50c   :  { %v4934_v62 = vpop.f32.mrf.mxu0 }
 0x50d   :  { %5849 = vrot.lane.b32.xlu1 %v4934_v62, %s7450_s21 }
 0x50e   :  { %v7135_v58 = vpop.f32.mrf.mxu0 }
 0x510   :  { %v8690_v57 = vpop.f32.mrf.mxu0 }
 0x511   :  { %5853 = vrot.lane.b32.xlu1 %v5011_v54, %s7451_s22 }
 0x512   :  { %v7145_v20 = vpop.f32.mrf.mxu0 }
 0x513   :  { %v5972_v20 = vld [vmem:[%s8917_s4] sm:$0xff] }
 0x514   :  { %v5242_v56 = vpop.f32.mrf.mxu0  ;;  %7187 = vmatprep.subr.mxu0 %v5972_v20 }
 0x515   :  { %5929 = vrot.lane.b32.xlu1 %v5473_v61, %s7449_s20  ;;  %5891 = vrot.lane.b32.xlu0 %v5242_v56, %s7450_s21 }
 0x516   :  { %v7155_v21 = vpop.f32.mrf.mxu0  ;;  %7188 = vmatpush3.msra.mxu0 %v5972_v20  ;;  %v6220_v20 = vld [vmem:[%s8921_s8 + $0x60] sm:$0xff] }
 0x517   :  { %7203 = vmatprep.subr.mxu0 %v6223_v33 }
 0x519   :  { %5895 = vrot.lane.b32.xlu0 %v5319_v50, %s7451_s22 }
 0x527   :  { %v5633_v12 = vpop.permute.xlu0 %5632 }
 0x528   :  { %v5643_v43 = vsel %vm287_vm4, %v8650_v3, %v5633_v12 }
 0x52f   :  { %v5678_v37 = vpop.permute.xlu1 %5677 }
 0x530   :  { %v5637_v39 = vpop.permute.xlu0 %5636  ;;  %v5688_v3 = vsel %vm287_vm4, %v8665_v6, %v5678_v37 }
 0x531   :  { %v5645_v32 = vsel %vm5644_vm8, %v5643_v43, %v5637_v39 }
 0x534   :  { %v5641_v4 = vpop.permute.xlu0 %5640 }
 0x535   :  { %v5647_v13 = vsel %vm5646_vm9, %v5645_v32, %v5641_v4 }
 0x536   :  { %v5655_v60 = vrot.slane %v5647_v13, %v8696_v53 }
 0x538   :  { %v5656_v63 = vcombine.high %v5655_v60, %v5655_v60  ;;  %v5663_v0 = vrot.slane %v5655_v60, %v8696_v53  ;;  %v5682_v51 = vpop.permute.xlu1 %5681 }
 0x539   :  { %v5689_v16 = vsel %vm5644_vm8, %v5688_v3, %v5682_v51 }
 0x53a   :  { %v5670_v27 = vrot.slane %v5656_v63, %v8696_v53  ;;  %5674 = vst.msk [vmem:[#allocation3] sm:$0x1] %vm5673_vm10, %v5663_v0 }
 0x53b   :  { %v5720_v29 = vpop.permute.xlu0 %5719 }
 0x53c   :  { %5675 = vst.msk [vmem:[#allocation3 + $0x8] sm:$0x1] %vm5673_vm10, %v5670_v27  ;;  %v5686_v22 = vpop.permute.xlu1 %5685  ;;  %v5730_v6 = vsel %vm287_vm4, %v8670_v59, %v5720_v29 }
 0x53d   :  { %v5690_v48 = vsel %vm5646_vm9, %v5689_v16, %v5686_v22 }
 0x53e   :  { %v5698_v18 = vrot.slane %v5690_v48, %v8696_v53 }
 0x540   :  { %v5699_v49 = vcombine.high %v5698_v18, %v5698_v18  ;;  %v5706_v40 = vrot.slane %v5698_v18, %v8696_v53 }
 0x541   :  { %v5724_v17 = vpop.permute.xlu0 %5723 }
 0x542   :  { %v5713_v10 = vrot.slane %v5699_v49, %v8696_v53  ;;  %5716 = vst.msk [vmem:[#allocation3 + $0x1] sm:$0x1] %vm5673_vm10, %v5706_v40  ;;  %v5731_v1 = vsel %vm5644_vm8, %v5730_v6, %v5724_v17 }
 0x544   :  { %5717 = vst.msk [vmem:[#allocation3 + $0x9] sm:$0x1] %vm5673_vm10, %v5713_v10 }
 0x545   :  { %v5728_v42 = vpop.permute.xlu0 %5727 }
 0x546   :  { %v5732_v34 = vsel %vm5646_vm9, %v5731_v1, %v5728_v42 }
 0x547   :  { %v5740_v55 = vrot.slane %v5732_v34, %v8696_v53  ;;  %v5627_v15 = vpop.f32.mrf.mxu1  ;;  %v5762_v9 = vpop.permute.xlu1 %5761 }
 0x548   :  { %v5772_v19 = vsel %vm287_vm4, %v8674_v41, %v5762_v9 }
 0x549   :  { %v5741_v5 = vcombine.high %v5740_v55, %v5740_v55  ;;  %v5748_v45 = vrot.slane %v5740_v55, %v8696_v53  ;;  %v7180_v47 = vpop.f32.mrf.mxu1 }
 0x54b   :  { %v5755_v24 = vrot.slane %v5741_v5, %v8696_v53  ;;  %5758 = vst.msk [vmem:[#allocation3 + $0x2] sm:$0x1] %vm5673_vm10, %v5748_v45  ;;  %v5766_v59 = vpop.permute.xlu1 %5765  ;;  %v6667_v45 = vld [vmem:[%s8918_s5] ss:$0 sm:$0xff] }
 0x54c   :  { %v5773_v8 = vsel %vm5644_vm8, %v5772_v19, %v5766_v59  ;;  %v8964_v19 = vld [vmem:[#allocation11_spill] sm:$0xff] }
 0x54d   :  { %5759 = vst.msk [vmem:[#allocation3 + $0xa] sm:$0x1] %vm5673_vm10, %v5755_v24 }
 0x54e   :  { %v8727_v31 = vpop.f32.mrf.mxu0 }
 0x54f   :  { %v5804_v38 = vpop.permute.xlu0 %5803  ;;  %v5770_v26 = vpop.permute.xlu1 %5769 }
 0x550   :  { %v7165_v36 = vpop.f32.mrf.mxu0  ;;  %v5774_v54 = vsel %vm5646_vm9, %v5773_v8, %v5770_v26  ;;  %v5814_v56 = vsel %vm287_vm4, %v8679_v46, %v5804_v38  ;;  %v8965_v8 = vld [vmem:[#allocation10_spill] sm:$0xff] }
 0x551   :  { %v5782_v7 = vrot.slane %v5774_v54, %v8696_v53 }
 0x552   :  { %v5550_v41 = vpop.f32.mrf.mxu0 }
 0x553   :  { %v5783_v50 = vcombine.high %v5782_v7, %v5782_v7  ;;  %v5790_v44 = vrot.slane %v5782_v7, %v8696_v53  ;;  %5933 = vrot.lane.b32.xlu1 %v5550_v41, %s7450_s21  ;;  %v5808_v61 = vpop.permute.xlu0 %5807  ;;  %v6117_v41 = vld [vmem:[%s8919_s6 + $0x18] sm:$0xff] }
 0x554   :  { %v7175_v62 = vpop.f32.mrf.mxu0  ;;  %v5815_v21 = vsel %vm5644_vm8, %v5814_v56, %v5808_v61  ;;  %7192 = vmatprep.subr.mxu1 %v6117_v41  ;;  %v6114_v61 = vld [vmem:[%s8919_s6] sm:$0xff]  ;;  %v6219_v56 = vld [vmem:[%s8921_s8 + $0x58] sm:$0xff] }
 0x555   :  { %v5797_v58 = vrot.slane %v5783_v50, %v8696_v53  ;;  %5800 = vst.msk [vmem:[#allocation3 + $0x3] sm:$0x1] %vm5673_vm10, %v5790_v44  ;;  %v6116_v50 = vld [vmem:[%s8919_s6 + $0x10] sm:$0xff]  ;;  %7193 = vmatpush3.msra.mxu1 %v6117_v41  ;;  %v6115_v44 = vld [vmem:[%s8919_s6 + $0x8] sm:$0xff] }
 0x556   :  { %7194 = vmatprep.subr.mxu1 %v6116_v50  ;;  %v6222_v62 = vld [vmem:[%s8921_s8 + $0x70] sm:$0xff] }
 0x557   :  { %5801 = vst.msk [vmem:[#allocation3 + $0xb] sm:$0x1] %vm5673_vm10, %v5797_v58  ;;  %5937 = vrot.lane.b32.xlu1 %v5627_v15, %s7451_s22  ;;  %v5812_v11 = vpop.permute.xlu0 %5811  ;;  %v5846_v52 = vpop.permute.xlu1 %5845  ;;  %7195 = vmatpush3.msra.mxu1 %v6116_v50  ;;  %v6221_v58 = vld [vmem:[%s8921_s8 + $0x68] sm:$0xff] }
 0x558   :  { %v5816_v23 = vsel %vm5646_vm9, %v5815_v21, %v5812_v11  ;;  %v5856_v43 = vsel %vm287_vm4, %v8684_v14, %v5846_v52  ;;  %7196 = vmatprep.subr.mxu1 %v6115_v44  ;;  %v6218_v21 = vld [vmem:[%s8921_s8 + $0x50] sm:$0xff]  ;;  %v6217_v11 = vld [vmem:[%s8921_s8 + $0x48] sm:$0xff] }
 0x559   :  { %v5824_v2 = vrot.slane %v5816_v23, %v8696_v53  ;;  %7197 = vmatpush3.msra.mxu1 %v6115_v44  ;;  %v6216_v23 = vld [vmem:[%s8921_s8 + $0x40] sm:$0xff] }
 0x55a   :  { %7198 = vmatprep.subr.mxu1 %v6114_v61 }
 0x55b   :  { %v5825_v12 = vcombine.high %v5824_v2, %v5824_v2  ;;  %v5832_v25 = vrot.slane %v5824_v2, %v8696_v53  ;;  %7199 = vmatpush3.msra.mxu1 %v6114_v61  ;;  %v6215_v2 = vld [vmem:[%s8921_s8 + $0x38] sm:$0xff] }
 0x55c   :  { %7238 = vmatprep.subr.mxu1 %v8949_v28 }
 0x55d   :  { %v5839_v46 = vrot.slane %v5825_v12, %v8696_v53  ;;  %5842 = vst.msk [vmem:[#allocation3 + $0x4] sm:$0x1] %vm5673_vm10, %v5832_v25  ;;  %v6214_v12 = vld [vmem:[%s8921_s8 + $0x30] sm:$0xff]  ;;  %v6213_v25 = vld [vmem:[%s8921_s8 + $0x28] sm:$0xff] }
 0x55f   :  { %5843 = vst.msk [vmem:[#allocation3 + $0xc] sm:$0x1] %vm5673_vm10, %v5839_v46  ;;  %v5888_v32 = vpop.permute.xlu0 %5887  ;;  %v6212_v46 = vld [vmem:[%s8921_s8 + $0x20] sm:$0xff] }
 0x560   :  { %v5898_v3 = vsel %vm287_vm4, %v8690_v57, %v5888_v32 }
 0x57f   :  { %v5850_v39 = vpop.permute.xlu1 %5849 }
 0x580   :  { %v5857_v37 = vsel %vm5644_vm8, %v5856_v43, %v5850_v39 }
 0x583   :  { %v5854_v4 = vpop.permute.xlu1 %5853 }
 0x584   :  { %v5858_v13 = vsel %vm5646_vm9, %v5857_v37, %v5854_v4 }
 0x585   :  { %v5866_v60 = vrot.slane %v5858_v13, %v8696_v53 }
 0x587   :  { %v5867_v63 = vcombine.high %v5866_v60, %v5866_v60  ;;  %v5874_v0 = vrot.slane %v5866_v60, %v8696_v53  ;;  %v5892_v51 = vpop.permute.xlu0 %5891  ;;  %v5930_v40 = vpop.permute.xlu1 %5929 }
 0x588   :  { %v5899_v14 = vsel %vm5644_vm8, %v5898_v3, %v5892_v51  ;;  %v5940_v17 = vsel %vm287_vm4, %v8727_v31, %v5930_v40 }
 0x589   :  { %v5881_v27 = vrot.slane %v5867_v63, %v8696_v53  ;;  %5884 = vst.msk [vmem:[#allocation3 + $0x5] sm:$0x1] %vm5673_vm10, %v5874_v0 }
 0x58b   :  { %5885 = vst.msk [vmem:[#allocation3 + $0xd] sm:$0x1] %vm5673_vm10, %v5881_v27  ;;  %v5896_v29 = vpop.permute.xlu0 %5895 }
 0x58c   :  { %v5900_v16 = vsel %vm5646_vm9, %v5899_v14, %v5896_v29 }
 0x58d   :  { %v5908_v22 = vrot.slane %v5900_v16, %v8696_v53 }
 0x58f   :  { %v5909_v48 = vcombine.high %v5908_v22, %v5908_v22  ;;  %v5916_v18 = vrot.slane %v5908_v22, %v8696_v53  ;;  %v6670_v22 = vld [vmem:[%s8923_s10] ss:$0 sm:$0xff] }
 0x591   :  { %v5923_v49 = vrot.slane %v5909_v48, %v8696_v53  ;;  %5926 = vst.msk [vmem:[#allocation3 + $0x6] sm:$0x1] %vm5673_vm10, %v5916_v18  ;;  %v6671_v18 = vld [vmem:[%s8924_s11] ss:$0 sm:$0xff] }
 0x593   :  { %5927 = vst.msk [vmem:[#allocation3 + $0xe] sm:$0x1] %vm5673_vm10, %v5923_v49 }
 0x5c5   :  { %v5934_v57 = vpop.permute.xlu1 %5933 }
 0x5c6   :  { %v5941_v10 = vsel %vm5644_vm8, %v5940_v17, %v5934_v57 }
 0x5c9   :  { %v5938_v6 = vpop.permute.xlu1 %5937 }
 0x5ca   :  { %v5942_v1 = vsel %vm5646_vm9, %v5941_v10, %v5938_v6 }
 0x5cb   :  { %v5950_v42 = vrot.slane %v5942_v1, %v8696_v53 }
 0x5cd   :  { %v5951_v34 = vcombine.high %v5950_v42, %v5950_v42  ;;  %v5958_v55 = vrot.slane %v5950_v42, %v8696_v53  ;;  %v6211_v42 = vld [vmem:[%s8921_s8 + $0x18] sm:$0xff] }
 0x5cf   :  { %v5965_v15 = vrot.slane %v5951_v34, %v8696_v53  ;;  %5968 = vst.msk [vmem:[#allocation3 + $0x7] sm:$0x1] %vm5673_vm10, %v5958_v55  ;;  %v6210_v34 = vld [vmem:[%s8921_s8 + $0x10] sm:$0xff]  ;;  %v6209_v55 = vld [vmem:[%s8921_s8 + $0x8] sm:$0xff] }
 0x5d1   :  { %5969 = vst.msk [vmem:[#allocation3 + $0xf] sm:$0x1] %vm5673_vm10, %v5965_v15  ;;  %v6208_v15 = vld [vmem:[%s8921_s8] sm:$0xff] }
 0x5d6   :  { %v5970_v9 = vld [vmem:[#allocation3] sm:$0xff] }
 0x5d7   :  { %7189 = vmatprep.mubr.msk.f32.mxu0 %vm56_vm0, %v5970_v9  ;;  %v6672_v9 = vld [vmem:[%s8920_s7] ss:$0 sm:$0xff] }
 0x5d8   :  { %v5971_v5 = vld [vmem:[#allocation3 + $0x8] sm:$0xff] }
 0x5d9   :  { %7190 = vmatmul.mubr.msk.f32.vlgmr.msra.gmra.mxu0 %vm56_vm0, %v5971_v5 }
 0x5da   :  { %7204 = vmatpush3.msra.mxu0 %v6223_v33 }
 0x5db   :  { %7205 = vmatprep.subr.mxu0 %v6222_v62 }
 0x5dc   :  { %7206 = vmatpush3.msra.mxu0 %v6222_v62 }
 0x5dd   :  { %7207 = vmatprep.subr.mxu0 %v6221_v58 }
 0x5de   :  { %7208 = vmatpush3.msra.mxu0 %v6221_v58 }
 0x5df   :  { %7209 = vmatprep.subr.mxu0 %v6220_v20 }
 0x5e0   :  { %7210 = vmatpush3.msra.mxu0 %v6220_v20 }
 0x5e1   :  { %7211 = vmatprep.subr.mxu0 %v6219_v56 }
 0x5e2   :  { %7212 = vmatpush3.msra.mxu0 %v6219_v56 }
 0x5e3   :  { %7213 = vmatprep.subr.mxu0 %v6218_v21 }
 0x5e4   :  { %7214 = vmatpush3.msra.mxu0 %v6218_v21 }
 0x5e5   :  { %7215 = vmatprep.subr.mxu0 %v6217_v11 }
 0x5e6   :  { %7216 = vmatpush3.msra.mxu0 %v6217_v11 }
 0x5e7   :  { %7217 = vmatprep.subr.mxu0 %v6216_v23 }
 0x5e8   :  { %7218 = vmatpush3.msra.mxu0 %v6216_v23 }
 0x5e9   :  { %7219 = vmatprep.subr.mxu0 %v6215_v2 }
 0x5ea   :  { %7220 = vmatpush3.msra.mxu0 %v6215_v2 }
 0x5eb   :  { %7221 = vmatprep.subr.mxu0 %v6214_v12 }
 0x5ec   :  { %7222 = vmatpush3.msra.mxu0 %v6214_v12 }
 0x5ed   :  { %7223 = vmatprep.subr.mxu0 %v6213_v25 }
 0x5ee   :  { %7224 = vmatpush3.msra.mxu0 %v6213_v25 }
 0x5ef   :  { %7225 = vmatprep.subr.mxu0 %v6212_v46 }
 0x5f0   :  { %7226 = vmatpush3.msra.mxu0 %v6212_v46 }
 0x5f1   :  { %7227 = vmatprep.subr.mxu0 %v6211_v42 }
 0x5f2   :  { %7228 = vmatpush3.msra.mxu0 %v6211_v42 }
 0x5f3   :  { %7229 = vmatprep.subr.mxu0 %v6210_v34 }
 0x5f4   :  { %7230 = vmatpush3.msra.mxu0 %v6210_v34 }
 0x5f5   :  { %7231 = vmatprep.subr.mxu0 %v6209_v55 }
 0x5f6   :  { %7232 = vmatpush3.msra.mxu0 %v6209_v55 }
 0x5f7   :  { %7233 = vmatprep.subr.mxu0 %v6208_v15 }
 0x5f8   :  { %7234 = vmatpush3.msra.mxu0 %v6208_v15 }
 0x699   :  { %v7191_v47 = vpop.f32.mrf.mxu0 }
 0x69a   :  { %v6061_v24 = vadd.f32 %v7191_v47, %v6667_v45 }
 0x69b   :  { %v6055_v59 = vpop.f32.mrf.mxu0 }
 0x69c   :  { %v8792_v31 = vadd.f32 %v6061_v24, %v8964_v19  ;;  %v6056_v53 = vadd.f32 %v6667_v45, %v6055_v59 }
 0x69e   :  { %v8795_v38 = vadd.f32 %v6056_v53, %v8965_v8  ;;  %v6071_v26 = vsel %vm56_vm0, %v8792_v31, 0.0  ;;  %v6077_v30 = vmul.f32 %v8792_v31, %v8792_v31 }
 0x69f   :  { %6072 = vadd.xlane.f32.xlu1 %v6071_v26 }
 0x6a0   :  { %v6068_v36 = vsel %vm56_vm0, %v8795_v38, 0.0  ;;  %v6076_v54 = vmul.f32 %v8795_v38, %v8795_v38  ;;  %v6081_v35 = vsel %vm56_vm0, %v6077_v30, 0.0 }
 0x6a1   :  { %6069 = vadd.xlane.f32.xlu0 %v6068_v36 }
 0x6a2   :  { %v6078_v7 = vsel %vm56_vm0, %v6076_v54, 0.0 }
 0x6a5   :  { %6079 = vadd.xlane.f32.xlu0 %v6078_v7 }
 0x6a9   :  { %6082 = vadd.xlane.f32.xlu0 %v6081_v35 }
 0x728   :  { %v6073_v43 = vpop.xlane.xlu1 %6072 }
 0x729   :  { %v6075_v37 = vmul.f32 0.03125, %v6073_v43 }
 0x72a   :  { %v6070_v52 = vpop.xlane.xlu0 %6069 }
 0x72b   :  { %v6074_v39 = vmul.f32 0.03125, %v6070_v52  ;;  %v6087_v0 = vmul.f32 %v6075_v37, %v6075_v37  ;;  %v6091_v49 = vsub.f32 %v8792_v31, %v6075_v37  ;;  %v6675_v31 = vld [vmem:[%s8922_s9] ss:$0 sm:$0xff] }
 0x72d   :  { %v6086_v4 = vmul.f32 %v6074_v39, %v6074_v39  ;;  %v6090_v29 = vsub.f32 %v8795_v38, %v6074_v39 }
 0x72e   :  { %v6080_v32 = vpop.xlane.xlu0 %6079 }
 0x72f   :  { %v6084_v13 = vmul.f32 0.03125, %v6080_v32  ;;  %v6676_v32 = vld [vmem:[%s8925_s12] ss:$0 sm:$0xff]  ;;  %s7453_s12 = smov [#allocation4]  }
 0x731   :  { %v6088_v60 = vsub.f32 %v6084_v13, %v6086_v4  ;;  %v6677_v4 = vld [vmem:[%s8926_s13] ss:$0 sm:$0xff]  ;;  %s6509_s13 = sshll.u32 %s7453_s12, 4  ;;  %s6510_s13 = int_to_ptr.vmem [resolvable:$true] %s6509_s13 }
 0x732   :  { %v6083_v63 = vpop.xlane.xlu0 %6082  ;;  %s7398_s3 = scalar_lea.vmem %s6510_s13, 256  ;;  %p7403_p1 = scmp.lt.s32.totalorder %s6510_s13, %s6510_s13 }
 0x733   :  { %v6092_v51 = vadd.f32 1e-05, %v6088_v60  ;;  %v6085_v27 = vmul.f32 0.03125, %v6083_v63  ;;  %p7399_p0 = scmp.ne.s32.totalorder %s6510_s13, %s7398_s3  ;;  %p7404_p2 = scmp.lt.s32.totalorder %s7398_s3, %s7398_s3 }
 0x735   :  { %7390 = vrsqrt.f32 %v6092_v51  ;;  %v6089_v3 = vsub.f32 %v6085_v27, %v6087_v0  ;;  %p7405_p3 = por %p7404_p2, %p7403_p1 }
 0x737   :  { %v6093_v14 = vadd.f32 1e-05, %v6089_v3  ;;  %p7406_p4 = pnand %p7405_p3, %p7399_p0 }
 0x739   :  { %7392 = vrsqrt.f32 %v6093_v14 }
 0x742   :  { %v7391_v16 = vpop.eup %7390 }
 0x743   :  { %v6096_v48 = vmul.f32 %v7391_v16, %v6090_v29 }
 0x745   :  { %v6104_v40 = vmul.f32 %v6670_v22, %v6096_v48 }
 0x746   :  { %v7393_v57 = vpop.eup %7392 }
 0x747   :  { %v6097_v17 = vmul.f32 %v7393_v57, %v6091_v49  ;;  %v6112_v10 = vadd.f32 %v6671_v18, %v6104_v40 }
 0x749   :  { %v6105_v6 = vmul.f32 %v6670_v22, %v6097_v17  ;;  %7200 = vmatprep.mubr.msk.f32.mxu1 %vm56_vm0, %v6112_v10 }
 0x74b   :  { %v6113_v1 = vadd.f32 %v6671_v18, %v6105_v6 }
 0x74d   :  { %7201 = vmatmul.mubr.msk.f32.vlgmr.msra.gmra.mxu1 %vm56_vm0, %v6113_v1 }
 0x74e   :  { %7240 = vmatprep.mubr.msk.f32.mxu1 %vm7446_vm3, %v8949_v28 }
 0x80d   :  { %v7202_v5 = vpop.f32.mrf.mxu1 }
 0x80e   :  { %v6203_v45 = vadd.f32 %v7202_v5, %v6672_v9 }
 0x80f   :  { %v6197_v47 = vpop.f32.mrf.mxu1 }
 0x810   :  { %v6198_v24 = vadd.f32 %v6672_v9, %v6197_v47  ;;  %v6207_v19 = vmax.f32 %v6203_v45, 0.0 }
 0x812   :  { %v6206_v59 = vmax.f32 %v6198_v24, 0.0 }
 0x814   :  { %7235 = vmatprep.mubr.f32.mxu0 %v6206_v59 }
 0x815   :  { %7236 = vmatmul.mubr.f32.vlgmr.msra.gmra.mxu0 %v6207_v19 }
 0x8d5   :  { %v7237_v53 = vpop.f32.mrf.mxu0 }
 0x8d6   :  { %v6303_v8 = vadd.f32 %v7237_v53, %v6675_v31 }
 0x8d7   :  { %v6297_v38 = vpop.f32.mrf.mxu0 }
 0x8d8   :  { %v6298_v26 = vadd.f32 %v6675_v31, %v6297_v38  ;;  %v6307_v36 = vadd.f32 %v6303_v8, %v6113_v1 }
 0x8da   :  { %v6306_v54 = vadd.f32 %v6298_v26, %v6112_v10  ;;  %v6319_v41 = vmul.f32 %v6307_v36, %v6307_v36  ;;  %v6313_v50 = vsel %vm56_vm0, %v6307_v36, 0.0 }
 0x8dc   :  { %v6310_v7 = vsel %vm56_vm0, %v6306_v54, 0.0  ;;  %v6318_v30 = vmul.f32 %v6306_v54, %v6306_v54  ;;  %v6323_v44 = vsel %vm56_vm0, %v6319_v41, 0.0 }
 0x8dd   :  { %6311 = vadd.xlane.f32.xlu1 %v6310_v7 }
 0x8de   :  { %v6320_v35 = vsel %vm56_vm0, %v6318_v30, 0.0 }
 0x8df   :  { %6321 = vadd.xlane.f32.xlu0 %v6320_v35 }
 0x8e1   :  { %6314 = vadd.xlane.f32.xlu1 %v6313_v50 }
 0x8e3   :  { %6324 = vadd.xlane.f32.xlu0 %v6323_v44 }
 0x966   :  { %v6312_v61 = vpop.xlane.xlu1 %6311 }
 0x967   :  { %v6316_v33 = vmul.f32 0.03125, %v6312_v61 }
 0x968   :  { %v6322_v62 = vpop.xlane.xlu0 %6321 }
 0x969   :  { %v6328_v58 = vmul.f32 %v6316_v33, %v6316_v33  ;;  %v6326_v20 = vmul.f32 0.03125, %v6322_v62  ;;  %v6332_v39 = vsub.f32 %v6306_v54, %v6316_v33 }
 0x96a   :  { %v6315_v56 = vpop.xlane.xlu1 %6314 }
 0x96b   :  { %v6330_v21 = vsub.f32 %v6326_v20, %v6328_v58  ;;  %v6317_v11 = vmul.f32 0.03125, %v6315_v56 }
 0x96c   :  { %v6325_v23 = vpop.xlane.xlu0 %6324 }
 0x96d   :  { %v6334_v2 = vadd.f32 1e-05, %v6330_v21  ;;  %v6329_v12 = vmul.f32 %v6317_v11, %v6317_v11  ;;  %v6327_v25 = vmul.f32 0.03125, %v6325_v23  ;;  %v6333_v13 = vsub.f32 %v6307_v36, %v6317_v11 }
 0x96f   :  { %7394 = vrsqrt.f32 %v6334_v2  ;;  %v6331_v46 = vsub.f32 %v6327_v25, %v6329_v12 }
 0x971   :  { %v6335_v52 = vadd.f32 1e-05, %v6331_v46 }
 0x973   :  { %7396 = vrsqrt.f32 %v6335_v52 }
 0x97c   :  { %v7395_v43 = vpop.eup %7394 }
 0x97d   :  { %v6338_v37 = vmul.f32 %v7395_v43, %v6332_v39 }
 0x97f   :  { %v6346_v60 = vmul.f32 %v6676_v32, %v6338_v37 }
 0x980   :  { %v7397_v63 = vpop.eup %7396 }
 0x981   :  { %v6354_v0 = vadd.f32 %v6677_v4, %v6346_v60  ;;  %v6339_v51 = vmul.f32 %v7397_v63, %v6333_v13 }
 0x983   :  { %7239 = vmatpush3.xpose.msk.msra.mxu1 %vm56_vm0, %v6354_v0  ;;  %v6347_v27 = vmul.f32 %v6676_v32, %v6339_v51 }
 0x984   :  { %7243 = vmatprep.subr.mxu1 %v8949_v28 }
 0x985   :  { %v6355_v3 = vadd.f32 %v6677_v4, %v6347_v27 }
 0x986   :  { %7241 = vmatmul.mubr.msk.f32.vlgmr.msra.gmra.mxu1 %vm56_vm0, %v6354_v0 }
 0x987   :  { %7244 = vmatpush3.xpose.msk.msra.mxu1 %vm56_vm0, %v6355_v3  ;;  %7245 = vmatprep.mubr.msk.f32.mxu1 %vm7446_vm3, %v8949_v28 }
 0x98a   :  { %7246 = vmatmul.mubr.msk.f32.vlgmr.msra.gmra.mxu1 %vm56_vm0, %v6355_v3 }
 0x98b   :  { %7409 = shalt.err (!%p7406_p4)
}
 0x98c   :  { %s7454_s18 = smov 128   ;;  %s7455_s22 = smov [#allocation6]  }
 0x98d   :  { %6515 = dma.vmem_to_hbm [thread:$0]  %s6510_s13, 256, %s8927_s14, [#allocation5], %s7454_s18, %s7454_s18, %s7449_s20  }
 0x98e   :  { %s6521_s23 = sshll.u32 %s7455_s22, 4  ;;  %s6522_s23 = int_to_ptr.vmem [resolvable:$true] %s6521_s23 }
 0x98f   :  { %s7418_s24 = scalar_lea.vmem %s6522_s23, 256  ;;  %p7423_p6 = scmp.lt.s32.totalorder %s6522_s23, %s6522_s23 }
 0x990   :  { %p7419_p5 = scmp.ne.s32.totalorder %s6522_s23, %s7418_s24  ;;  %p7424_p7 = scmp.lt.s32.totalorder %s7418_s24, %s7418_s24 }
 0x992   :  { %p7425_p8 = por %p7424_p7, %p7423_p6 }
 0x994   :  { %p7426_p9 = pnand %p7425_p8, %p7419_p5 }
 0xa46   :  { %v6425_v14 = vpop.f32.mrf.mxu1 }
 0xa47   :  { %6502 = vst.msk [vmem:[#allocation6] sm:$0xff] %vm287_vm4, %v6425_v14 }
 0xa48   :  { %v7242_v28 = vpop.f32.mrf.mxu1 }
 0xa4a   :  { %v6498_v29 = vpop.f32.mrf.mxu1 }
 0xa4b   :  { %6503 = vst.msk [vmem:[#allocation6 + $0x8] sm:$0xff] %vm287_vm4, %v6498_v29 }
 0xa4c   :  { %v7247_v16 = vpop.f32.mrf.mxu1 }
 0xa4d   :  { %7429 = shalt.err (!%p7426_p9)
}
 0xa4e   :  { %6527 = dma.vmem_to_hbm [thread:$0]  %s6522_s23, 256, %s8928_s15, [#allocation7], %s7454_s18, %s7454_s18, %s7449_s20  }
 0xa4f   :  { %7438 = dma.done.wait [#allocation5], 256  }
 0xa50   :  { %7439 = vsyncadd [#allocation5], 4294967040 }
 0xa51   :  { %7440 = dma.done.wait [#allocation7], 256  }
 0xa52   :  { %7441 = vsyncadd [#allocation7], 4294967040 }
 0xa53   :  { %6534 = vsyncpa [#allocation5], 1 }
 0xa54   :  { %6535 = vsyncpa [#allocation7], 1 }

</bundles_post_ra>
